<compile_context>
chip_gen: v6e
topology: v6e:2x2x1
jax: 0.10.0
libtpu: 0.0.40
codegen_flags: <defaults>
</compile_context>

<pallas_src>
import jax
import jax.numpy as jnp
from jax.experimental import pallas as pl
from jax.experimental.pallas import tpu as pltpu


C_IN, C1, C2, NUM_CLASSES = 4, 16, 32, 5


# ----------------------------------------------------------------------------
# Fused Pallas kernel: whole FCN forward for one batch element per grid step.
# ----------------------------------------------------------------------------
def _fcn_fused_kernel(x_ref,
                      gt1_ref, w1_ref, sh1_ref,
                      gt2_ref, w2_ref, sh2_ref,
                      gtc_ref, wc1_ref, shc1_ref, wc2_ref, bc2_ref, uto_ref,
                      gta_ref, wa1_ref, sha1_ref, wa2_ref, ba2_ref, uta_ref,
                      out_ref, aux_ref):
    def conv3x3_bn_relu(xT, gt_ref, w_ref, sh_ref):
        # xT: [Cin, HW]; gt_ref: [9, HW, HoWo] tap gather mats (padding = zero rows)
        # w_ref: [9, Cout, Cin] BN-scale-folded taps; sh_ref: [Cout, 1] BN shift.
        cout = w_ref.shape[1]
        howo = gt_ref.shape[2]
        acc = jnp.zeros((cout, howo), jnp.float32)
        for t in range(9):  # static unroll: 9 tap matmul-accumulates, all on MXU
            patch = jnp.dot(xT, gt_ref[t], preferred_element_type=jnp.float32)
            acc = acc + jnp.dot(w_ref[t], patch, preferred_element_type=jnp.float32)
        return jnp.maximum(acc + sh_ref[...], 0.0)

    xT = x_ref[...]                                                   # [C_IN, H*W]

    # --- backbone (stride-2 conv-BN-ReLU stages) ---
    f_aux = conv3x3_bn_relu(xT, gt1_ref, w1_ref, sh1_ref)             # [C1, H/2*W/2]
    f_out = conv3x3_bn_relu(f_aux, gt2_ref, w2_ref, sh2_ref)          # [C2, H/4*W/4]

    # --- classifier FCNHead on features['out'] ---
    h = conv3x3_bn_relu(f_out, gtc_ref, wc1_ref, shc1_ref)            # [C2//4, H/4*W/4]
    # Dropout(0.1) is identity in eval mode
    logits = jnp.dot(wc2_ref[...], h,
                     preferred_element_type=jnp.float32) + bc2_ref[...]   # [5, H/4*W/4]
    out_ref[...] = jnp.dot(logits, uto_ref[...],
                           preferred_element_type=jnp.float32)            # [5, H*W]

    # --- aux FCNHead on features['aux'] ---
    ha = conv3x3_bn_relu(f_aux, gta_ref, wa1_ref, sha1_ref)           # [C1//4, H/2*W/2]
    alog = jnp.dot(wa2_ref[...], ha,
                   preferred_element_type=jnp.float32) + ba2_ref[...]     # [5, H/2*W/2]
    aux_ref[...] = jnp.dot(alog, uta_ref[...],
                           preferred_element_type=jnp.float32)            # [5, H*W]


# ----------------------------------------------------------------------------
# Constant / parameter preparation (runs once, outside the hot path)
# ----------------------------------------------------------------------------
def _conv3x3_gather_T(H, W, stride):
    """For each of the 9 taps, a [H*W, Ho*Wo] 0/1 matrix G^T so that
    patch_t^T = x^T @ G_t^T gathers the (zero-padded) input pixel of each output."""
    Ho = (H + 2 - 3) // stride + 1
    Wo = (W + 2 - 3) // stride + 1
    ho = jnp.arange(Ho)
    wo = jnp.arange(Wo)
    pix = jnp.arange(H * W)
    mats = []
    for ki in range(3):
        for kj in range(3):
            hi = stride * ho + ki - 1
            wi = stride * wo + kj - 1
            valid = ((hi >= 0) & (hi < H))[:, None] & ((wi >= 0) & (wi < W))[None, :]
            src = jnp.clip(hi, 0, H - 1)[:, None] * W + jnp.clip(wi, 0, W - 1)[None, :]
            g = (pix[:, None] == src.reshape(1, -1)) & valid.reshape(1, -1)
            mats.append(g.astype(jnp.float32))
    return jnp.stack(mats, axis=0), Ho, Wo          # [9, H*W, Ho*Wo]


def _fold_conv_bn_T(w, bn, eps=1e-5):
    """Fold BN scale into the conv taps (transposed layout): W_t = [Cout, Cin]."""
    gamma, beta, mean, var = bn
    scale = gamma / jnp.sqrt(var + eps)
    shift = beta - mean * scale
    cout, cin = w.shape[0], w.shape[1]
    wt = (w * scale[:, None, None, None]).transpose(2, 3, 0, 1).reshape(9, cout, cin)
    return wt, shift.reshape(cout, 1)


def _interp_matrix(in_size, out_size):
    """PyTorch F.interpolate(mode='bilinear', align_corners=False) row weights."""
    scale = in_size / out_size
    dst = jnp.arange(out_size, dtype=jnp.float32)
    src = jnp.maximum((dst + 0.5) * scale - 0.5, 0.0)
    i0 = jnp.clip(jnp.floor(src).astype(jnp.int32), 0, in_size - 1)
    i1 = jnp.minimum(i0 + 1, in_size - 1)
    frac = src - i0.astype(jnp.float32)
    rows = jnp.arange(out_size)
    a = jnp.zeros((out_size, in_size), jnp.float32)
    a = a.at[rows, i0].add(1.0 - frac)
    a = a.at[rows, i1].add(frac)
    return a                                          # [out_size, in_size]


def prepare_constants(params, input_hw):
    """Precompute gather matrices, BN-folded weights and upsample matrices."""
    H, W = input_hw
    gt1, h1, w1 = _conv3x3_gather_T(H, W, 2)          # backbone stage 1 (stride 2)
    gt2, h2, w2 = _conv3x3_gather_T(h1, w1, 2)        # backbone stage 2 (stride 2)
    gtc, _, _ = _conv3x3_gather_T(h2, w2, 1)          # classifier conv3x3 (stride 1)
    gta, _, _ = _conv3x3_gather_T(h1, w1, 1)          # aux conv3x3 (stride 1)

    wt1, sh1 = _fold_conv_bn_T(params["b1_w"], params["b1_bn"])
    wt2, sh2 = _fold_conv_bn_T(params["b2_w"], params["b2_bn"])
    wtc1, shc1 = _fold_conv_bn_T(params["c1_w"], params["c1_bn"])
    wta1, sha1 = _fold_conv_bn_T(params["a1_w"], params["a1_bn"])

    wc2 = params["c2_w"].reshape(NUM_CLASSES, -1)
    bc2 = params["c2_b"].reshape(NUM_CLASSES, 1)
    wa2 = params["a2_w"].reshape(NUM_CLASSES, -1)
    ba2 = params["a2_b"].reshape(NUM_CLASSES, 1)

    # bilinear upsample as a single matmul per head: out^T = logits^T @ kron(Ah, Aw)^T
    uto = jnp.kron(_interp_matrix(h2, H), _interp_matrix(w2, W)).T    # [h2*w2, H*W]
    uta = jnp.kron(_interp_matrix(h1, H), _interp_matrix(w1, W)).T    # [h1*w1, H*W]

    return (gt1, wt1, sh1, gt2, wt2, sh2,
            gtc, wtc1, shc1, wc2, bc2, uto,
            gta, wta1, sha1, wa2, ba2, uta)


# ----------------------------------------------------------------------------
# Forward pass (one pallas_call for the whole network)
# ----------------------------------------------------------------------------
def fcn_forward(params, x):
    """x: [N, C_IN, H, W] (NCHW, float32) -> {'out', 'aux'}: [N, NUM_CLASSES, H, W]."""
    n, cin, H, W = x.shape
    hw = H * W
    consts = prepare_constants(params, (H, W))
    x_flat = x.reshape(n, cin, hw)                    # NCHW is already [C, H*W]-major

    def const_spec(a):
        nd = a.ndim
        return pl.BlockSpec(a.shape, lambda i, _nd=nd: (0,) * _nd)

    out, aux = pl.pallas_call(
        _fcn_fused_kernel,
        out_shape=(jax.ShapeDtypeStruct((n, NUM_CLASSES, hw), jnp.float32),
                   jax.ShapeDtypeStruct((n, NUM_CLASSES, hw), jnp.float32)),
        grid=(n,),
        in_specs=[pl.BlockSpec((None, cin, hw), lambda i: (i, 0, 0))]
                 + [const_spec(c) for c in consts],
        out_specs=(pl.BlockSpec((None, NUM_CLASSES, hw), lambda i: (i, 0, 0)),
                   pl.BlockSpec((None, NUM_CLASSES, hw), lambda i: (i, 0, 0))),
        compiler_params=pltpu.CompilerParams(
            dimension_semantics=("parallel",),        # v7x: one batch item per TC
            vmem_limit_bytes=32 * 1024 * 1024,
        ),
    )(x_flat, *consts)

    return {"out": out.reshape(n, NUM_CLASSES, H, W),
            "aux": aux.reshape(n, NUM_CLASSES, H, W)}


# ----------------------------------------------------------------------------
# Parameter init (same structure as the reference implementation)
# ----------------------------------------------------------------------------
def init_params(key):
    ks = jax.random.split(key, 32)

    def conv_w(k, cout, cin, kh, kw):
        return 0.1 * jax.random.normal(k, (cout, cin, kh, kw), jnp.float32)

    def bn(k, c):
        k1, k2, k3, k4 = jax.random.split(k, 4)
        gamma = 1.0 + 0.1 * jax.random.normal(k1, (c,), jnp.float32)
        beta = 0.1 * jax.random.normal(k2, (c,), jnp.float32)
        mean = 0.1 * jax.random.normal(k3, (c,), jnp.float32)
        var = 1.0 + 0.1 * jnp.abs(jax.random.normal(k4, (c,), jnp.float32))
        return (gamma, beta, mean, var)

    return {
        # backbone stage 1 (feeds 'aux') and stage 2 (feeds 'out'); stride 2 each
        "b1_w": conv_w(ks[0], C1, C_IN, 3, 3), "b1_bn": bn(ks[1], C1),
        "b2_w": conv_w(ks[2], C2, C1, 3, 3), "b2_bn": bn(ks[3], C2),
        # classifier = FCNHead(C2, NUM_CLASSES): inter = C2 // 4
        "c1_w": conv_w(ks[4], C2 // 4, C2, 3, 3), "c1_bn": bn(ks[5], C2 // 4),
        "c2_w": conv_w(ks[6], NUM_CLASSES, C2 // 4, 1, 1),
        "c2_b": 0.1 * jax.random.normal(ks[7], (NUM_CLASSES,), jnp.float32),
        # aux_classifier = FCNHead(C1, NUM_CLASSES): inter = C1 // 4
        "a1_w": conv_w(ks[8], C1 // 4, C1, 3, 3), "a1_bn": bn(ks[9], C1 // 4),
        "a2_w": conv_w(ks[10], NUM_CLASSES, C1 // 4, 1, 1),
        "a2_b": 0.1 * jax.random.normal(ks[11], (NUM_CLASSES,), jnp.float32),
    }


if __name__ == "__main__":
    key = jax.random.PRNGKey(0)
    kx, kp = jax.random.split(key)
    x = jax.random.normal(kx, (2, C_IN, 16, 16), jnp.float32)   # NCHW, like PyTorch
    params = init_params(kp)

    result = fcn_forward(params, x)
    jax.block_until_ready(result)

    assert result["out"].shape == (2, NUM_CLASSES, 16, 16)
    assert result["aux"].shape == (2, NUM_CLASSES, 16, 16)
    assert bool(jnp.isfinite(result["out"]).all())
    assert bool(jnp.isfinite(result["aux"]).all())
    print("KERNEL_OK")
</pallas_src>

<mosaic_0001>
module attributes {stable_mosaic.version = 11 : i64} {
  func.func @_fcn_fused_kernel(%arg0: i32, %arg1: memref<1x4x256xf32, #tpu.memory_space<vmem>>, %arg2: memref<9x256x64xf32, #tpu.memory_space<vmem>>, %arg3: memref<9x16x4xf32, #tpu.memory_space<vmem>>, %arg4: memref<16x1xf32, #tpu.memory_space<vmem>>, %arg5: memref<9x64x16xf32, #tpu.memory_space<vmem>>, %arg6: memref<9x32x16xf32, #tpu.memory_space<vmem>>, %arg7: memref<32x1xf32, #tpu.memory_space<vmem>>, %arg8: memref<9x16x16xf32, #tpu.memory_space<vmem>>, %arg9: memref<9x8x32xf32, #tpu.memory_space<vmem>>, %arg10: memref<8x1xf32, #tpu.memory_space<vmem>>, %arg11: memref<5x8xf32, #tpu.memory_space<vmem>>, %arg12: memref<5x1xf32, #tpu.memory_space<vmem>>, %arg13: memref<16x256xf32, #tpu.memory_space<vmem>>, %arg14: memref<9x64x64xf32, #tpu.memory_space<vmem>>, %arg15: memref<9x4x16xf32, #tpu.memory_space<vmem>>, %arg16: memref<4x1xf32, #tpu.memory_space<vmem>>, %arg17: memref<5x4xf32, #tpu.memory_space<vmem>>, %arg18: memref<5x1xf32, #tpu.memory_space<vmem>>, %arg19: memref<64x256xf32, #tpu.memory_space<vmem>>, %arg20: memref<1x5x256xf32, #tpu.memory_space<vmem>>, %arg21: memref<1x5x256xf32, #tpu.memory_space<vmem>>) attributes {dimension_semantics = [#tpu.dimension_semantics<parallel>], iteration_bounds = array<i64: 2>, scalar_prefetch = 0 : i64, scratch_operands = 0 : i64, tpu.core_type = #tpu.core_type<tc>, window_params = [{transform_indices = @transform_0, window_bounds = array<i64: 1, 4, 256>}, {pipeline_mode = #tpu.pipeline_mode<synchronous>, transform_indices = @transform_1, window_bounds = array<i64: 9, 256, 64>}, {pipeline_mode = #tpu.pipeline_mode<synchronous>, transform_indices = @transform_2, window_bounds = array<i64: 9, 16, 4>}, {pipeline_mode = #tpu.pipeline_mode<synchronous>, transform_indices = @transform_3, window_bounds = array<i64: 16, 1>}, {pipeline_mode = #tpu.pipeline_mode<synchronous>, transform_indices = @transform_4, window_bounds = array<i64: 9, 64, 16>}, {pipeline_mode = #tpu.pipeline_mode<synchronous>, transform_indices = @transform_5, window_bounds = array<i64: 9, 32, 16>}, {pipeline_mode = #tpu.pipeline_mode<synchronous>, transform_indices = @transform_6, window_bounds = array<i64: 32, 1>}, {pipeline_mode = #tpu.pipeline_mode<synchronous>, transform_indices = @transform_7, window_bounds = array<i64: 9, 16, 16>}, {pipeline_mode = #tpu.pipeline_mode<synchronous>, transform_indices = @transform_8, window_bounds = array<i64: 9, 8, 32>}, {pipeline_mode = #tpu.pipeline_mode<synchronous>, transform_indices = @transform_9, window_bounds = array<i64: 8, 1>}, {pipeline_mode = #tpu.pipeline_mode<synchronous>, transform_indices = @transform_10, window_bounds = array<i64: 5, 8>}, {pipeline_mode = #tpu.pipeline_mode<synchronous>, transform_indices = @transform_11, window_bounds = array<i64: 5, 1>}, {pipeline_mode = #tpu.pipeline_mode<synchronous>, transform_indices = @transform_12, window_bounds = array<i64: 16, 256>}, {pipeline_mode = #tpu.pipeline_mode<synchronous>, transform_indices = @transform_13, window_bounds = array<i64: 9, 64, 64>}, {pipeline_mode = #tpu.pipeline_mode<synchronous>, transform_indices = @transform_14, window_bounds = array<i64: 9, 4, 16>}, {pipeline_mode = #tpu.pipeline_mode<synchronous>, transform_indices = @transform_15, window_bounds = array<i64: 4, 1>}, {pipeline_mode = #tpu.pipeline_mode<synchronous>, transform_indices = @transform_16, window_bounds = array<i64: 5, 4>}, {pipeline_mode = #tpu.pipeline_mode<synchronous>, transform_indices = @transform_17, window_bounds = array<i64: 5, 1>}, {pipeline_mode = #tpu.pipeline_mode<synchronous>, transform_indices = @transform_18, window_bounds = array<i64: 64, 256>}, {transform_indices = @transform_19, window_bounds = array<i64: 1, 5, 256>}, {transform_indices = @transform_20, window_bounds = array<i64: 1, 5, 256>}]} {
    %c0 = arith.constant 0 : index
    %c0_0 = arith.constant 0 : index
    %c0_1 = arith.constant 0 : index
    %0 = vector.load %arg1[%c0, %c0_0, %c0_1] : memref<1x4x256xf32, #tpu.memory_space<vmem>>, vector<1x4x256xf32>
    %1 = vector.shape_cast %0 : vector<1x4x256xf32> to vector<4x256xf32>
    %cst = arith.constant 0.000000e+00 : f32
    %2 = vector.broadcast %cst : f32 to vector<16x64xf32>
    %c0_2 = arith.constant 0 : index
    %c0_3 = arith.constant 0 : index
    %c0_4 = arith.constant 0 : index
    %3 = vector.load %arg2[%c0_2, %c0_3, %c0_4] : memref<9x256x64xf32, #tpu.memory_space<vmem>>, vector<1x256x64xf32>
    %4 = vector.shape_cast %3 : vector<1x256x64xf32> to vector<256x64xf32>
    %cst_5 = arith.constant dense<0.000000e+00> : vector<4x64xf32>
    %5 = tpu.matmul %1, %4, %cst_5 {dimension_numbers = #tpu.dot_dimension_numbers<[1], [0], [0], [1], [0, 0, 1, 1], [], []>} : vector<4x256xf32>, vector<256x64xf32>, vector<4x64xf32> -> vector<4x64xf32>
    %c0_6 = arith.constant 0 : index
    %c0_7 = arith.constant 0 : index
    %c0_8 = arith.constant 0 : index
    %6 = vector.load %arg3[%c0_6, %c0_7, %c0_8] : memref<9x16x4xf32, #tpu.memory_space<vmem>>, vector<1x16x4xf32>
    %7 = vector.shape_cast %6 : vector<1x16x4xf32> to vector<16x4xf32>
    %cst_9 = arith.constant dense<0.000000e+00> : vector<16x64xf32>
    %8 = tpu.matmul %7, %5, %cst_9 {dimension_numbers = #tpu.dot_dimension_numbers<[1], [0], [0], [1], [0, 0, 1, 1], [], []>} : vector<16x4xf32>, vector<4x64xf32>, vector<16x64xf32> -> vector<16x64xf32>
    %9 = arith.addf %2, %8 : vector<16x64xf32>
    %c1 = arith.constant 1 : index
    %c0_10 = arith.constant 0 : index
    %c0_11 = arith.constant 0 : index
    %10 = vector.load %arg2[%c1, %c0_10, %c0_11] : memref<9x256x64xf32, #tpu.memory_space<vmem>>, vector<1x256x64xf32>
    %11 = vector.shape_cast %10 : vector<1x256x64xf32> to vector<256x64xf32>
    %cst_12 = arith.constant dense<0.000000e+00> : vector<4x64xf32>
    %12 = tpu.matmul %1, %11, %cst_12 {dimension_numbers = #tpu.dot_dimension_numbers<[1], [0], [0], [1], [0, 0, 1, 1], [], []>} : vector<4x256xf32>, vector<256x64xf32>, vector<4x64xf32> -> vector<4x64xf32>
    %c1_13 = arith.constant 1 : index
    %c0_14 = arith.constant 0 : index
    %c0_15 = arith.constant 0 : index
    %13 = vector.load %arg3[%c1_13, %c0_14, %c0_15] : memref<9x16x4xf32, #tpu.memory_space<vmem>>, vector<1x16x4xf32>
    %14 = vector.shape_cast %13 : vector<1x16x4xf32> to vector<16x4xf32>
    %cst_16 = arith.constant dense<0.000000e+00> : vector<16x64xf32>
    %15 = tpu.matmul %14, %12, %cst_16 {dimension_numbers = #tpu.dot_dimension_numbers<[1], [0], [0], [1], [0, 0, 1, 1], [], []>} : vector<16x4xf32>, vector<4x64xf32>, vector<16x64xf32> -> vector<16x64xf32>
    %16 = arith.addf %9, %15 : vector<16x64xf32>
    %c2 = arith.constant 2 : index
    %c0_17 = arith.constant 0 : index
    %c0_18 = arith.constant 0 : index
    %17 = vector.load %arg2[%c2, %c0_17, %c0_18] : memref<9x256x64xf32, #tpu.memory_space<vmem>>, vector<1x256x64xf32>
    %18 = vector.shape_cast %17 : vector<1x256x64xf32> to vector<256x64xf32>
    %cst_19 = arith.constant dense<0.000000e+00> : vector<4x64xf32>
    %19 = tpu.matmul %1, %18, %cst_19 {dimension_numbers = #tpu.dot_dimension_numbers<[1], [0], [0], [1], [0, 0, 1, 1], [], []>} : vector<4x256xf32>, vector<256x64xf32>, vector<4x64xf32> -> vector<4x64xf32>
    %c2_20 = arith.constant 2 : index
    %c0_21 = arith.constant 0 : index
    %c0_22 = arith.constant 0 : index
    %20 = vector.load %arg3[%c2_20, %c0_21, %c0_22] : memref<9x16x4xf32, #tpu.memory_space<vmem>>, vector<1x16x4xf32>
    %21 = vector.shape_cast %20 : vector<1x16x4xf32> to vector<16x4xf32>
    %cst_23 = arith.constant dense<0.000000e+00> : vector<16x64xf32>
    %22 = tpu.matmul %21, %19, %cst_23 {dimension_numbers = #tpu.dot_dimension_numbers<[1], [0], [0], [1], [0, 0, 1, 1], [], []>} : vector<16x4xf32>, vector<4x64xf32>, vector<16x64xf32> -> vector<16x64xf32>
    %23 = arith.addf %16, %22 : vector<16x64xf32>
    %c3 = arith.constant 3 : index
    %c0_24 = arith.constant 0 : index
    %c0_25 = arith.constant 0 : index
    %24 = vector.load %arg2[%c3, %c0_24, %c0_25] : memref<9x256x64xf32, #tpu.memory_space<vmem>>, vector<1x256x64xf32>
    %25 = vector.shape_cast %24 : vector<1x256x64xf32> to vector<256x64xf32>
    %cst_26 = arith.constant dense<0.000000e+00> : vector<4x64xf32>
    %26 = tpu.matmul %1, %25, %cst_26 {dimension_numbers = #tpu.dot_dimension_numbers<[1], [0], [0], [1], [0, 0, 1, 1], [], []>} : vector<4x256xf32>, vector<256x64xf32>, vector<4x64xf32> -> vector<4x64xf32>
    %c3_27 = arith.constant 3 : index
    %c0_28 = arith.constant 0 : index
    %c0_29 = arith.constant 0 : index
    %27 = vector.load %arg3[%c3_27, %c0_28, %c0_29] : memref<9x16x4xf32, #tpu.memory_space<vmem>>, vector<1x16x4xf32>
    %28 = vector.shape_cast %27 : vector<1x16x4xf32> to vector<16x4xf32>
    %cst_30 = arith.constant dense<0.000000e+00> : vector<16x64xf32>
    %29 = tpu.matmul %28, %26, %cst_30 {dimension_numbers = #tpu.dot_dimension_numbers<[1], [0], [0], [1], [0, 0, 1, 1], [], []>} : vector<16x4xf32>, vector<4x64xf32>, vector<16x64xf32> -> vector<16x64xf32>
    %30 = arith.addf %23, %29 : vector<16x64xf32>
    %c4 = arith.constant 4 : index
    %c0_31 = arith.constant 0 : index
    %c0_32 = arith.constant 0 : index
    %31 = vector.load %arg2[%c4, %c0_31, %c0_32] : memref<9x256x64xf32, #tpu.memory_space<vmem>>, vector<1x256x64xf32>
    %32 = vector.shape_cast %31 : vector<1x256x64xf32> to vector<256x64xf32>
    %cst_33 = arith.constant dense<0.000000e+00> : vector<4x64xf32>
    %33 = tpu.matmul %1, %32, %cst_33 {dimension_numbers = #tpu.dot_dimension_numbers<[1], [0], [0], [1], [0, 0, 1, 1], [], []>} : vector<4x256xf32>, vector<256x64xf32>, vector<4x64xf32> -> vector<4x64xf32>
    %c4_34 = arith.constant 4 : index
    %c0_35 = arith.constant 0 : index
    %c0_36 = arith.constant 0 : index
    %34 = vector.load %arg3[%c4_34, %c0_35, %c0_36] : memref<9x16x4xf32, #tpu.memory_space<vmem>>, vector<1x16x4xf32>
    %35 = vector.shape_cast %34 : vector<1x16x4xf32> to vector<16x4xf32>
    %cst_37 = arith.constant dense<0.000000e+00> : vector<16x64xf32>
    %36 = tpu.matmul %35, %33, %cst_37 {dimension_numbers = #tpu.dot_dimension_numbers<[1], [0], [0], [1], [0, 0, 1, 1], [], []>} : vector<16x4xf32>, vector<4x64xf32>, vector<16x64xf32> -> vector<16x64xf32>
    %37 = arith.addf %30, %36 : vector<16x64xf32>
    %c5 = arith.constant 5 : index
    %c0_38 = arith.constant 0 : index
    %c0_39 = arith.constant 0 : index
    %38 = vector.load %arg2[%c5, %c0_38, %c0_39] : memref<9x256x64xf32, #tpu.memory_space<vmem>>, vector<1x256x64xf32>
    %39 = vector.shape_cast %38 : vector<1x256x64xf32> to vector<256x64xf32>
    %cst_40 = arith.constant dense<0.000000e+00> : vector<4x64xf32>
    %40 = tpu.matmul %1, %39, %cst_40 {dimension_numbers = #tpu.dot_dimension_numbers<[1], [0], [0], [1], [0, 0, 1, 1], [], []>} : vector<4x256xf32>, vector<256x64xf32>, vector<4x64xf32> -> vector<4x64xf32>
    %c5_41 = arith.constant 5 : index
    %c0_42 = arith.constant 0 : index
    %c0_43 = arith.constant 0 : index
    %41 = vector.load %arg3[%c5_41, %c0_42, %c0_43] : memref<9x16x4xf32, #tpu.memory_space<vmem>>, vector<1x16x4xf32>
    %42 = vector.shape_cast %41 : vector<1x16x4xf32> to vector<16x4xf32>
    %cst_44 = arith.constant dense<0.000000e+00> : vector<16x64xf32>
    %43 = tpu.matmul %42, %40, %cst_44 {dimension_numbers = #tpu.dot_dimension_numbers<[1], [0], [0], [1], [0, 0, 1, 1], [], []>} : vector<16x4xf32>, vector<4x64xf32>, vector<16x64xf32> -> vector<16x64xf32>
    %44 = arith.addf %37, %43 : vector<16x64xf32>
    %c6 = arith.constant 6 : index
    %c0_45 = arith.constant 0 : index
    %c0_46 = arith.constant 0 : index
    %45 = vector.load %arg2[%c6, %c0_45, %c0_46] : memref<9x256x64xf32, #tpu.memory_space<vmem>>, vector<1x256x64xf32>
    %46 = vector.shape_cast %45 : vector<1x256x64xf32> to vector<256x64xf32>
    %cst_47 = arith.constant dense<0.000000e+00> : vector<4x64xf32>
    %47 = tpu.matmul %1, %46, %cst_47 {dimension_numbers = #tpu.dot_dimension_numbers<[1], [0], [0], [1], [0, 0, 1, 1], [], []>} : vector<4x256xf32>, vector<256x64xf32>, vector<4x64xf32> -> vector<4x64xf32>
    %c6_48 = arith.constant 6 : index
    %c0_49 = arith.constant 0 : index
    %c0_50 = arith.constant 0 : index
    %48 = vector.load %arg3[%c6_48, %c0_49, %c0_50] : memref<9x16x4xf32, #tpu.memory_space<vmem>>, vector<1x16x4xf32>
    %49 = vector.shape_cast %48 : vector<1x16x4xf32> to vector<16x4xf32>
    %cst_51 = arith.constant dense<0.000000e+00> : vector<16x64xf32>
    %50 = tpu.matmul %49, %47, %cst_51 {dimension_numbers = #tpu.dot_dimension_numbers<[1], [0], [0], [1], [0, 0, 1, 1], [], []>} : vector<16x4xf32>, vector<4x64xf32>, vector<16x64xf32> -> vector<16x64xf32>
    %51 = arith.addf %44, %50 : vector<16x64xf32>
    %c7 = arith.constant 7 : index
    %c0_52 = arith.constant 0 : index
    %c0_53 = arith.constant 0 : index
    %52 = vector.load %arg2[%c7, %c0_52, %c0_53] : memref<9x256x64xf32, #tpu.memory_space<vmem>>, vector<1x256x64xf32>
    %53 = vector.shape_cast %52 : vector<1x256x64xf32> to vector<256x64xf32>
    %cst_54 = arith.constant dense<0.000000e+00> : vector<4x64xf32>
    %54 = tpu.matmul %1, %53, %cst_54 {dimension_numbers = #tpu.dot_dimension_numbers<[1], [0], [0], [1], [0, 0, 1, 1], [], []>} : vector<4x256xf32>, vector<256x64xf32>, vector<4x64xf32> -> vector<4x64xf32>
    %c7_55 = arith.constant 7 : index
    %c0_56 = arith.constant 0 : index
    %c0_57 = arith.constant 0 : index
    %55 = vector.load %arg3[%c7_55, %c0_56, %c0_57] : memref<9x16x4xf32, #tpu.memory_space<vmem>>, vector<1x16x4xf32>
    %56 = vector.shape_cast %55 : vector<1x16x4xf32> to vector<16x4xf32>
    %cst_58 = arith.constant dense<0.000000e+00> : vector<16x64xf32>
    %57 = tpu.matmul %56, %54, %cst_58 {dimension_numbers = #tpu.dot_dimension_numbers<[1], [0], [0], [1], [0, 0, 1, 1], [], []>} : vector<16x4xf32>, vector<4x64xf32>, vector<16x64xf32> -> vector<16x64xf32>
    %58 = arith.addf %51, %57 : vector<16x64xf32>
    %c8 = arith.constant 8 : index
    %c0_59 = arith.constant 0 : index
    %c0_60 = arith.constant 0 : index
    %59 = vector.load %arg2[%c8, %c0_59, %c0_60] : memref<9x256x64xf32, #tpu.memory_space<vmem>>, vector<1x256x64xf32>
    %60 = vector.shape_cast %59 : vector<1x256x64xf32> to vector<256x64xf32>
    %cst_61 = arith.constant dense<0.000000e+00> : vector<4x64xf32>
    %61 = tpu.matmul %1, %60, %cst_61 {dimension_numbers = #tpu.dot_dimension_numbers<[1], [0], [0], [1], [0, 0, 1, 1], [], []>} : vector<4x256xf32>, vector<256x64xf32>, vector<4x64xf32> -> vector<4x64xf32>
    %c8_62 = arith.constant 8 : index
    %c0_63 = arith.constant 0 : index
    %c0_64 = arith.constant 0 : index
    %62 = vector.load %arg3[%c8_62, %c0_63, %c0_64] : memref<9x16x4xf32, #tpu.memory_space<vmem>>, vector<1x16x4xf32>
    %63 = vector.shape_cast %62 : vector<1x16x4xf32> to vector<16x4xf32>
    %cst_65 = arith.constant dense<0.000000e+00> : vector<16x64xf32>
    %64 = tpu.matmul %63, %61, %cst_65 {dimension_numbers = #tpu.dot_dimension_numbers<[1], [0], [0], [1], [0, 0, 1, 1], [], []>} : vector<16x4xf32>, vector<4x64xf32>, vector<16x64xf32> -> vector<16x64xf32>
    %65 = arith.addf %58, %64 : vector<16x64xf32>
    %c0_66 = arith.constant 0 : index
    %c0_67 = arith.constant 0 : index
    %66 = vector.load %arg4[%c0_66, %c0_67] : memref<16x1xf32, #tpu.memory_space<vmem>>, vector<16x1xf32>
    %67 = vector.broadcast %66 : vector<16x1xf32> to vector<16x64xf32>
    %68 = arith.addf %65, %67 : vector<16x64xf32>
    %cst_68 = arith.constant 0.000000e+00 : f32
    %69 = vector.broadcast %cst_68 : f32 to vector<16x64xf32>
    %70 = arith.maximumf %68, %69 : vector<16x64xf32>
    %cst_69 = arith.constant 0.000000e+00 : f32
    %71 = vector.broadcast %cst_69 : f32 to vector<32x16xf32>
    %c0_70 = arith.constant 0 : index
    %c0_71 = arith.constant 0 : index
    %c0_72 = arith.constant 0 : index
    %72 = vector.load %arg5[%c0_70, %c0_71, %c0_72] : memref<9x64x16xf32, #tpu.memory_space<vmem>>, vector<1x64x16xf32>
    %73 = vector.shape_cast %72 : vector<1x64x16xf32> to vector<64x16xf32>
    %cst_73 = arith.constant dense<0.000000e+00> : vector<16x16xf32>
    %74 = tpu.matmul %70, %73, %cst_73 {dimension_numbers = #tpu.dot_dimension_numbers<[1], [0], [0], [1], [0, 0, 1, 1], [], []>} : vector<16x64xf32>, vector<64x16xf32>, vector<16x16xf32> -> vector<16x16xf32>
    %c0_74 = arith.constant 0 : index
    %c0_75 = arith.constant 0 : index
    %c0_76 = arith.constant 0 : index
    %75 = vector.load %arg6[%c0_74, %c0_75, %c0_76] : memref<9x32x16xf32, #tpu.memory_space<vmem>>, vector<1x32x16xf32>
    %76 = vector.shape_cast %75 : vector<1x32x16xf32> to vector<32x16xf32>
    %cst_77 = arith.constant dense<0.000000e+00> : vector<32x16xf32>
    %77 = tpu.matmul %76, %74, %cst_77 {dimension_numbers = #tpu.dot_dimension_numbers<[1], [0], [0], [1], [0, 0, 1, 1], [], []>} : vector<32x16xf32>, vector<16x16xf32>, vector<32x16xf32> -> vector<32x16xf32>
    %78 = arith.addf %71, %77 : vector<32x16xf32>
    %c1_78 = arith.constant 1 : index
    %c0_79 = arith.constant 0 : index
    %c0_80 = arith.constant 0 : index
    %79 = vector.load %arg5[%c1_78, %c0_79, %c0_80] : memref<9x64x16xf32, #tpu.memory_space<vmem>>, vector<1x64x16xf32>
    %80 = vector.shape_cast %79 : vector<1x64x16xf32> to vector<64x16xf32>
    %cst_81 = arith.constant dense<0.000000e+00> : vector<16x16xf32>
    %81 = tpu.matmul %70, %80, %cst_81 {dimension_numbers = #tpu.dot_dimension_numbers<[1], [0], [0], [1], [0, 0, 1, 1], [], []>} : vector<16x64xf32>, vector<64x16xf32>, vector<16x16xf32> -> vector<16x16xf32>
    %c1_82 = arith.constant 1 : index
    %c0_83 = arith.constant 0 : index
    %c0_84 = arith.constant 0 : index
    %82 = vector.load %arg6[%c1_82, %c0_83, %c0_84] : memref<9x32x16xf32, #tpu.memory_space<vmem>>, vector<1x32x16xf32>
    %83 = vector.shape_cast %82 : vector<1x32x16xf32> to vector<32x16xf32>
    %cst_85 = arith.constant dense<0.000000e+00> : vector<32x16xf32>
    %84 = tpu.matmul %83, %81, %cst_85 {dimension_numbers = #tpu.dot_dimension_numbers<[1], [0], [0], [1], [0, 0, 1, 1], [], []>} : vector<32x16xf32>, vector<16x16xf32>, vector<32x16xf32> -> vector<32x16xf32>
    %85 = arith.addf %78, %84 : vector<32x16xf32>
    %c2_86 = arith.constant 2 : index
    %c0_87 = arith.constant 0 : index
    %c0_88 = arith.constant 0 : index
    %86 = vector.load %arg5[%c2_86, %c0_87, %c0_88] : memref<9x64x16xf32, #tpu.memory_space<vmem>>, vector<1x64x16xf32>
    %87 = vector.shape_cast %86 : vector<1x64x16xf32> to vector<64x16xf32>
    %cst_89 = arith.constant dense<0.000000e+00> : vector<16x16xf32>
    %88 = tpu.matmul %70, %87, %cst_89 {dimension_numbers = #tpu.dot_dimension_numbers<[1], [0], [0], [1], [0, 0, 1, 1], [], []>} : vector<16x64xf32>, vector<64x16xf32>, vector<16x16xf32> -> vector<16x16xf32>
    %c2_90 = arith.constant 2 : index
    %c0_91 = arith.constant 0 : index
    %c0_92 = arith.constant 0 : index
    %89 = vector.load %arg6[%c2_90, %c0_91, %c0_92] : memref<9x32x16xf32, #tpu.memory_space<vmem>>, vector<1x32x16xf32>
    %90 = vector.shape_cast %89 : vector<1x32x16xf32> to vector<32x16xf32>
    %cst_93 = arith.constant dense<0.000000e+00> : vector<32x16xf32>
    %91 = tpu.matmul %90, %88, %cst_93 {dimension_numbers = #tpu.dot_dimension_numbers<[1], [0], [0], [1], [0, 0, 1, 1], [], []>} : vector<32x16xf32>, vector<16x16xf32>, vector<32x16xf32> -> vector<32x16xf32>
    %92 = arith.addf %85, %91 : vector<32x16xf32>
    %c3_94 = arith.constant 3 : index
    %c0_95 = arith.constant 0 : index
    %c0_96 = arith.constant 0 : index
    %93 = vector.load %arg5[%c3_94, %c0_95, %c0_96] : memref<9x64x16xf32, #tpu.memory_space<vmem>>, vector<1x64x16xf32>
    %94 = vector.shape_cast %93 : vector<1x64x16xf32> to vector<64x16xf32>
    %cst_97 = arith.constant dense<0.000000e+00> : vector<16x16xf32>
    %95 = tpu.matmul %70, %94, %cst_97 {dimension_numbers = #tpu.dot_dimension_numbers<[1], [0], [0], [1], [0, 0, 1, 1], [], []>} : vector<16x64xf32>, vector<64x16xf32>, vector<16x16xf32> -> vector<16x16xf32>
    %c3_98 = arith.constant 3 : index
    %c0_99 = arith.constant 0 : index
    %c0_100 = arith.constant 0 : index
    %96 = vector.load %arg6[%c3_98, %c0_99, %c0_100] : memref<9x32x16xf32, #tpu.memory_space<vmem>>, vector<1x32x16xf32>
    %97 = vector.shape_cast %96 : vector<1x32x16xf32> to vector<32x16xf32>
    %cst_101 = arith.constant dense<0.000000e+00> : vector<32x16xf32>
    %98 = tpu.matmul %97, %95, %cst_101 {dimension_numbers = #tpu.dot_dimension_numbers<[1], [0], [0], [1], [0, 0, 1, 1], [], []>} : vector<32x16xf32>, vector<16x16xf32>, vector<32x16xf32> -> vector<32x16xf32>
    %99 = arith.addf %92, %98 : vector<32x16xf32>
    %c4_102 = arith.constant 4 : index
    %c0_103 = arith.constant 0 : index
    %c0_104 = arith.constant 0 : index
    %100 = vector.load %arg5[%c4_102, %c0_103, %c0_104] : memref<9x64x16xf32, #tpu.memory_space<vmem>>, vector<1x64x16xf32>
    %101 = vector.shape_cast %100 : vector<1x64x16xf32> to vector<64x16xf32>
    %cst_105 = arith.constant dense<0.000000e+00> : vector<16x16xf32>
    %102 = tpu.matmul %70, %101, %cst_105 {dimension_numbers = #tpu.dot_dimension_numbers<[1], [0], [0], [1], [0, 0, 1, 1], [], []>} : vector<16x64xf32>, vector<64x16xf32>, vector<16x16xf32> -> vector<16x16xf32>
    %c4_106 = arith.constant 4 : index
    %c0_107 = arith.constant 0 : index
    %c0_108 = arith.constant 0 : index
    %103 = vector.load %arg6[%c4_106, %c0_107, %c0_108] : memref<9x32x16xf32, #tpu.memory_space<vmem>>, vector<1x32x16xf32>
    %104 = vector.shape_cast %103 : vector<1x32x16xf32> to vector<32x16xf32>
    %cst_109 = arith.constant dense<0.000000e+00> : vector<32x16xf32>
    %105 = tpu.matmul %104, %102, %cst_109 {dimension_numbers = #tpu.dot_dimension_numbers<[1], [0], [0], [1], [0, 0, 1, 1], [], []>} : vector<32x16xf32>, vector<16x16xf32>, vector<32x16xf32> -> vector<32x16xf32>
    %106 = arith.addf %99, %105 : vector<32x16xf32>
    %c5_110 = arith.constant 5 : index
    %c0_111 = arith.constant 0 : index
    %c0_112 = arith.constant 0 : index
    %107 = vector.load %arg5[%c5_110, %c0_111, %c0_112] : memref<9x64x16xf32, #tpu.memory_space<vmem>>, vector<1x64x16xf32>
    %108 = vector.shape_cast %107 : vector<1x64x16xf32> to vector<64x16xf32>
    %cst_113 = arith.constant dense<0.000000e+00> : vector<16x16xf32>
    %109 = tpu.matmul %70, %108, %cst_113 {dimension_numbers = #tpu.dot_dimension_numbers<[1], [0], [0], [1], [0, 0, 1, 1], [], []>} : vector<16x64xf32>, vector<64x16xf32>, vector<16x16xf32> -> vector<16x16xf32>
    %c5_114 = arith.constant 5 : index
    %c0_115 = arith.constant 0 : index
    %c0_116 = arith.constant 0 : index
    %110 = vector.load %arg6[%c5_114, %c0_115, %c0_116] : memref<9x32x16xf32, #tpu.memory_space<vmem>>, vector<1x32x16xf32>
    %111 = vector.shape_cast %110 : vector<1x32x16xf32> to vector<32x16xf32>
    %cst_117 = arith.constant dense<0.000000e+00> : vector<32x16xf32>
    %112 = tpu.matmul %111, %109, %cst_117 {dimension_numbers = #tpu.dot_dimension_numbers<[1], [0], [0], [1], [0, 0, 1, 1], [], []>} : vector<32x16xf32>, vector<16x16xf32>, vector<32x16xf32> -> vector<32x16xf32>
    %113 = arith.addf %106, %112 : vector<32x16xf32>
    %c6_118 = arith.constant 6 : index
    %c0_119 = arith.constant 0 : index
    %c0_120 = arith.constant 0 : index
    %114 = vector.load %arg5[%c6_118, %c0_119, %c0_120] : memref<9x64x16xf32, #tpu.memory_space<vmem>>, vector<1x64x16xf32>
    %115 = vector.shape_cast %114 : vector<1x64x16xf32> to vector<64x16xf32>
    %cst_121 = arith.constant dense<0.000000e+00> : vector<16x16xf32>
    %116 = tpu.matmul %70, %115, %cst_121 {dimension_numbers = #tpu.dot_dimension_numbers<[1], [0], [0], [1], [0, 0, 1, 1], [], []>} : vector<16x64xf32>, vector<64x16xf32>, vector<16x16xf32> -> vector<16x16xf32>
    %c6_122 = arith.constant 6 : index
    %c0_123 = arith.constant 0 : index
    %c0_124 = arith.constant 0 : index
    %117 = vector.load %arg6[%c6_122, %c0_123, %c0_124] : memref<9x32x16xf32, #tpu.memory_space<vmem>>, vector<1x32x16xf32>
    %118 = vector.shape_cast %117 : vector<1x32x16xf32> to vector<32x16xf32>
    %cst_125 = arith.constant dense<0.000000e+00> : vector<32x16xf32>
    %119 = tpu.matmul %118, %116, %cst_125 {dimension_numbers = #tpu.dot_dimension_numbers<[1], [0], [0], [1], [0, 0, 1, 1], [], []>} : vector<32x16xf32>, vector<16x16xf32>, vector<32x16xf32> -> vector<32x16xf32>
    %120 = arith.addf %113, %119 : vector<32x16xf32>
    %c7_126 = arith.constant 7 : index
    %c0_127 = arith.constant 0 : index
    %c0_128 = arith.constant 0 : index
    %121 = vector.load %arg5[%c7_126, %c0_127, %c0_128] : memref<9x64x16xf32, #tpu.memory_space<vmem>>, vector<1x64x16xf32>
    %122 = vector.shape_cast %121 : vector<1x64x16xf32> to vector<64x16xf32>
    %cst_129 = arith.constant dense<0.000000e+00> : vector<16x16xf32>
    %123 = tpu.matmul %70, %122, %cst_129 {dimension_numbers = #tpu.dot_dimension_numbers<[1], [0], [0], [1], [0, 0, 1, 1], [], []>} : vector<16x64xf32>, vector<64x16xf32>, vector<16x16xf32> -> vector<16x16xf32>
    %c7_130 = arith.constant 7 : index
    %c0_131 = arith.constant 0 : index
    %c0_132 = arith.constant 0 : index
    %124 = vector.load %arg6[%c7_130, %c0_131, %c0_132] : memref<9x32x16xf32, #tpu.memory_space<vmem>>, vector<1x32x16xf32>
    %125 = vector.shape_cast %124 : vector<1x32x16xf32> to vector<32x16xf32>
    %cst_133 = arith.constant dense<0.000000e+00> : vector<32x16xf32>
    %126 = tpu.matmul %125, %123, %cst_133 {dimension_numbers = #tpu.dot_dimension_numbers<[1], [0], [0], [1], [0, 0, 1, 1], [], []>} : vector<32x16xf32>, vector<16x16xf32>, vector<32x16xf32> -> vector<32x16xf32>
    %127 = arith.addf %120, %126 : vector<32x16xf32>
    %c8_134 = arith.constant 8 : index
    %c0_135 = arith.constant 0 : index
    %c0_136 = arith.constant 0 : index
    %128 = vector.load %arg5[%c8_134, %c0_135, %c0_136] : memref<9x64x16xf32, #tpu.memory_space<vmem>>, vector<1x64x16xf32>
    %129 = vector.shape_cast %128 : vector<1x64x16xf32> to vector<64x16xf32>
    %cst_137 = arith.constant dense<0.000000e+00> : vector<16x16xf32>
    %130 = tpu.matmul %70, %129, %cst_137 {dimension_numbers = #tpu.dot_dimension_numbers<[1], [0], [0], [1], [0, 0, 1, 1], [], []>} : vector<16x64xf32>, vector<64x16xf32>, vector<16x16xf32> -> vector<16x16xf32>
    %c8_138 = arith.constant 8 : index
    %c0_139 = arith.constant 0 : index
    %c0_140 = arith.constant 0 : index
    %131 = vector.load %arg6[%c8_138, %c0_139, %c0_140] : memref<9x32x16xf32, #tpu.memory_space<vmem>>, vector<1x32x16xf32>
    %132 = vector.shape_cast %131 : vector<1x32x16xf32> to vector<32x16xf32>
    %cst_141 = arith.constant dense<0.000000e+00> : vector<32x16xf32>
    %133 = tpu.matmul %132, %130, %cst_141 {dimension_numbers = #tpu.dot_dimension_numbers<[1], [0], [0], [1], [0, 0, 1, 1], [], []>} : vector<32x16xf32>, vector<16x16xf32>, vector<32x16xf32> -> vector<32x16xf32>
    %134 = arith.addf %127, %133 : vector<32x16xf32>
    %c0_142 = arith.constant 0 : index
    %c0_143 = arith.constant 0 : index
    %135 = vector.load %arg7[%c0_142, %c0_143] : memref<32x1xf32, #tpu.memory_space<vmem>>, vector<32x1xf32>
    %136 = vector.broadcast %135 : vector<32x1xf32> to vector<32x16xf32>
    %137 = arith.addf %134, %136 : vector<32x16xf32>
    %cst_144 = arith.constant 0.000000e+00 : f32
    %138 = vector.broadcast %cst_144 : f32 to vector<32x16xf32>
    %139 = arith.maximumf %137, %138 : vector<32x16xf32>
    %cst_145 = arith.constant 0.000000e+00 : f32
    %140 = vector.broadcast %cst_145 : f32 to vector<8x16xf32>
    %c0_146 = arith.constant 0 : index
    %c0_147 = arith.constant 0 : index
    %c0_148 = arith.constant 0 : index
    %141 = vector.load %arg8[%c0_146, %c0_147, %c0_148] : memref<9x16x16xf32, #tpu.memory_space<vmem>>, vector<1x16x16xf32>
    %142 = vector.shape_cast %141 : vector<1x16x16xf32> to vector<16x16xf32>
    %cst_149 = arith.constant dense<0.000000e+00> : vector<32x16xf32>
    %143 = tpu.matmul %139, %142, %cst_149 {dimension_numbers = #tpu.dot_dimension_numbers<[1], [0], [0], [1], [0, 0, 1, 1], [], []>} : vector<32x16xf32>, vector<16x16xf32>, vector<32x16xf32> -> vector<32x16xf32>
    %c0_150 = arith.constant 0 : index
    %c0_151 = arith.constant 0 : index
    %c0_152 = arith.constant 0 : index
    %144 = vector.load %arg9[%c0_150, %c0_151, %c0_152] : memref<9x8x32xf32, #tpu.memory_space<vmem>>, vector<1x8x32xf32>
    %145 = vector.shape_cast %144 : vector<1x8x32xf32> to vector<8x32xf32>
    %cst_153 = arith.constant dense<0.000000e+00> : vector<8x16xf32>
    %146 = tpu.matmul %145, %143, %cst_153 {dimension_numbers = #tpu.dot_dimension_numbers<[1], [0], [0], [1], [0, 0, 1, 1], [], []>} : vector<8x32xf32>, vector<32x16xf32>, vector<8x16xf32> -> vector<8x16xf32>
    %147 = arith.addf %140, %146 : vector<8x16xf32>
    %c1_154 = arith.constant 1 : index
    %c0_155 = arith.constant 0 : index
    %c0_156 = arith.constant 0 : index
    %148 = vector.load %arg8[%c1_154, %c0_155, %c0_156] : memref<9x16x16xf32, #tpu.memory_space<vmem>>, vector<1x16x16xf32>
    %149 = vector.shape_cast %148 : vector<1x16x16xf32> to vector<16x16xf32>
    %cst_157 = arith.constant dense<0.000000e+00> : vector<32x16xf32>
    %150 = tpu.matmul %139, %149, %cst_157 {dimension_numbers = #tpu.dot_dimension_numbers<[1], [0], [0], [1], [0, 0, 1, 1], [], []>} : vector<32x16xf32>, vector<16x16xf32>, vector<32x16xf32> -> vector<32x16xf32>
    %c1_158 = arith.constant 1 : index
    %c0_159 = arith.constant 0 : index
    %c0_160 = arith.constant 0 : index
    %151 = vector.load %arg9[%c1_158, %c0_159, %c0_160] : memref<9x8x32xf32, #tpu.memory_space<vmem>>, vector<1x8x32xf32>
    %152 = vector.shape_cast %151 : vector<1x8x32xf32> to vector<8x32xf32>
    %cst_161 = arith.constant dense<0.000000e+00> : vector<8x16xf32>
    %153 = tpu.matmul %152, %150, %cst_161 {dimension_numbers = #tpu.dot_dimension_numbers<[1], [0], [0], [1], [0, 0, 1, 1], [], []>} : vector<8x32xf32>, vector<32x16xf32>, vector<8x16xf32> -> vector<8x16xf32>
    %154 = arith.addf %147, %153 : vector<8x16xf32>
    %c2_162 = arith.constant 2 : index
    %c0_163 = arith.constant 0 : index
    %c0_164 = arith.constant 0 : index
    %155 = vector.load %arg8[%c2_162, %c0_163, %c0_164] : memref<9x16x16xf32, #tpu.memory_space<vmem>>, vector<1x16x16xf32>
    %156 = vector.shape_cast %155 : vector<1x16x16xf32> to vector<16x16xf32>
    %cst_165 = arith.constant dense<0.000000e+00> : vector<32x16xf32>
    %157 = tpu.matmul %139, %156, %cst_165 {dimension_numbers = #tpu.dot_dimension_numbers<[1], [0], [0], [1], [0, 0, 1, 1], [], []>} : vector<32x16xf32>, vector<16x16xf32>, vector<32x16xf32> -> vector<32x16xf32>
    %c2_166 = arith.constant 2 : index
    %c0_167 = arith.constant 0 : index
    %c0_168 = arith.constant 0 : index
    %158 = vector.load %arg9[%c2_166, %c0_167, %c0_168] : memref<9x8x32xf32, #tpu.memory_space<vmem>>, vector<1x8x32xf32>
    %159 = vector.shape_cast %158 : vector<1x8x32xf32> to vector<8x32xf32>
    %cst_169 = arith.constant dense<0.000000e+00> : vector<8x16xf32>
    %160 = tpu.matmul %159, %157, %cst_169 {dimension_numbers = #tpu.dot_dimension_numbers<[1], [0], [0], [1], [0, 0, 1, 1], [], []>} : vector<8x32xf32>, vector<32x16xf32>, vector<8x16xf32> -> vector<8x16xf32>
    %161 = arith.addf %154, %160 : vector<8x16xf32>
    %c3_170 = arith.constant 3 : index
    %c0_171 = arith.constant 0 : index
    %c0_172 = arith.constant 0 : index
    %162 = vector.load %arg8[%c3_170, %c0_171, %c0_172] : memref<9x16x16xf32, #tpu.memory_space<vmem>>, vector<1x16x16xf32>
    %163 = vector.shape_cast %162 : vector<1x16x16xf32> to vector<16x16xf32>
    %cst_173 = arith.constant dense<0.000000e+00> : vector<32x16xf32>
    %164 = tpu.matmul %139, %163, %cst_173 {dimension_numbers = #tpu.dot_dimension_numbers<[1], [0], [0], [1], [0, 0, 1, 1], [], []>} : vector<32x16xf32>, vector<16x16xf32>, vector<32x16xf32> -> vector<32x16xf32>
    %c3_174 = arith.constant 3 : index
    %c0_175 = arith.constant 0 : index
    %c0_176 = arith.constant 0 : index
    %165 = vector.load %arg9[%c3_174, %c0_175, %c0_176] : memref<9x8x32xf32, #tpu.memory_space<vmem>>, vector<1x8x32xf32>
    %166 = vector.shape_cast %165 : vector<1x8x32xf32> to vector<8x32xf32>
    %cst_177 = arith.constant dense<0.000000e+00> : vector<8x16xf32>
    %167 = tpu.matmul %166, %164, %cst_177 {dimension_numbers = #tpu.dot_dimension_numbers<[1], [0], [0], [1], [0, 0, 1, 1], [], []>} : vector<8x32xf32>, vector<32x16xf32>, vector<8x16xf32> -> vector<8x16xf32>
    %168 = arith.addf %161, %167 : vector<8x16xf32>
    %c4_178 = arith.constant 4 : index
    %c0_179 = arith.constant 0 : index
    %c0_180 = arith.constant 0 : index
    %169 = vector.load %arg8[%c4_178, %c0_179, %c0_180] : memref<9x16x16xf32, #tpu.memory_space<vmem>>, vector<1x16x16xf32>
    %170 = vector.shape_cast %169 : vector<1x16x16xf32> to vector<16x16xf32>
    %cst_181 = arith.constant dense<0.000000e+00> : vector<32x16xf32>
    %171 = tpu.matmul %139, %170, %cst_181 {dimension_numbers = #tpu.dot_dimension_numbers<[1], [0], [0], [1], [0, 0, 1, 1], [], []>} : vector<32x16xf32>, vector<16x16xf32>, vector<32x16xf32> -> vector<32x16xf32>
    %c4_182 = arith.constant 4 : index
    %c0_183 = arith.constant 0 : index
    %c0_184 = arith.constant 0 : index
    %172 = vector.load %arg9[%c4_182, %c0_183, %c0_184] : memref<9x8x32xf32, #tpu.memory_space<vmem>>, vector<1x8x32xf32>
    %173 = vector.shape_cast %172 : vector<1x8x32xf32> to vector<8x32xf32>
    %cst_185 = arith.constant dense<0.000000e+00> : vector<8x16xf32>
    %174 = tpu.matmul %173, %171, %cst_185 {dimension_numbers = #tpu.dot_dimension_numbers<[1], [0], [0], [1], [0, 0, 1, 1], [], []>} : vector<8x32xf32>, vector<32x16xf32>, vector<8x16xf32> -> vector<8x16xf32>
    %175 = arith.addf %168, %174 : vector<8x16xf32>
    %c5_186 = arith.constant 5 : index
    %c0_187 = arith.constant 0 : index
    %c0_188 = arith.constant 0 : index
    %176 = vector.load %arg8[%c5_186, %c0_187, %c0_188] : memref<9x16x16xf32, #tpu.memory_space<vmem>>, vector<1x16x16xf32>
    %177 = vector.shape_cast %176 : vector<1x16x16xf32> to vector<16x16xf32>
    %cst_189 = arith.constant dense<0.000000e+00> : vector<32x16xf32>
    %178 = tpu.matmul %139, %177, %cst_189 {dimension_numbers = #tpu.dot_dimension_numbers<[1], [0], [0], [1], [0, 0, 1, 1], [], []>} : vector<32x16xf32>, vector<16x16xf32>, vector<32x16xf32> -> vector<32x16xf32>
    %c5_190 = arith.constant 5 : index
    %c0_191 = arith.constant 0 : index
    %c0_192 = arith.constant 0 : index
    %179 = vector.load %arg9[%c5_190, %c0_191, %c0_192] : memref<9x8x32xf32, #tpu.memory_space<vmem>>, vector<1x8x32xf32>
    %180 = vector.shape_cast %179 : vector<1x8x32xf32> to vector<8x32xf32>
    %cst_193 = arith.constant dense<0.000000e+00> : vector<8x16xf32>
    %181 = tpu.matmul %180, %178, %cst_193 {dimension_numbers = #tpu.dot_dimension_numbers<[1], [0], [0], [1], [0, 0, 1, 1], [], []>} : vector<8x32xf32>, vector<32x16xf32>, vector<8x16xf32> -> vector<8x16xf32>
    %182 = arith.addf %175, %181 : vector<8x16xf32>
    %c6_194 = arith.constant 6 : index
    %c0_195 = arith.constant 0 : index
    %c0_196 = arith.constant 0 : index
    %183 = vector.load %arg8[%c6_194, %c0_195, %c0_196] : memref<9x16x16xf32, #tpu.memory_space<vmem>>, vector<1x16x16xf32>
    %184 = vector.shape_cast %183 : vector<1x16x16xf32> to vector<16x16xf32>
    %cst_197 = arith.constant dense<0.000000e+00> : vector<32x16xf32>
    %185 = tpu.matmul %139, %184, %cst_197 {dimension_numbers = #tpu.dot_dimension_numbers<[1], [0], [0], [1], [0, 0, 1, 1], [], []>} : vector<32x16xf32>, vector<16x16xf32>, vector<32x16xf32> -> vector<32x16xf32>
    %c6_198 = arith.constant 6 : index
    %c0_199 = arith.constant 0 : index
    %c0_200 = arith.constant 0 : index
    %186 = vector.load %arg9[%c6_198, %c0_199, %c0_200] : memref<9x8x32xf32, #tpu.memory_space<vmem>>, vector<1x8x32xf32>
    %187 = vector.shape_cast %186 : vector<1x8x32xf32> to vector<8x32xf32>
    %cst_201 = arith.constant dense<0.000000e+00> : vector<8x16xf32>
    %188 = tpu.matmul %187, %185, %cst_201 {dimension_numbers = #tpu.dot_dimension_numbers<[1], [0], [0], [1], [0, 0, 1, 1], [], []>} : vector<8x32xf32>, vector<32x16xf32>, vector<8x16xf32> -> vector<8x16xf32>
    %189 = arith.addf %182, %188 : vector<8x16xf32>
    %c7_202 = arith.constant 7 : index
    %c0_203 = arith.constant 0 : index
    %c0_204 = arith.constant 0 : index
    %190 = vector.load %arg8[%c7_202, %c0_203, %c0_204] : memref<9x16x16xf32, #tpu.memory_space<vmem>>, vector<1x16x16xf32>
    %191 = vector.shape_cast %190 : vector<1x16x16xf32> to vector<16x16xf32>
    %cst_205 = arith.constant dense<0.000000e+00> : vector<32x16xf32>
    %192 = tpu.matmul %139, %191, %cst_205 {dimension_numbers = #tpu.dot_dimension_numbers<[1], [0], [0], [1], [0, 0, 1, 1], [], []>} : vector<32x16xf32>, vector<16x16xf32>, vector<32x16xf32> -> vector<32x16xf32>
    %c7_206 = arith.constant 7 : index
    %c0_207 = arith.constant 0 : index
    %c0_208 = arith.constant 0 : index
    %193 = vector.load %arg9[%c7_206, %c0_207, %c0_208] : memref<9x8x32xf32, #tpu.memory_space<vmem>>, vector<1x8x32xf32>
    %194 = vector.shape_cast %193 : vector<1x8x32xf32> to vector<8x32xf32>
    %cst_209 = arith.constant dense<0.000000e+00> : vector<8x16xf32>
    %195 = tpu.matmul %194, %192, %cst_209 {dimension_numbers = #tpu.dot_dimension_numbers<[1], [0], [0], [1], [0, 0, 1, 1], [], []>} : vector<8x32xf32>, vector<32x16xf32>, vector<8x16xf32> -> vector<8x16xf32>
    %196 = arith.addf %189, %195 : vector<8x16xf32>
    %c8_210 = arith.constant 8 : index
    %c0_211 = arith.constant 0 : index
    %c0_212 = arith.constant 0 : index
    %197 = vector.load %arg8[%c8_210, %c0_211, %c0_212] : memref<9x16x16xf32, #tpu.memory_space<vmem>>, vector<1x16x16xf32>
    %198 = vector.shape_cast %197 : vector<1x16x16xf32> to vector<16x16xf32>
    %cst_213 = arith.constant dense<0.000000e+00> : vector<32x16xf32>
    %199 = tpu.matmul %139, %198, %cst_213 {dimension_numbers = #tpu.dot_dimension_numbers<[1], [0], [0], [1], [0, 0, 1, 1], [], []>} : vector<32x16xf32>, vector<16x16xf32>, vector<32x16xf32> -> vector<32x16xf32>
    %c8_214 = arith.constant 8 : index
    %c0_215 = arith.constant 0 : index
    %c0_216 = arith.constant 0 : index
    %200 = vector.load %arg9[%c8_214, %c0_215, %c0_216] : memref<9x8x32xf32, #tpu.memory_space<vmem>>, vector<1x8x32xf32>
    %201 = vector.shape_cast %200 : vector<1x8x32xf32> to vector<8x32xf32>
    %cst_217 = arith.constant dense<0.000000e+00> : vector<8x16xf32>
    %202 = tpu.matmul %201, %199, %cst_217 {dimension_numbers = #tpu.dot_dimension_numbers<[1], [0], [0], [1], [0, 0, 1, 1], [], []>} : vector<8x32xf32>, vector<32x16xf32>, vector<8x16xf32> -> vector<8x16xf32>
    %203 = arith.addf %196, %202 : vector<8x16xf32>
    %c0_218 = arith.constant 0 : index
    %c0_219 = arith.constant 0 : index
    %204 = vector.load %arg10[%c0_218, %c0_219] : memref<8x1xf32, #tpu.memory_space<vmem>>, vector<8x1xf32>
    %205 = vector.broadcast %204 : vector<8x1xf32> to vector<8x16xf32>
    %206 = arith.addf %203, %205 : vector<8x16xf32>
    %cst_220 = arith.constant 0.000000e+00 : f32
    %207 = vector.broadcast %cst_220 : f32 to vector<8x16xf32>
    %208 = arith.maximumf %206, %207 : vector<8x16xf32>
    %c0_221 = arith.constant 0 : index
    %c0_222 = arith.constant 0 : index
    %209 = vector.load %arg11[%c0_221, %c0_222] : memref<5x8xf32, #tpu.memory_space<vmem>>, vector<5x8xf32>
    %cst_223 = arith.constant dense<0.000000e+00> : vector<5x16xf32>
    %210 = tpu.matmul %209, %208, %cst_223 {dimension_numbers = #tpu.dot_dimension_numbers<[1], [0], [0], [1], [0, 0, 1, 1], [], []>} : vector<5x8xf32>, vector<8x16xf32>, vector<5x16xf32> -> vector<5x16xf32>
    %c0_224 = arith.constant 0 : index
    %c0_225 = arith.constant 0 : index
    %211 = vector.load %arg12[%c0_224, %c0_225] : memref<5x1xf32, #tpu.memory_space<vmem>>, vector<5x1xf32>
    %212 = vector.broadcast %211 : vector<5x1xf32> to vector<5x16xf32>
    %213 = arith.addf %210, %212 : vector<5x16xf32>
    %c0_226 = arith.constant 0 : index
    %c0_227 = arith.constant 0 : index
    %214 = vector.load %arg13[%c0_226, %c0_227] : memref<16x256xf32, #tpu.memory_space<vmem>>, vector<16x256xf32>
    %cst_228 = arith.constant dense<0.000000e+00> : vector<5x256xf32>
    %215 = tpu.matmul %213, %214, %cst_228 {dimension_numbers = #tpu.dot_dimension_numbers<[1], [0], [0], [1], [0, 0, 1, 1], [], []>} : vector<5x16xf32>, vector<16x256xf32>, vector<5x256xf32> -> vector<5x256xf32>
    %c0_229 = arith.constant 0 : index
    %c0_230 = arith.constant 0 : index
    %c0_231 = arith.constant 0 : index
    %216 = vector.load %arg20[%c0_229, %c0_230, %c0_231] : memref<1x5x256xf32, #tpu.memory_space<vmem>>, vector<1x5x256xf32>
    %217 = vector.shape_cast %216 : vector<1x5x256xf32> to vector<5x256xf32>
    %218 = vector.shape_cast %215 : vector<5x256xf32> to vector<1x5x256xf32>
    tpu.vector_store %arg20[%c0_229, %c0_230, %c0_231], %218 {strides = array<i32>} : memref<1x5x256xf32, #tpu.memory_space<vmem>>, vector<1x5x256xf32>,
    %cst_232 = arith.constant 0.000000e+00 : f32
    %219 = vector.broadcast %cst_232 : f32 to vector<4x64xf32>
    %c0_233 = arith.constant 0 : index
    %c0_234 = arith.constant 0 : index
    %c0_235 = arith.constant 0 : index
    %220 = vector.load %arg14[%c0_233, %c0_234, %c0_235] : memref<9x64x64xf32, #tpu.memory_space<vmem>>, vector<1x64x64xf32>
    %221 = vector.shape_cast %220 : vector<1x64x64xf32> to vector<64x64xf32>
    %cst_236 = arith.constant dense<0.000000e+00> : vector<16x64xf32>
    %222 = tpu.matmul %70, %221, %cst_236 {dimension_numbers = #tpu.dot_dimension_numbers<[1], [0], [0], [1], [0, 0, 1, 1], [], []>} : vector<16x64xf32>, vector<64x64xf32>, vector<16x64xf32> -> vector<16x64xf32>
    %c0_237 = arith.constant 0 : index
    %c0_238 = arith.constant 0 : index
    %c0_239 = arith.constant 0 : index
    %223 = vector.load %arg15[%c0_237, %c0_238, %c0_239] : memref<9x4x16xf32, #tpu.memory_space<vmem>>, vector<1x4x16xf32>
    %224 = vector.shape_cast %223 : vector<1x4x16xf32> to vector<4x16xf32>
    %cst_240 = arith.constant dense<0.000000e+00> : vector<4x64xf32>
    %225 = tpu.matmul %224, %222, %cst_240 {dimension_numbers = #tpu.dot_dimension_numbers<[1], [0], [0], [1], [0, 0, 1, 1], [], []>} : vector<4x16xf32>, vector<16x64xf32>, vector<4x64xf32> -> vector<4x64xf32>
    %226 = arith.addf %219, %225 : vector<4x64xf32>
    %c1_241 = arith.constant 1 : index
    %c0_242 = arith.constant 0 : index
    %c0_243 = arith.constant 0 : index
    %227 = vector.load %arg14[%c1_241, %c0_242, %c0_243] : memref<9x64x64xf32, #tpu.memory_space<vmem>>, vector<1x64x64xf32>
    %228 = vector.shape_cast %227 : vector<1x64x64xf32> to vector<64x64xf32>
    %cst_244 = arith.constant dense<0.000000e+00> : vector<16x64xf32>
    %229 = tpu.matmul %70, %228, %cst_244 {dimension_numbers = #tpu.dot_dimension_numbers<[1], [0], [0], [1], [0, 0, 1, 1], [], []>} : vector<16x64xf32>, vector<64x64xf32>, vector<16x64xf32> -> vector<16x64xf32>
    %c1_245 = arith.constant 1 : index
    %c0_246 = arith.constant 0 : index
    %c0_247 = arith.constant 0 : index
    %230 = vector.load %arg15[%c1_245, %c0_246, %c0_247] : memref<9x4x16xf32, #tpu.memory_space<vmem>>, vector<1x4x16xf32>
    %231 = vector.shape_cast %230 : vector<1x4x16xf32> to vector<4x16xf32>
    %cst_248 = arith.constant dense<0.000000e+00> : vector<4x64xf32>
    %232 = tpu.matmul %231, %229, %cst_248 {dimension_numbers = #tpu.dot_dimension_numbers<[1], [0], [0], [1], [0, 0, 1, 1], [], []>} : vector<4x16xf32>, vector<16x64xf32>, vector<4x64xf32> -> vector<4x64xf32>
    %233 = arith.addf %226, %232 : vector<4x64xf32>
    %c2_249 = arith.constant 2 : index
    %c0_250 = arith.constant 0 : index
    %c0_251 = arith.constant 0 : index
    %234 = vector.load %arg14[%c2_249, %c0_250, %c0_251] : memref<9x64x64xf32, #tpu.memory_space<vmem>>, vector<1x64x64xf32>
    %235 = vector.shape_cast %234 : vector<1x64x64xf32> to vector<64x64xf32>
    %cst_252 = arith.constant dense<0.000000e+00> : vector<16x64xf32>
    %236 = tpu.matmul %70, %235, %cst_252 {dimension_numbers = #tpu.dot_dimension_numbers<[1], [0], [0], [1], [0, 0, 1, 1], [], []>} : vector<16x64xf32>, vector<64x64xf32>, vector<16x64xf32> -> vector<16x64xf32>
    %c2_253 = arith.constant 2 : index
    %c0_254 = arith.constant 0 : index
    %c0_255 = arith.constant 0 : index
    %237 = vector.load %arg15[%c2_253, %c0_254, %c0_255] : memref<9x4x16xf32, #tpu.memory_space<vmem>>, vector<1x4x16xf32>
    %238 = vector.shape_cast %237 : vector<1x4x16xf32> to vector<4x16xf32>
    %cst_256 = arith.constant dense<0.000000e+00> : vector<4x64xf32>
    %239 = tpu.matmul %238, %236, %cst_256 {dimension_numbers = #tpu.dot_dimension_numbers<[1], [0], [0], [1], [0, 0, 1, 1], [], []>} : vector<4x16xf32>, vector<16x64xf32>, vector<4x64xf32> -> vector<4x64xf32>
    %240 = arith.addf %233, %239 : vector<4x64xf32>
    %c3_257 = arith.constant 3 : index
    %c0_258 = arith.constant 0 : index
    %c0_259 = arith.constant 0 : index
    %241 = vector.load %arg14[%c3_257, %c0_258, %c0_259] : memref<9x64x64xf32, #tpu.memory_space<vmem>>, vector<1x64x64xf32>
    %242 = vector.shape_cast %241 : vector<1x64x64xf32> to vector<64x64xf32>
    %cst_260 = arith.constant dense<0.000000e+00> : vector<16x64xf32>
    %243 = tpu.matmul %70, %242, %cst_260 {dimension_numbers = #tpu.dot_dimension_numbers<[1], [0], [0], [1], [0, 0, 1, 1], [], []>} : vector<16x64xf32>, vector<64x64xf32>, vector<16x64xf32> -> vector<16x64xf32>
    %c3_261 = arith.constant 3 : index
    %c0_262 = arith.constant 0 : index
    %c0_263 = arith.constant 0 : index
    %244 = vector.load %arg15[%c3_261, %c0_262, %c0_263] : memref<9x4x16xf32, #tpu.memory_space<vmem>>, vector<1x4x16xf32>
    %245 = vector.shape_cast %244 : vector<1x4x16xf32> to vector<4x16xf32>
    %cst_264 = arith.constant dense<0.000000e+00> : vector<4x64xf32>
    %246 = tpu.matmul %245, %243, %cst_264 {dimension_numbers = #tpu.dot_dimension_numbers<[1], [0], [0], [1], [0, 0, 1, 1], [], []>} : vector<4x16xf32>, vector<16x64xf32>, vector<4x64xf32> -> vector<4x64xf32>
    %247 = arith.addf %240, %246 : vector<4x64xf32>
    %c4_265 = arith.constant 4 : index
    %c0_266 = arith.constant 0 : index
    %c0_267 = arith.constant 0 : index
    %248 = vector.load %arg14[%c4_265, %c0_266, %c0_267] : memref<9x64x64xf32, #tpu.memory_space<vmem>>, vector<1x64x64xf32>
    %249 = vector.shape_cast %248 : vector<1x64x64xf32> to vector<64x64xf32>
    %cst_268 = arith.constant dense<0.000000e+00> : vector<16x64xf32>
    %250 = tpu.matmul %70, %249, %cst_268 {dimension_numbers = #tpu.dot_dimension_numbers<[1], [0], [0], [1], [0, 0, 1, 1], [], []>} : vector<16x64xf32>, vector<64x64xf32>, vector<16x64xf32> -> vector<16x64xf32>
    %c4_269 = arith.constant 4 : index
    %c0_270 = arith.constant 0 : index
    %c0_271 = arith.constant 0 : index
    %251 = vector.load %arg15[%c4_269, %c0_270, %c0_271] : memref<9x4x16xf32, #tpu.memory_space<vmem>>, vector<1x4x16xf32>
    %252 = vector.shape_cast %251 : vector<1x4x16xf32> to vector<4x16xf32>
    %cst_272 = arith.constant dense<0.000000e+00> : vector<4x64xf32>
    %253 = tpu.matmul %252, %250, %cst_272 {dimension_numbers = #tpu.dot_dimension_numbers<[1], [0], [0], [1], [0, 0, 1, 1], [], []>} : vector<4x16xf32>, vector<16x64xf32>, vector<4x64xf32> -> vector<4x64xf32>
    %254 = arith.addf %247, %253 : vector<4x64xf32>
    %c5_273 = arith.constant 5 : index
    %c0_274 = arith.constant 0 : index
    %c0_275 = arith.constant 0 : index
    %255 = vector.load %arg14[%c5_273, %c0_274, %c0_275] : memref<9x64x64xf32, #tpu.memory_space<vmem>>, vector<1x64x64xf32>
    %256 = vector.shape_cast %255 : vector<1x64x64xf32> to vector<64x64xf32>
    %cst_276 = arith.constant dense<0.000000e+00> : vector<16x64xf32>
    %257 = tpu.matmul %70, %256, %cst_276 {dimension_numbers = #tpu.dot_dimension_numbers<[1], [0], [0], [1], [0, 0, 1, 1], [], []>} : vector<16x64xf32>, vector<64x64xf32>, vector<16x64xf32> -> vector<16x64xf32>
    %c5_277 = arith.constant 5 : index
    %c0_278 = arith.constant 0 : index
    %c0_279 = arith.constant 0 : index
    %258 = vector.load %arg15[%c5_277, %c0_278, %c0_279] : memref<9x4x16xf32, #tpu.memory_space<vmem>>, vector<1x4x16xf32>
    %259 = vector.shape_cast %258 : vector<1x4x16xf32> to vector<4x16xf32>
    %cst_280 = arith.constant dense<0.000000e+00> : vector<4x64xf32>
    %260 = tpu.matmul %259, %257, %cst_280 {dimension_numbers = #tpu.dot_dimension_numbers<[1], [0], [0], [1], [0, 0, 1, 1], [], []>} : vector<4x16xf32>, vector<16x64xf32>, vector<4x64xf32> -> vector<4x64xf32>
    %261 = arith.addf %254, %260 : vector<4x64xf32>
    %c6_281 = arith.constant 6 : index
    %c0_282 = arith.constant 0 : index
    %c0_283 = arith.constant 0 : index
    %262 = vector.load %arg14[%c6_281, %c0_282, %c0_283] : memref<9x64x64xf32, #tpu.memory_space<vmem>>, vector<1x64x64xf32>
    %263 = vector.shape_cast %262 : vector<1x64x64xf32> to vector<64x64xf32>
    %cst_284 = arith.constant dense<0.000000e+00> : vector<16x64xf32>
    %264 = tpu.matmul %70, %263, %cst_284 {dimension_numbers = #tpu.dot_dimension_numbers<[1], [0], [0], [1], [0, 0, 1, 1], [], []>} : vector<16x64xf32>, vector<64x64xf32>, vector<16x64xf32> -> vector<16x64xf32>
    %c6_285 = arith.constant 6 : index
    %c0_286 = arith.constant 0 : index
    %c0_287 = arith.constant 0 : index
    %265 = vector.load %arg15[%c6_285, %c0_286, %c0_287] : memref<9x4x16xf32, #tpu.memory_space<vmem>>, vector<1x4x16xf32>
    %266 = vector.shape_cast %265 : vector<1x4x16xf32> to vector<4x16xf32>
    %cst_288 = arith.constant dense<0.000000e+00> : vector<4x64xf32>
    %267 = tpu.matmul %266, %264, %cst_288 {dimension_numbers = #tpu.dot_dimension_numbers<[1], [0], [0], [1], [0, 0, 1, 1], [], []>} : vector<4x16xf32>, vector<16x64xf32>, vector<4x64xf32> -> vector<4x64xf32>
    %268 = arith.addf %261, %267 : vector<4x64xf32>
    %c7_289 = arith.constant 7 : index
    %c0_290 = arith.constant 0 : index
    %c0_291 = arith.constant 0 : index
    %269 = vector.load %arg14[%c7_289, %c0_290, %c0_291] : memref<9x64x64xf32, #tpu.memory_space<vmem>>, vector<1x64x64xf32>
    %270 = vector.shape_cast %269 : vector<1x64x64xf32> to vector<64x64xf32>
    %cst_292 = arith.constant dense<0.000000e+00> : vector<16x64xf32>
    %271 = tpu.matmul %70, %270, %cst_292 {dimension_numbers = #tpu.dot_dimension_numbers<[1], [0], [0], [1], [0, 0, 1, 1], [], []>} : vector<16x64xf32>, vector<64x64xf32>, vector<16x64xf32> -> vector<16x64xf32>
    %c7_293 = arith.constant 7 : index
    %c0_294 = arith.constant 0 : index
    %c0_295 = arith.constant 0 : index
    %272 = vector.load %arg15[%c7_293, %c0_294, %c0_295] : memref<9x4x16xf32, #tpu.memory_space<vmem>>, vector<1x4x16xf32>
    %273 = vector.shape_cast %272 : vector<1x4x16xf32> to vector<4x16xf32>
    %cst_296 = arith.constant dense<0.000000e+00> : vector<4x64xf32>
    %274 = tpu.matmul %273, %271, %cst_296 {dimension_numbers = #tpu.dot_dimension_numbers<[1], [0], [0], [1], [0, 0, 1, 1], [], []>} : vector<4x16xf32>, vector<16x64xf32>, vector<4x64xf32> -> vector<4x64xf32>
    %275 = arith.addf %268, %274 : vector<4x64xf32>
    %c8_297 = arith.constant 8 : index
    %c0_298 = arith.constant 0 : index
    %c0_299 = arith.constant 0 : index
    %276 = vector.load %arg14[%c8_297, %c0_298, %c0_299] : memref<9x64x64xf32, #tpu.memory_space<vmem>>, vector<1x64x64xf32>
    %277 = vector.shape_cast %276 : vector<1x64x64xf32> to vector<64x64xf32>
    %cst_300 = arith.constant dense<0.000000e+00> : vector<16x64xf32>
    %278 = tpu.matmul %70, %277, %cst_300 {dimension_numbers = #tpu.dot_dimension_numbers<[1], [0], [0], [1], [0, 0, 1, 1], [], []>} : vector<16x64xf32>, vector<64x64xf32>, vector<16x64xf32> -> vector<16x64xf32>
    %c8_301 = arith.constant 8 : index
    %c0_302 = arith.constant 0 : index
    %c0_303 = arith.constant 0 : index
    %279 = vector.load %arg15[%c8_301, %c0_302, %c0_303] : memref<9x4x16xf32, #tpu.memory_space<vmem>>, vector<1x4x16xf32>
    %280 = vector.shape_cast %279 : vector<1x4x16xf32> to vector<4x16xf32>
    %cst_304 = arith.constant dense<0.000000e+00> : vector<4x64xf32>
    %281 = tpu.matmul %280, %278, %cst_304 {dimension_numbers = #tpu.dot_dimension_numbers<[1], [0], [0], [1], [0, 0, 1, 1], [], []>} : vector<4x16xf32>, vector<16x64xf32>, vector<4x64xf32> -> vector<4x64xf32>
    %282 = arith.addf %275, %281 : vector<4x64xf32>
    %c0_305 = arith.constant 0 : index
    %c0_306 = arith.constant 0 : index
    %283 = vector.load %arg16[%c0_305, %c0_306] : memref<4x1xf32, #tpu.memory_space<vmem>>, vector<4x1xf32>
    %284 = vector.broadcast %283 : vector<4x1xf32> to vector<4x64xf32>
    %285 = arith.addf %282, %284 : vector<4x64xf32>
    %cst_307 = arith.constant 0.000000e+00 : f32
    %286 = vector.broadcast %cst_307 : f32 to vector<4x64xf32>
    %287 = arith.maximumf %285, %286 : vector<4x64xf32>
    %c0_308 = arith.constant 0 : index
    %c0_309 = arith.constant 0 : index
    %288 = vector.load %arg17[%c0_308, %c0_309] : memref<5x4xf32, #tpu.memory_space<vmem>>, vector<5x4xf32>
    %cst_310 = arith.constant dense<0.000000e+00> : vector<5x64xf32>
    %289 = tpu.matmul %288, %287, %cst_310 {dimension_numbers = #tpu.dot_dimension_numbers<[1], [0], [0], [1], [0, 0, 1, 1], [], []>} : vector<5x4xf32>, vector<4x64xf32>, vector<5x64xf32> -> vector<5x64xf32>
    %c0_311 = arith.constant 0 : index
    %c0_312 = arith.constant 0 : index
    %290 = vector.load %arg18[%c0_311, %c0_312] : memref<5x1xf32, #tpu.memory_space<vmem>>, vector<5x1xf32>
    %291 = vector.broadcast %290 : vector<5x1xf32> to vector<5x64xf32>
    %292 = arith.addf %289, %291 : vector<5x64xf32>
    %c0_313 = arith.constant 0 : index
    %c0_314 = arith.constant 0 : index
    %293 = vector.load %arg19[%c0_313, %c0_314] : memref<64x256xf32, #tpu.memory_space<vmem>>, vector<64x256xf32>
    %cst_315 = arith.constant dense<0.000000e+00> : vector<5x256xf32>
    %294 = tpu.matmul %292, %293, %cst_315 {dimension_numbers = #tpu.dot_dimension_numbers<[1], [0], [0], [1], [0, 0, 1, 1], [], []>} : vector<5x64xf32>, vector<64x256xf32>, vector<5x256xf32> -> vector<5x256xf32>
    %c0_316 = arith.constant 0 : index
    %c0_317 = arith.constant 0 : index
    %c0_318 = arith.constant 0 : index
    %295 = vector.load %arg21[%c0_316, %c0_317, %c0_318] : memref<1x5x256xf32, #tpu.memory_space<vmem>>, vector<1x5x256xf32>
    %296 = vector.shape_cast %295 : vector<1x5x256xf32> to vector<5x256xf32>
    %297 = vector.shape_cast %294 : vector<5x256xf32> to vector<1x5x256xf32>
    tpu.vector_store %arg21[%c0_316, %c0_317, %c0_318], %297 {strides = array<i32>} : memref<1x5x256xf32, #tpu.memory_space<vmem>>, vector<1x5x256xf32>,
    return
  }
  func.func @transform_0(%arg0: i32) -> (i32, i32, i32) {
    %c0_i32 = arith.constant 0 : i32
    %c0_i32_0 = arith.constant 0 : i32
    %c0_i32_1 = arith.constant 0 : i32
    return %arg0, %c0_i32, %c0_i32_0 : i32, i32, i32
  }
  func.func @transform_1(%arg0: i32) -> (i32, i32, i32) {
    %c0_i32 = arith.constant 0 : i32
    %c0_i32_0 = arith.constant 0 : i32
    %c0_i32_1 = arith.constant 0 : i32
    %c0_i32_2 = arith.constant 0 : i32
    return %c0_i32, %c0_i32_0, %c0_i32_1 : i32, i32, i32
  }
  func.func @transform_2(%arg0: i32) -> (i32, i32, i32) {
    %c0_i32 = arith.constant 0 : i32
    %c0_i32_0 = arith.constant 0 : i32
    %c0_i32_1 = arith.constant 0 : i32
    %c0_i32_2 = arith.constant 0 : i32
    return %c0_i32, %c0_i32_0, %c0_i32_1 : i32, i32, i32
  }
  func.func @transform_3(%arg0: i32) -> (i32, i32) {
    %c0_i32 = arith.constant 0 : i32
    %c0_i32_0 = arith.constant 0 : i32
    %c0_i32_1 = arith.constant 0 : i32
    return %c0_i32, %c0_i32_0 : i32, i32
  }
  func.func @transform_4(%arg0: i32) -> (i32, i32, i32) {
    %c0_i32 = arith.constant 0 : i32
    %c0_i32_0 = arith.constant 0 : i32
    %c0_i32_1 = arith.constant 0 : i32
    %c0_i32_2 = arith.constant 0 : i32
    return %c0_i32, %c0_i32_0, %c0_i32_1 : i32, i32, i32
  }
  func.func @transform_5(%arg0: i32) -> (i32, i32, i32) {
    %c0_i32 = arith.constant 0 : i32
    %c0_i32_0 = arith.constant 0 : i32
    %c0_i32_1 = arith.constant 0 : i32
    %c0_i32_2 = arith.constant 0 : i32
    return %c0_i32, %c0_i32_0, %c0_i32_1 : i32, i32, i32
  }
  func.func @transform_6(%arg0: i32) -> (i32, i32) {
    %c0_i32 = arith.constant 0 : i32
    %c0_i32_0 = arith.constant 0 : i32
    %c0_i32_1 = arith.constant 0 : i32
    return %c0_i32, %c0_i32_0 : i32, i32
  }
  func.func @transform_7(%arg0: i32) -> (i32, i32, i32) {
    %c0_i32 = arith.constant 0 : i32
    %c0_i32_0 = arith.constant 0 : i32
    %c0_i32_1 = arith.constant 0 : i32
    %c0_i32_2 = arith.constant 0 : i32
    return %c0_i32, %c0_i32_0, %c0_i32_1 : i32, i32, i32
  }
  func.func @transform_8(%arg0: i32) -> (i32, i32, i32) {
    %c0_i32 = arith.constant 0 : i32
    %c0_i32_0 = arith.constant 0 : i32
    %c0_i32_1 = arith.constant 0 : i32
    %c0_i32_2 = arith.constant 0 : i32
    return %c0_i32, %c0_i32_0, %c0_i32_1 : i32, i32, i32
  }
  func.func @transform_9(%arg0: i32) -> (i32, i32) {
    %c0_i32 = arith.constant 0 : i32
    %c0_i32_0 = arith.constant 0 : i32
    %c0_i32_1 = arith.constant 0 : i32
    return %c0_i32, %c0_i32_0 : i32, i32
  }
  func.func @transform_10(%arg0: i32) -> (i32, i32) {
    %c0_i32 = arith.constant 0 : i32
    %c0_i32_0 = arith.constant 0 : i32
    %c0_i32_1 = arith.constant 0 : i32
    return %c0_i32, %c0_i32_0 : i32, i32
  }
  func.func @transform_11(%arg0: i32) -> (i32, i32) {
    %c0_i32 = arith.constant 0 : i32
    %c0_i32_0 = arith.constant 0 : i32
    %c0_i32_1 = arith.constant 0 : i32
    return %c0_i32, %c0_i32_0 : i32, i32
  }
  func.func @transform_12(%arg0: i32) -> (i32, i32) {
    %c0_i32 = arith.constant 0 : i32
    %c0_i32_0 = arith.constant 0 : i32
    %c0_i32_1 = arith.constant 0 : i32
    return %c0_i32, %c0_i32_0 : i32, i32
  }
  func.func @transform_13(%arg0: i32) -> (i32, i32, i32) {
    %c0_i32 = arith.constant 0 : i32
    %c0_i32_0 = arith.constant 0 : i32
    %c0_i32_1 = arith.constant 0 : i32
    %c0_i32_2 = arith.constant 0 : i32
    return %c0_i32, %c0_i32_0, %c0_i32_1 : i32, i32, i32
  }
  func.func @transform_14(%arg0: i32) -> (i32, i32, i32) {
    %c0_i32 = arith.constant 0 : i32
    %c0_i32_0 = arith.constant 0 : i32
    %c0_i32_1 = arith.constant 0 : i32
    %c0_i32_2 = arith.constant 0 : i32
    return %c0_i32, %c0_i32_0, %c0_i32_1 : i32, i32, i32
  }
  func.func @transform_15(%arg0: i32) -> (i32, i32) {
    %c0_i32 = arith.constant 0 : i32
    %c0_i32_0 = arith.constant 0 : i32
    %c0_i32_1 = arith.constant 0 : i32
    return %c0_i32, %c0_i32_0 : i32, i32
  }
  func.func @transform_16(%arg0: i32) -> (i32, i32) {
    %c0_i32 = arith.constant 0 : i32
    %c0_i32_0 = arith.constant 0 : i32
    %c0_i32_1 = arith.constant 0 : i32
    return %c0_i32, %c0_i32_0 : i32, i32
  }
  func.func @transform_17(%arg0: i32) -> (i32, i32) {
    %c0_i32 = arith.constant 0 : i32
    %c0_i32_0 = arith.constant 0 : i32
    %c0_i32_1 = arith.constant 0 : i32
    return %c0_i32, %c0_i32_0 : i32, i32
  }
  func.func @transform_18(%arg0: i32) -> (i32, i32) {
    %c0_i32 = arith.constant 0 : i32
    %c0_i32_0 = arith.constant 0 : i32
    %c0_i32_1 = arith.constant 0 : i32
    return %c0_i32, %c0_i32_0 : i32, i32
  }
  func.func @transform_19(%arg0: i32) -> (i32, i32, i32) {
    %c0_i32 = arith.constant 0 : i32
    %c0_i32_0 = arith.constant 0 : i32
    %c0_i32_1 = arith.constant 0 : i32
    return %arg0, %c0_i32, %c0_i32_0 : i32, i32, i32
  }
  func.func @transform_20(%arg0: i32) -> (i32, i32, i32) {
    %c0_i32 = arith.constant 0 : i32
    %c0_i32_0 = arith.constant 0 : i32
    %c0_i32_1 = arith.constant 0 : i32
    return %arg0, %c0_i32, %c0_i32_0 : i32, i32, i32
  }
}

</mosaic_0001>

<bundles_post_ra>
// kernel: tpu_custom_call.1
= control target key start
LH: loop header
LB: loop body
LE: loop exit
PB: predicated region body
PF: predicated region fallthrough
CT: control target
= control target key end

     0   :  { %s11816_s0 = inlined_call_operand.vmem [shape: f32[2,4,256], index: 0, kind: input, shape index: {}]   ;;  %s11817_s1 = inlined_call_operand.vmem [shape: f32[9,256,64], index: 1, kind: input, shape index: {}]   ;;  %s11818_s2 = inlined_call_operand.vmem [shape: f32[9,16,4], index: 2, kind: input, shape index: {}]   ;;  %s11819_s3 = inlined_call_operand.vmem [shape: f32[16,1], index: 3, kind: input, shape index: {}]   ;;  %s11820_s4 = inlined_call_operand.vmem [shape: f32[9,64,16], index: 4, kind: input, shape index: {}]   ;;  %s11821_s5 = inlined_call_operand.vmem [shape: f32[9,32,16], index: 5, kind: input, shape index: {}]   ;;  %s11822_s6 = inlined_call_operand.vmem [shape: f32[32,1], index: 6, kind: input, shape index: {}]   ;;  %s11823_s7 = inlined_call_operand.vmem [shape: f32[9,16,16], index: 7, kind: input, shape index: {}]   ;;  %s11824_s8 = inlined_call_operand.vmem [shape: f32[9,8,32], index: 8, kind: input, shape index: {}]   ;;  %s11825_s9 = inlined_call_operand.vmem [shape: f32[8,1], index: 9, kind: input, shape index: {}]   ;;  %s11826_s10 = inlined_call_operand.vmem [shape: f32[5,8], index: 10, kind: input, shape index: {}]   ;;  %s11827_s11 = inlined_call_operand.vmem [shape: f32[5,1], index: 11, kind: input, shape index: {}]   ;;  %s11828_s12 = inlined_call_operand.vmem [shape: f32[16,256], index: 12, kind: input, shape index: {}]   ;;  %s11829_s13 = inlined_call_operand.vmem [shape: f32[9,64,64], index: 13, kind: input, shape index: {}]   ;;  %s11830_s14 = inlined_call_operand.vmem [shape: f32[9,4,16], index: 14, kind: input, shape index: {}]   ;;  %s11831_s15 = inlined_call_operand.vmem [shape: f32[4,1], index: 15, kind: input, shape index: {}]   ;;  %s11832_s16 = inlined_call_operand.vmem [shape: f32[5,4], index: 16, kind: input, shape index: {}]   ;;  %s11833_s17 = inlined_call_operand.vmem [shape: f32[5,1], index: 17, kind: input, shape index: {}]   ;;  %s11834_s18 = inlined_call_operand.vmem [shape: f32[64,256], index: 18, kind: input, shape index: {}]   ;;  %s11835_s19 = inlined_call_operand.vmem [shape: f32[2,5,256], index: 19, kind: output, shape index: {0}]   ;;  %s11836_s20 = inlined_call_operand.vmem [shape: f32[2,5,256], index: 20, kind: output, shape index: {1}]  }
   0x1   :  { %11843 = sst [smem:[#allocation3_spill]] %s11816_s0 }
   0x2   :  { %11844 = sst [smem:[#allocation4_spill]] %s11817_s1  ;;  %s9702_s1 = smov 0  }
   0x3   :  { %11845 = sst [smem:[#allocation5_spill]] %s11818_s2 }
   0x4   :  { %11846 = sst [smem:[#allocation6_spill]] %s11819_s3 }
   0x5   :  { %11847 = sst [smem:[#allocation7_spill]] %s11820_s4 }
   0x6 LB: > { %11848 = sst [smem:[#allocation2_spill]] %s9592_s1  ;;  %s7488_s22 = sadd.s32 4294967295, %s9592_s1   ;;  %s9592_s1 = sphi %s9702_s1, %s31_s1  }
   0x7   : > { %p7492_p0 = scmp.ge.s32.totalorder %s9592_s1, 1  ;;  %p565_p1 = scmp.lt.s32.totalorder %s9592_s1, 3 }
   0x9   : > { %p566_p2 = pnand %p7492_p0, %p565_p1 }
   0xa   : > { %s11849_s2 = sld [smem:[#allocation4_spill]] (!%p566_p2)  ;;  %p9796_p3 = scmp.lt.s32.totalorder (!%p566_p2), %s7488_s22, 1 }
   0xb   : > { %569 = sbr.rel (%p566_p2) target bundleno = 7122 (0x1bd2), region = 96  ;;  %s11851_s0 = sld [smem:[#allocation3_spill]] (!%p566_p2) }
   0xc   : > { %s11852_s27 = sld [smem:[#allocation5_spill]] (!%p566_p2) }
   0xd   : > { %s11853_s3 = sld [smem:[#allocation6_spill]] (!%p566_p2) }
  0x10   : > { %v7530_v0 = vld [vmem:[%s11849_s2 + $0x1f8] sm:$0xff]  ;;  %v7529_v4 = vld [vmem:[%s11849_s2 + $0x1f0] sm:$0xff]  ;;  %v7528_v8 = vld [vmem:[%s11849_s2 + $0x1e8] sm:$0xff]  ;;  %s11858_s22 = smov (!%p9796_p3, %s7488_s22), 1  ;;  %vm857_vm0 = vcmask 31744   ;;  %vm864_vm1 = vcmask 1043456  }
  0x11   : > { %v675_v1 = vld [vmem:[%s11849_s2 + $0xf8] sm:$0xff]  ;;  %8161 = vmatprep.subr.mxu1 %v7530_v0  ;;  %v674_v5 = vld [vmem:[%s11849_s2 + $0xf0] sm:$0xff]  ;;  %v673_v9 = vld [vmem:[%s11849_s2 + $0xe8] sm:$0xff]  ;;  %s8123_s28 = sshll.u32 %s11858_s22, 3  ;;  %vm2395_vm2 = vcmask 523264   ;;  %vm2570_vm3 = vcmask 130048  }
  0x12   : > { %v7514_v2 = vld [vmem:[%s11849_s2 + $0x178] sm:$0xff]  ;;  %8126 = vmatprep.subr.mxu0 %v675_v1  ;;  %v7513_v6 = vld [vmem:[%s11849_s2 + $0x170] sm:$0xff]  ;;  %v7512_v10 = vld [vmem:[%s11849_s2 + $0x168] sm:$0xff]  ;;  %s9876_s1 = scalar_lea.vmem %s11851_s0, %s8123_s28  ;;  %s11854_s28 = sld [smem:[#allocation7_spill]]  ;;  %vm9596_vm4 = vmmov 0   ;;  %vm4317_vm5 = vcmask 261120  }
  0x13   : > { %v659_v3 = vld [vmem:[%s11849_s2 + $0x78] sm:$0xff]  ;;  %8162 = vmatpush3.msra.mxu1 %v7514_v2  ;;  %v658_v7 = vld [vmem:[%s11849_s2 + $0x70] sm:$0xff]  ;;  %v657_v11 = vld [vmem:[%s11849_s2 + $0x68] sm:$0xff]  ;;  %vm5627_vm6 = vcmask 64512   ;;  %s11842_s29 = sshll.u32 %s11858_s22, 4  ;;  %s11855_s0 = sshll.u32 %s11858_s22, 4 }
  0x14   : > { %8127 = vmatpush3.msra.mxu0 %v659_v3  ;;  %8163 = vmatprep.subr.mxu1 %v7529_v4  ;;  %v7527_v12 = vld [vmem:[%s11849_s2 + $0x1e0] sm:$0xff]  ;;  %v7526_v16 = vld [vmem:[%s11849_s2 + $0x1d8] sm:$0xff]  ;;  %v7525_v20 = vld [vmem:[%s11849_s2 + $0x1d0] sm:$0xff]  ;;  %s637_s21 = scalar_lea.vmem %s11835_s19, %s11842_s29  ;;  %s642_s24 = scalar_lea.vmem %s11836_s20, %s11855_s0 }
  0x15   : > { %8128 = vmatprep.subr.mxu0 %v674_v5  ;;  %8164 = vmatpush3.msra.mxu1 %v7513_v6  ;;  %v672_v13 = vld [vmem:[%s11849_s2 + $0xe0] sm:$0xff]  ;;  %v671_v17 = vld [vmem:[%s11849_s2 + $0xd8] sm:$0xff]  ;;  %v670_v21 = vld [vmem:[%s11849_s2 + $0xd0] sm:$0xff] }
  0x16   : > { %8129 = vmatpush3.msra.mxu0 %v658_v7  ;;  %8165 = vmatprep.subr.mxu1 %v7528_v8  ;;  %v7511_v14 = vld [vmem:[%s11849_s2 + $0x160] sm:$0xff]  ;;  %v7510_v18 = vld [vmem:[%s11849_s2 + $0x158] sm:$0xff]  ;;  %v7509_v22 = vld [vmem:[%s11849_s2 + $0x150] sm:$0xff] }
  0x17   : > { %8130 = vmatprep.subr.mxu0 %v673_v9  ;;  %v656_v15 = vld [vmem:[%s11849_s2 + $0x60] sm:$0xff]  ;;  %8166 = vmatpush3.msra.mxu1 %v7512_v10  ;;  %v655_v19 = vld [vmem:[%s11849_s2 + $0x58] sm:$0xff]  ;;  %v654_v23 = vld [vmem:[%s11849_s2 + $0x50] sm:$0xff] }
  0x18   : > { %8131 = vmatpush3.msra.mxu0 %v657_v11  ;;  %8167 = vmatprep.subr.mxu1 %v7527_v12  ;;  %v7524_v24 = vld [vmem:[%s11849_s2 + $0x1c8] sm:$0xff]  ;;  %v7523_v28 = vld [vmem:[%s11849_s2 + $0x1c0] sm:$0xff]  ;;  %v7522_v32 = vld [vmem:[%s11849_s2 + $0x1b8] sm:$0xff] }
  0x19   : > { %8132 = vmatprep.subr.mxu0 %v672_v13  ;;  %8168 = vmatpush3.msra.mxu1 %v7511_v14  ;;  %v669_v25 = vld [vmem:[%s11849_s2 + $0xc8] sm:$0xff]  ;;  %v668_v29 = vld [vmem:[%s11849_s2 + $0xc0] sm:$0xff]  ;;  %v667_v33 = vld [vmem:[%s11849_s2 + $0xb8] sm:$0xff] }
  0x1a   : > { %8133 = vmatpush3.msra.mxu0 %v656_v15  ;;  %8169 = vmatprep.subr.mxu1 %v7526_v16  ;;  %v7508_v26 = vld [vmem:[%s11849_s2 + $0x148] sm:$0xff]  ;;  %v7507_v30 = vld [vmem:[%s11849_s2 + $0x140] sm:$0xff]  ;;  %v7506_v34 = vld [vmem:[%s11849_s2 + $0x138] sm:$0xff] }
  0x1b   : > { %8134 = vmatprep.subr.mxu0 %v671_v17  ;;  %8170 = vmatpush3.msra.mxu1 %v7510_v18  ;;  %v653_v27 = vld [vmem:[%s11849_s2 + $0x48] sm:$0xff]  ;;  %v652_v31 = vld [vmem:[%s11849_s2 + $0x40] sm:$0xff]  ;;  %v651_v35 = vld [vmem:[%s11849_s2 + $0x38] sm:$0xff] }
  0x1c   : > { %8135 = vmatpush3.msra.mxu0 %v655_v19  ;;  %8171 = vmatprep.subr.mxu1 %v7525_v20  ;;  %v7521_v36 = vld [vmem:[%s11849_s2 + $0x1b0] sm:$0xff]  ;;  %v7520_v40 = vld [vmem:[%s11849_s2 + $0x1a8] sm:$0xff]  ;;  %v7519_v44 = vld [vmem:[%s11849_s2 + $0x1a0] sm:$0xff] }
  0x1d   : > { %8136 = vmatprep.subr.mxu0 %v670_v21  ;;  %8172 = vmatpush3.msra.mxu1 %v7509_v22  ;;  %v666_v37 = vld [vmem:[%s11849_s2 + $0xb0] sm:$0xff]  ;;  %v665_v41 = vld [vmem:[%s11849_s2 + $0xa8] sm:$0xff]  ;;  %v664_v45 = vld [vmem:[%s11849_s2 + $0xa0] sm:$0xff] }
  0x1e   : > { %8137 = vmatpush3.msra.mxu0 %v654_v23  ;;  %8173 = vmatprep.subr.mxu1 %v7524_v24  ;;  %v7505_v38 = vld [vmem:[%s11849_s2 + $0x130] sm:$0xff]  ;;  %v7504_v42 = vld [vmem:[%s11849_s2 + $0x128] sm:$0xff]  ;;  %v7503_v46 = vld [vmem:[%s11849_s2 + $0x120] sm:$0xff] }
  0x1f   : > { %8138 = vmatprep.subr.mxu0 %v669_v25  ;;  %8174 = vmatpush3.msra.mxu1 %v7508_v26  ;;  %v650_v39 = vld [vmem:[%s11849_s2 + $0x30] sm:$0xff]  ;;  %v649_v43 = vld [vmem:[%s11849_s2 + $0x28] sm:$0xff]  ;;  %v648_v47 = vld [vmem:[%s11849_s2 + $0x20] sm:$0xff] }
  0x20   : > { %8139 = vmatpush3.msra.mxu0 %v653_v27  ;;  %8175 = vmatprep.subr.mxu1 %v7523_v28  ;;  %v7518_v48 = vld [vmem:[%s11849_s2 + $0x198] sm:$0xff]  ;;  %v7517_v52 = vld [vmem:[%s11849_s2 + $0x190] sm:$0xff]  ;;  %v9897_v56 = vld [vmem:[%s9876_s1] sm:$0xff] }
  0x21   : > { %8140 = vmatprep.subr.mxu0 %v668_v29  ;;  %8176 = vmatpush3.msra.mxu1 %v7507_v30  ;;  %v663_v49 = vld [vmem:[%s11849_s2 + $0x98] sm:$0xff]  ;;  %v662_v53 = vld [vmem:[%s11849_s2 + $0x90] sm:$0xff]  ;;  %v7516_v57 = vld [vmem:[%s11849_s2 + $0x188] sm:$0xff]  ;;  %v9919_v63 = vcombine.high %v9897_v56, %v9897_v56 }
  0x22   : > { %8141 = vmatpush3.msra.mxu0 %v652_v31  ;;  %8177 = vmatprep.subr.mxu1 %v7522_v32  ;;  %v7502_v50 = vld [vmem:[%s11849_s2 + $0x118] sm:$0xff]  ;;  %v7501_v54 = vld [vmem:[%s11849_s2 + $0x110] sm:$0xff]  ;;  %v661_v58 = vld [vmem:[%s11849_s2 + $0x88] sm:$0xff] }
  0x23   : > { %8142 = vmatprep.subr.mxu0 %v667_v33  ;;  %8178 = vmatpush3.msra.mxu1 %v7506_v34  ;;  %v647_v51 = vld [vmem:[%s11849_s2 + $0x18] sm:$0xff]  ;;  %v646_v55 = vld [vmem:[%s11849_s2 + $0x10] sm:$0xff]  ;;  %v7500_v59 = vld [vmem:[%s11849_s2 + $0x108] sm:$0xff] }
  0x24   : > { %8143 = vmatpush3.msra.mxu0 %v651_v35  ;;  %8179 = vmatprep.subr.mxu1 %v7521_v36  ;;  %v645_v60 = vld [vmem:[%s11849_s2 + $0x8] sm:$0xff]  ;;  %v7515_v61 = vld [vmem:[%s11849_s2 + $0x180] sm:$0xff]  ;;  %v7531_v2 = vld [vmem:[%s11852_s27 + $0x10] sm:$0xff] }
  0x25   : > { %8144 = vmatprep.subr.mxu0 %v666_v37  ;;  %8180 = vmatpush3.msra.mxu1 %v7505_v38  ;;  %v660_v62 = vld [vmem:[%s11849_s2 + $0x80] sm:$0xff]  ;;  %v7532_v9 = vld [vmem:[%s11852_s27 + $0x18] sm:$0xff]  ;;  %v750_v12 = vld [vmem:[%s11852_s27 + $0x8] sm:$0xff] }
  0x26   : > { %8145 = vmatpush3.msra.mxu0 %v650_v39  ;;  %8181 = vmatprep.subr.mxu1 %v7520_v40  ;;  %v7499_v0 = vld [vmem:[%s11849_s2 + $0x100] sm:$0xff]  ;;  %v7570_v11 = vld [vmem:[%s11849_s2 + $0x2f8] sm:$0xff]  ;;  %v7569_v14 = vld [vmem:[%s11849_s2 + $0x2f0] sm:$0xff] }
  0x27   : > { %8146 = vmatprep.subr.mxu0 %v665_v41  ;;  %8182 = vmatpush3.msra.mxu1 %v7504_v42  ;;  %v644_v1 = vld [vmem:[%s11849_s2] sm:$0xff]  ;;  %v7554_v13 = vld [vmem:[%s11849_s2 + $0x278] sm:$0xff]  ;;  %v7553_v15 = vld [vmem:[%s11849_s2 + $0x270] sm:$0xff] }
  0x28   : > { %8147 = vmatpush3.msra.mxu0 %v649_v43  ;;  %8183 = vmatprep.subr.mxu1 %v7519_v44  ;;  %v749_v10 = vld [vmem:[%s11852_s27] sm:$0xff]  ;;  %v7568_v16 = vld [vmem:[%s11849_s2 + $0x2e8] sm:$0xff]  ;;  %v7566_v20 = vld [vmem:[%s11849_s2 + $0x2d8] sm:$0xff] }
  0x29   : > { %8148 = vmatprep.subr.mxu0 %v664_v45  ;;  %8184 = vmatpush3.msra.mxu1 %v7503_v46  ;;  %v7552_v17 = vld [vmem:[%s11849_s2 + $0x268] sm:$0xff]  ;;  %v7567_v18 = vld [vmem:[%s11849_s2 + $0x2e0] sm:$0xff]  ;;  %v7550_v21 = vld [vmem:[%s11849_s2 + $0x258] sm:$0xff] }
  0x2a   : > { %8149 = vmatpush3.msra.mxu0 %v648_v47  ;;  %8185 = vmatprep.subr.mxu1 %v7518_v48  ;;  %v7551_v19 = vld [vmem:[%s11849_s2 + $0x260] sm:$0xff]  ;;  %v7565_v22 = vld [vmem:[%s11849_s2 + $0x2d0] sm:$0xff]  ;;  %v7564_v24 = vld [vmem:[%s11849_s2 + $0x2c8] sm:$0xff] }
  0x2b   : > { %8150 = vmatprep.subr.mxu0 %v663_v49  ;;  %8186 = vmatpush3.msra.mxu1 %v7502_v50  ;;  %v7549_v23 = vld [vmem:[%s11849_s2 + $0x250] sm:$0xff]  ;;  %v7548_v25 = vld [vmem:[%s11849_s2 + $0x248] sm:$0xff]  ;;  %v7563_v26 = vld [vmem:[%s11849_s2 + $0x2c0] sm:$0xff] }
  0x2c   : > { %8151 = vmatpush3.msra.mxu0 %v647_v51  ;;  %8187 = vmatprep.subr.mxu1 %v7517_v52  ;;  %v7547_v27 = vld [vmem:[%s11849_s2 + $0x240] sm:$0xff]  ;;  %v7562_v28 = vld [vmem:[%s11849_s2 + $0x2b8] sm:$0xff]  ;;  %v7561_v30 = vld [vmem:[%s11849_s2 + $0x2b0] sm:$0xff] }
  0x2d   : > { %8152 = vmatprep.subr.mxu0 %v662_v53  ;;  %8188 = vmatpush3.msra.mxu1 %v7501_v54  ;;  %v7546_v29 = vld [vmem:[%s11849_s2 + $0x238] sm:$0xff]  ;;  %v7545_v31 = vld [vmem:[%s11849_s2 + $0x230] sm:$0xff]  ;;  %v7560_v32 = vld [vmem:[%s11849_s2 + $0x2a8] sm:$0xff] }
  0x2e   : > { %8153 = vmatpush3.msra.mxu0 %v646_v55  ;;  %8189 = vmatprep.subr.mxu1 %v7516_v57  ;;  %v7544_v33 = vld [vmem:[%s11849_s2 + $0x228] sm:$0xff]  ;;  %v7559_v34 = vld [vmem:[%s11849_s2 + $0x2a0] sm:$0xff]  ;;  %v7558_v36 = vld [vmem:[%s11849_s2 + $0x298] sm:$0xff] }
  0x2f   : > { %8154 = vmatprep.subr.mxu0 %v661_v58  ;;  %8190 = vmatpush3.msra.mxu1 %v7500_v59  ;;  %v7543_v35 = vld [vmem:[%s11849_s2 + $0x220] sm:$0xff]  ;;  %v7542_v37 = vld [vmem:[%s11849_s2 + $0x218] sm:$0xff]  ;;  %v7557_v38 = vld [vmem:[%s11849_s2 + $0x290] sm:$0xff] }
  0x30   : > { %8155 = vmatpush3.msra.mxu0 %v645_v60  ;;  %8191 = vmatprep.subr.mxu1 %v7515_v61  ;;  %v7541_v39 = vld [vmem:[%s11849_s2 + $0x210] sm:$0xff]  ;;  %v7556_v40 = vld [vmem:[%s11849_s2 + $0x288] sm:$0xff]  ;;  %v7555_v42 = vld [vmem:[%s11849_s2 + $0x280] sm:$0xff] }
  0x31   : > { %8156 = vmatprep.subr.mxu0 %v660_v62  ;;  %8192 = vmatpush3.msra.mxu1 %v7499_v0  ;;  %v7540_v41 = vld [vmem:[%s11849_s2 + $0x208] sm:$0xff]  ;;  %v7539_v43 = vld [vmem:[%s11849_s2 + $0x200] sm:$0xff]  ;;  %v7607_v55 = vld [vmem:[%s11849_s2 + $0x3f8] sm:$0xff] }
  0x32   : > { %848 = vmatprep.mubr.f32.mxu1 %v9919_v63  ;;  %8157 = vmatpush3.msra.mxu0 %v644_v1  ;;  %v7571_v44 = vld [vmem:[%s11852_s27 + $0x20] sm:$0xff]  ;;  %v7572_v54 = vld [vmem:[%s11852_s27 + $0x28] sm:$0xff]  ;;  %v7591_v57 = vld [vmem:[%s11849_s2 + $0x378] sm:$0xff] }
  0x33   : > { %743 = vmatprep.mubr.f32.mxu0 %v9919_v63  ;;  %849 = vmatmul.mubr.f32.vlgmr.msra.gmra.mxu1 %v9897_v56  ;;  %v7606_v58 = vld [vmem:[%s11849_s2 + $0x3f0] sm:$0xff]  ;;  %v7605_v60 = vld [vmem:[%s11849_s2 + $0x3e8] sm:$0xff]  ;;  %v7604_v62 = vld [vmem:[%s11849_s2 + $0x3e0] sm:$0xff] }
  0x34   : > { %744 = vmatmul.mubr.f32.vlgmr.msra.gmra.mxu0 %v9897_v56  ;;  %8844 = vmatprep.mubr.msk.f32.mxu1 %vm857_vm0, %v7571_v44  ;;  %v7590_v59 = vld [vmem:[%s11849_s2 + $0x370] sm:$0xff]  ;;  %v7589_v61 = vld [vmem:[%s11849_s2 + $0x368] sm:$0xff]  ;;  %v7588_v0 = vld [vmem:[%s11849_s2 + $0x360] sm:$0xff] }
  0x35   : > { %8834 = vmatprep.mubr.msk.f32.mxu0 %vm857_vm0, %v7531_v2  ;;  %v7603_v1 = vld [vmem:[%s11849_s2 + $0x3d8] sm:$0xff]  ;;  %v7639_v44 = vld [vmem:[%s11849_s2 + $0x4d0] sm:$0xff] }
  0x36   : > { %v7587_v2 = vld [vmem:[%s11849_s2 + $0x358] sm:$0xff] }
  0xf3   : > { %v8193_v3 = vpop.f32.mrf.mxu1 }
  0xf4   : > { %v8158_v4 = vpop.f32.mrf.mxu0 }
  0xf5   : > { %v8194_v5 = vpop.f32.mrf.mxu1 }
  0xf6   : > { %v8159_v6 = vpop.f32.mrf.mxu0  ;;  %v8195_v7 = vadd.f32 %v8194_v5, %v8193_v3  ;;  %v7602_v3 = vld [vmem:[%s11849_s2 + $0x3d0] sm:$0xff]  ;;  %v7601_v5 = vld [vmem:[%s11849_s2 + $0x3c8] sm:$0xff] }
  0xf7   : > { %v8160_v8 = vadd.f32 %v8159_v6, %v8158_v4  ;;  %v7586_v4 = vld [vmem:[%s11849_s2 + $0x350] sm:$0xff]  ;;  %v7585_v6 = vld [vmem:[%s11849_s2 + $0x348] sm:$0xff] }
  0xf8   : > { %8832 = vmatprep.subr.msk.mxu0 %vm864_vm1, %v8195_v7 }
  0xf9   : > { %8833 = vmatpush3.msk.msra.mxu0 %vm864_vm1, %v8195_v7  ;;  %v7600_v7 = vld [vmem:[%s11849_s2 + $0x3c0] sm:$0xff] }
  0xfa   : > { %8835 = vmatmul.mubr.msk.f32.vlgmr.msra.gmra.mxu0 %vm857_vm0, %v7532_v9  ;;  %8837 = vmatprep.subr.msk.mxu0 %vm864_vm1, %v8160_v8  ;;  %v7599_v9 = vld [vmem:[%s11849_s2 + $0x3b8] sm:$0xff] }
  0xfb   : > { %8838 = vmatpush3.msk.msra.mxu0 %vm864_vm1, %v8160_v8  ;;  %8839 = vmatprep.mubr.msk.f32.mxu0 %vm857_vm0, %v749_v10  ;;  %v7584_v8 = vld [vmem:[%s11849_s2 + $0x340] sm:$0xff]  ;;  %v7583_v10 = vld [vmem:[%s11849_s2 + $0x338] sm:$0xff] }
  0xfc   : > { %8202 = vmatprep.subr.mxu0 %v7570_v11  ;;  %v7598_v11 = vld [vmem:[%s11849_s2 + $0x3b0] sm:$0xff] }
  0xfe   : > { %8840 = vmatmul.mubr.msk.f32.vlgmr.msra.gmra.mxu0 %vm857_vm0, %v750_v12  ;;  %v7582_v12 = vld [vmem:[%s11849_s2 + $0x330] sm:$0xff] }
  0xff   : > { %8203 = vmatpush3.msra.mxu0 %v7554_v13  ;;  %1124 = vmatprep.mubr.f32.mxu0 %v9919_v63  ;;  %v7597_v13 = vld [vmem:[%s11849_s2 + $0x3a8] sm:$0xff] }
 0x100   : > { %8204 = vmatprep.subr.mxu0 %v7569_v14  ;;  %v7581_v14 = vld [vmem:[%s11849_s2 + $0x328] sm:$0xff] }
 0x101   : > { %8205 = vmatpush3.msra.mxu0 %v7553_v15  ;;  %v7596_v15 = vld [vmem:[%s11849_s2 + $0x3a0] sm:$0xff] }
 0x102   : > { %8206 = vmatprep.subr.mxu0 %v7568_v16  ;;  %v7580_v16 = vld [vmem:[%s11849_s2 + $0x320] sm:$0xff] }
 0x103   : > { %8207 = vmatpush3.msra.mxu0 %v7552_v17  ;;  %v7595_v17 = vld [vmem:[%s11849_s2 + $0x398] sm:$0xff] }
 0x104   : > { %8208 = vmatprep.subr.mxu0 %v7567_v18  ;;  %v7579_v18 = vld [vmem:[%s11849_s2 + $0x318] sm:$0xff] }
 0x105   : > { %8209 = vmatpush3.msra.mxu0 %v7551_v19  ;;  %v7594_v19 = vld [vmem:[%s11849_s2 + $0x390] sm:$0xff] }
 0x106   : > { %8210 = vmatprep.subr.mxu0 %v7566_v20  ;;  %v7578_v20 = vld [vmem:[%s11849_s2 + $0x310] sm:$0xff] }
 0x107   : > { %8211 = vmatpush3.msra.mxu0 %v7550_v21  ;;  %v7593_v21 = vld [vmem:[%s11849_s2 + $0x388] sm:$0xff] }
 0x108   : > { %8212 = vmatprep.subr.mxu0 %v7565_v22  ;;  %v7577_v22 = vld [vmem:[%s11849_s2 + $0x308] sm:$0xff] }
 0x109   : > { %8213 = vmatpush3.msra.mxu0 %v7549_v23  ;;  %v7592_v23 = vld [vmem:[%s11849_s2 + $0x380] sm:$0xff] }
 0x10a   : > { %8214 = vmatprep.subr.mxu0 %v7564_v24  ;;  %v7576_v24 = vld [vmem:[%s11849_s2 + $0x300] sm:$0xff] }
 0x10b   : > { %8215 = vmatpush3.msra.mxu0 %v7548_v25  ;;  %v7608_v25 = vld [vmem:[%s11852_s27 + $0x30] sm:$0xff] }
 0x10c   : > { %8216 = vmatprep.subr.mxu0 %v7563_v26 }
 0x10d   : > { %8217 = vmatpush3.msra.mxu0 %v7547_v27 }
 0x10e   : > { %8218 = vmatprep.subr.mxu0 %v7562_v28 }
 0x10f   : > { %8219 = vmatpush3.msra.mxu0 %v7546_v29 }
 0x110   : > { %8220 = vmatprep.subr.mxu0 %v7561_v30 }
 0x111   : > { %8221 = vmatpush3.msra.mxu0 %v7545_v31 }
 0x112   : > { %8222 = vmatprep.subr.mxu0 %v7560_v32 }
 0x113   : > { %8223 = vmatpush3.msra.mxu0 %v7544_v33  ;;  %v7609_v33 = vld [vmem:[%s11852_s27 + $0x38] sm:$0xff] }
 0x114   : > { %8224 = vmatprep.subr.mxu0 %v7559_v34  ;;  %v7644_v34 = vld [vmem:[%s11849_s2 + $0x4f8] sm:$0xff] }
 0x115   : > { %8225 = vmatpush3.msra.mxu0 %v7543_v35  ;;  %v7628_v35 = vld [vmem:[%s11849_s2 + $0x478] sm:$0xff] }
 0x116   : > { %8226 = vmatprep.subr.mxu0 %v7558_v36  ;;  %v7643_v36 = vld [vmem:[%s11849_s2 + $0x4f0] sm:$0xff] }
 0x117   : > { %8227 = vmatpush3.msra.mxu0 %v7542_v37  ;;  %v7627_v37 = vld [vmem:[%s11849_s2 + $0x470] sm:$0xff] }
 0x118   : > { %8228 = vmatprep.subr.mxu0 %v7557_v38  ;;  %v7642_v38 = vld [vmem:[%s11849_s2 + $0x4e8] sm:$0xff] }
 0x119   : > { %8229 = vmatpush3.msra.mxu0 %v7541_v39  ;;  %v7626_v39 = vld [vmem:[%s11849_s2 + $0x468] sm:$0xff] }
 0x11a   : > { %8230 = vmatprep.subr.mxu0 %v7556_v40  ;;  %v7641_v40 = vld [vmem:[%s11849_s2 + $0x4e0] sm:$0xff] }
 0x11b   : > { %8231 = vmatpush3.msra.mxu0 %v7540_v41  ;;  %v7625_v41 = vld [vmem:[%s11849_s2 + $0x460] sm:$0xff] }
 0x11c   : > { %8232 = vmatprep.subr.mxu0 %v7555_v42  ;;  %v7640_v42 = vld [vmem:[%s11849_s2 + $0x4d8] sm:$0xff] }
 0x11d   : > { %8233 = vmatpush3.msra.mxu0 %v7539_v43  ;;  %v7624_v43 = vld [vmem:[%s11849_s2 + $0x458] sm:$0xff] }
 0x11e   : > { %1125 = vmatmul.mubr.f32.vlgmr.msra.gmra.mxu0 %v9897_v56 }
 0x11f   : > { %8849 = vmatprep.mubr.msk.f32.mxu0 %vm857_vm0, %v7608_v25  ;;  %v7675_v25 = vld [vmem:[%s11849_s2 + $0x5c8] sm:$0xff] }
 0x1ba   : > { %v8836_v45 = vpop.f32.mrf.mxu0 }
 0x1bc   : > { %v934_v46 = vpop.f32.mrf.mxu0 }
 0x1be   : > { %v8841_v47 = vpop.f32.mrf.mxu0 }
 0x1bf   : > { %v10053_v48 = vadd.f32 %v8841_v47, %v8836_v45  ;;  %v7623_v45 = vld [vmem:[%s11849_s2 + $0x450] sm:$0xff]  ;;  %v7622_v47 = vld [vmem:[%s11849_s2 + $0x448] sm:$0xff] }
 0x1c0   : > { %v1018_v49 = vpop.f32.mrf.mxu0 }
 0x1c1   : > { %v10055_v50 = vadd.f32 %v1018_v49, %v934_v46  ;;  %v7638_v46 = vld [vmem:[%s11849_s2 + $0x4c8] sm:$0xff]  ;;  %v7621_v49 = vld [vmem:[%s11849_s2 + $0x440] sm:$0xff] }
 0x1de   : > { %v8234_v51 = vpop.f32.mrf.mxu0 }
 0x1e0   : > { %v8235_v52 = vpop.f32.mrf.mxu0 }
 0x1e1   : > { %v8236_v53 = vadd.f32 %v8235_v52, %v8234_v51  ;;  %v7620_v51 = vld [vmem:[%s11849_s2 + $0x438] sm:$0xff]  ;;  %v7635_v52 = vld [vmem:[%s11849_s2 + $0x4b0] sm:$0xff] }
 0x1e3   : > { %8842 = vmatprep.subr.msk.mxu1 %vm864_vm1, %v8236_v53 }
 0x1e4   : > { %8843 = vmatpush3.msk.msra.mxu1 %vm864_vm1, %v8236_v53  ;;  %v7619_v53 = vld [vmem:[%s11849_s2 + $0x430] sm:$0xff] }
 0x1e5   : > { %8845 = vmatmul.mubr.msk.f32.vlgmr.msra.gmra.mxu1 %vm857_vm0, %v7572_v54  ;;  %8240 = vmatprep.subr.mxu1 %v7607_v55  ;;  %v7634_v54 = vld [vmem:[%s11849_s2 + $0x4a8] sm:$0xff] }
 0x1e6   : > { %8241 = vmatpush3.msra.mxu1 %v7591_v57  ;;  %1316 = vmatprep.mubr.f32.mxu1 %v9919_v63  ;;  %v7618_v55 = vld [vmem:[%s11849_s2 + $0x428] sm:$0xff]  ;;  %v7633_v57 = vld [vmem:[%s11849_s2 + $0x4a0] sm:$0xff] }
 0x1e7   : > { %8242 = vmatprep.subr.mxu1 %v7606_v58  ;;  %v7617_v58 = vld [vmem:[%s11849_s2 + $0x420] sm:$0xff] }
 0x1e8   : > { %8243 = vmatpush3.msra.mxu1 %v7590_v59  ;;  %v7632_v59 = vld [vmem:[%s11849_s2 + $0x498] sm:$0xff] }
 0x1e9   : > { %8244 = vmatprep.subr.mxu1 %v7605_v60  ;;  %v7616_v60 = vld [vmem:[%s11849_s2 + $0x418] sm:$0xff] }
 0x1ea   : > { %8245 = vmatpush3.msra.mxu1 %v7589_v61  ;;  %v7631_v61 = vld [vmem:[%s11849_s2 + $0x490] sm:$0xff] }
 0x1eb   : > { %8246 = vmatprep.subr.mxu1 %v7604_v62  ;;  %v7615_v62 = vld [vmem:[%s11849_s2 + $0x410] sm:$0xff] }
 0x1ec   : > { %8247 = vmatpush3.msra.mxu1 %v7588_v0  ;;  %v7630_v0 = vld [vmem:[%s11849_s2 + $0x488] sm:$0xff] }
 0x1ed   : > { %8248 = vmatprep.subr.mxu1 %v7603_v1  ;;  %v7614_v1 = vld [vmem:[%s11849_s2 + $0x408] sm:$0xff] }
 0x1ee   : > { %8249 = vmatpush3.msra.mxu1 %v7587_v2  ;;  %v7629_v2 = vld [vmem:[%s11849_s2 + $0x480] sm:$0xff] }
 0x1ef   : > { %8250 = vmatprep.subr.mxu1 %v7602_v3  ;;  %v7613_v3 = vld [vmem:[%s11849_s2 + $0x400] sm:$0xff] }
 0x1f0   : > { %8251 = vmatpush3.msra.mxu1 %v7586_v4  ;;  %v7645_v4 = vld [vmem:[%s11852_s27 + $0x40] sm:$0xff] }
 0x1f1   : > { %8252 = vmatprep.subr.mxu1 %v7601_v5 }
 0x1f2   : > { %8253 = vmatpush3.msra.mxu1 %v7585_v6 }
 0x1f3   : > { %8254 = vmatprep.subr.mxu1 %v7600_v7 }
 0x1f4   : > { %8255 = vmatpush3.msra.mxu1 %v7584_v8 }
 0x1f5   : > { %8256 = vmatprep.subr.mxu1 %v7599_v9 }
 0x1f6   : > { %8257 = vmatpush3.msra.mxu1 %v7583_v10 }
 0x1f7   : > { %8258 = vmatprep.subr.mxu1 %v7598_v11 }
 0x1f8   : > { %8259 = vmatpush3.msra.mxu1 %v7582_v12  ;;  %v7646_v12 = vld [vmem:[%s11852_s27 + $0x48] sm:$0xff] }
 0x1f9   : > { %8260 = vmatprep.subr.mxu1 %v7597_v13  ;;  %v7681_v13 = vld [vmem:[%s11849_s2 + $0x5f8] sm:$0xff] }
 0x1fa   : > { %8261 = vmatpush3.msra.mxu1 %v7581_v14  ;;  %v7665_v14 = vld [vmem:[%s11849_s2 + $0x578] sm:$0xff] }
 0x1fb   : > { %8262 = vmatprep.subr.mxu1 %v7596_v15  ;;  %v7680_v15 = vld [vmem:[%s11849_s2 + $0x5f0] sm:$0xff] }
 0x1fc   : > { %8263 = vmatpush3.msra.mxu1 %v7580_v16  ;;  %v7664_v16 = vld [vmem:[%s11849_s2 + $0x570] sm:$0xff] }
 0x1fd   : > { %8264 = vmatprep.subr.mxu1 %v7595_v17  ;;  %v7679_v17 = vld [vmem:[%s11849_s2 + $0x5e8] sm:$0xff] }
 0x1fe   : > { %8265 = vmatpush3.msra.mxu1 %v7579_v18  ;;  %v7663_v18 = vld [vmem:[%s11849_s2 + $0x568] sm:$0xff] }
 0x1ff   : > { %8266 = vmatprep.subr.mxu1 %v7594_v19  ;;  %v7678_v19 = vld [vmem:[%s11849_s2 + $0x5e0] sm:$0xff] }
 0x200   : > { %8267 = vmatpush3.msra.mxu1 %v7578_v20  ;;  %v7662_v20 = vld [vmem:[%s11849_s2 + $0x560] sm:$0xff] }
 0x201   : > { %8268 = vmatprep.subr.mxu1 %v7593_v21  ;;  %v7677_v21 = vld [vmem:[%s11849_s2 + $0x5d8] sm:$0xff] }
 0x202   : > { %8269 = vmatpush3.msra.mxu1 %v7577_v22  ;;  %v7661_v22 = vld [vmem:[%s11849_s2 + $0x558] sm:$0xff] }
 0x203   : > { %8270 = vmatprep.subr.mxu1 %v7592_v23  ;;  %v7676_v23 = vld [vmem:[%s11849_s2 + $0x5d0] sm:$0xff] }
 0x204   : > { %8271 = vmatpush3.msra.mxu1 %v7576_v24  ;;  %v7660_v24 = vld [vmem:[%s11849_s2 + $0x550] sm:$0xff] }
 0x205   : > { %1317 = vmatmul.mubr.f32.vlgmr.msra.gmra.mxu1 %v9897_v56 }
 0x206   : > { %8854 = vmatprep.mubr.msk.f32.mxu1 %vm857_vm0, %v7645_v4  ;;  %v7712_v4 = vld [vmem:[%s11849_s2 + $0x6c8] sm:$0xff] }
 0x2a5   : > { %v8846_v26 = vpop.f32.mrf.mxu1 }
 0x2a6   : > { %v10166_v27 = vadd.f32 %v8846_v26, %v10053_v48  ;;  %v7637_v48 = vld [vmem:[%s11849_s2 + $0x4c0] sm:$0xff]  ;;  %v7659_v26 = vld [vmem:[%s11849_s2 + $0x548] sm:$0xff] }
 0x2a7   : > { %v1208_v28 = vpop.f32.mrf.mxu1 }
 0x2a8   : > { %v10169_v29 = vadd.f32 %v1208_v28, %v10055_v50  ;;  %v7636_v50 = vld [vmem:[%s11849_s2 + $0x4b8] sm:$0xff]  ;;  %v7658_v28 = vld [vmem:[%s11849_s2 + $0x540] sm:$0xff] }
 0x2c5   : > { %v8272_v30 = vpop.f32.mrf.mxu1 }
 0x2c7   : > { %v8273_v31 = vpop.f32.mrf.mxu1 }
 0x2c8   : > { %v8274_v32 = vadd.f32 %v8273_v31, %v8272_v30  ;;  %v7657_v30 = vld [vmem:[%s11849_s2 + $0x538] sm:$0xff]  ;;  %v7672_v31 = vld [vmem:[%s11849_s2 + $0x5b0] sm:$0xff] }
 0x2ca   : > { %8847 = vmatprep.subr.msk.mxu0 %vm864_vm1, %v8274_v32 }
 0x2cb   : > { %8848 = vmatpush3.msk.msra.mxu0 %vm864_vm1, %v8274_v32  ;;  %v7656_v32 = vld [vmem:[%s11849_s2 + $0x530] sm:$0xff] }
 0x2cc   : > { %8850 = vmatmul.mubr.msk.f32.vlgmr.msra.gmra.mxu0 %vm857_vm0, %v7609_v33  ;;  %8278 = vmatprep.subr.mxu0 %v7644_v34  ;;  %v7671_v33 = vld [vmem:[%s11849_s2 + $0x5a8] sm:$0xff] }
 0x2cd   : > { %8279 = vmatpush3.msra.mxu0 %v7628_v35  ;;  %1508 = vmatprep.mubr.f32.mxu0 %v9919_v63  ;;  %v7655_v34 = vld [vmem:[%s11849_s2 + $0x528] sm:$0xff]  ;;  %v7670_v35 = vld [vmem:[%s11849_s2 + $0x5a0] sm:$0xff] }
 0x2ce   : > { %8280 = vmatprep.subr.mxu0 %v7643_v36  ;;  %v7654_v36 = vld [vmem:[%s11849_s2 + $0x520] sm:$0xff] }
 0x2cf   : > { %8281 = vmatpush3.msra.mxu0 %v7627_v37  ;;  %v7669_v37 = vld [vmem:[%s11849_s2 + $0x598] sm:$0xff] }
 0x2d0   : > { %8282 = vmatprep.subr.mxu0 %v7642_v38  ;;  %v7653_v38 = vld [vmem:[%s11849_s2 + $0x518] sm:$0xff] }
 0x2d1   : > { %8283 = vmatpush3.msra.mxu0 %v7626_v39  ;;  %v7668_v39 = vld [vmem:[%s11849_s2 + $0x590] sm:$0xff] }
 0x2d2   : > { %8284 = vmatprep.subr.mxu0 %v7641_v40  ;;  %v7652_v40 = vld [vmem:[%s11849_s2 + $0x510] sm:$0xff] }
 0x2d3   : > { %8285 = vmatpush3.msra.mxu0 %v7625_v41  ;;  %v7667_v41 = vld [vmem:[%s11849_s2 + $0x588] sm:$0xff] }
 0x2d4   : > { %8286 = vmatprep.subr.mxu0 %v7640_v42  ;;  %v7651_v42 = vld [vmem:[%s11849_s2 + $0x508] sm:$0xff] }
 0x2d5   : > { %8287 = vmatpush3.msra.mxu0 %v7624_v43  ;;  %v7666_v43 = vld [vmem:[%s11849_s2 + $0x580] sm:$0xff] }
 0x2d6   : > { %8288 = vmatprep.subr.mxu0 %v7639_v44  ;;  %v7650_v44 = vld [vmem:[%s11849_s2 + $0x500] sm:$0xff] }
 0x2d7   : > { %8289 = vmatpush3.msra.mxu0 %v7623_v45  ;;  %v7682_v45 = vld [vmem:[%s11852_s27 + $0x50] sm:$0xff] }
 0x2d8   : > { %8290 = vmatprep.subr.mxu0 %v7638_v46 }
 0x2d9   : > { %8291 = vmatpush3.msra.mxu0 %v7622_v47 }
 0x2da   : > { %8292 = vmatprep.subr.mxu0 %v7637_v48 }
 0x2db   : > { %8293 = vmatpush3.msra.mxu0 %v7621_v49 }
 0x2dc   : > { %8294 = vmatprep.subr.mxu0 %v7636_v50 }
 0x2dd   : > { %8295 = vmatpush3.msra.mxu0 %v7620_v51 }
 0x2de   : > { %8296 = vmatprep.subr.mxu0 %v7635_v52 }
 0x2df   : > { %8297 = vmatpush3.msra.mxu0 %v7619_v53  ;;  %v7683_v53 = vld [vmem:[%s11852_s27 + $0x58] sm:$0xff] }
 0x2e0   : > { %8298 = vmatprep.subr.mxu0 %v7634_v54  ;;  %v7718_v54 = vld [vmem:[%s11849_s2 + $0x6f8] sm:$0xff] }
 0x2e1   : > { %8299 = vmatpush3.msra.mxu0 %v7618_v55  ;;  %v7702_v55 = vld [vmem:[%s11849_s2 + $0x678] sm:$0xff] }
 0x2e2   : > { %8300 = vmatprep.subr.mxu0 %v7633_v57  ;;  %v7717_v57 = vld [vmem:[%s11849_s2 + $0x6f0] sm:$0xff] }
 0x2e3   : > { %8301 = vmatpush3.msra.mxu0 %v7617_v58  ;;  %v7701_v58 = vld [vmem:[%s11849_s2 + $0x670] sm:$0xff] }
 0x2e4   : > { %8302 = vmatprep.subr.mxu0 %v7632_v59  ;;  %v7716_v59 = vld [vmem:[%s11849_s2 + $0x6e8] sm:$0xff] }
 0x2e5   : > { %8303 = vmatpush3.msra.mxu0 %v7616_v60  ;;  %v7700_v60 = vld [vmem:[%s11849_s2 + $0x668] sm:$0xff] }
 0x2e6   : > { %8304 = vmatprep.subr.mxu0 %v7631_v61  ;;  %v7715_v61 = vld [vmem:[%s11849_s2 + $0x6e0] sm:$0xff] }
 0x2e7   : > { %8305 = vmatpush3.msra.mxu0 %v7615_v62  ;;  %v7699_v62 = vld [vmem:[%s11849_s2 + $0x660] sm:$0xff] }
 0x2e8   : > { %8306 = vmatprep.subr.mxu0 %v7630_v0  ;;  %v7714_v0 = vld [vmem:[%s11849_s2 + $0x6d8] sm:$0xff] }
 0x2e9   : > { %8307 = vmatpush3.msra.mxu0 %v7614_v1  ;;  %v7698_v1 = vld [vmem:[%s11849_s2 + $0x658] sm:$0xff] }
 0x2ea   : > { %8308 = vmatprep.subr.mxu0 %v7629_v2  ;;  %v7713_v2 = vld [vmem:[%s11849_s2 + $0x6d0] sm:$0xff] }
 0x2eb   : > { %8309 = vmatpush3.msra.mxu0 %v7613_v3  ;;  %v7697_v3 = vld [vmem:[%s11849_s2 + $0x650] sm:$0xff] }
 0x2ec   : > { %1509 = vmatmul.mubr.f32.vlgmr.msra.gmra.mxu0 %v9897_v56 }
 0x2ed   : > { %8859 = vmatprep.mubr.msk.f32.mxu0 %vm857_vm0, %v7682_v45  ;;  %v7749_v45 = vld [vmem:[%s11849_s2 + $0x7c8] sm:$0xff] }
 0x38c   : > { %v8851_v5 = vpop.f32.mrf.mxu0 }
 0x38d   : > { %v10280_v6 = vadd.f32 %v8851_v5, %v10166_v27  ;;  %v7674_v27 = vld [vmem:[%s11849_s2 + $0x5c0] sm:$0xff]  ;;  %v7696_v5 = vld [vmem:[%s11849_s2 + $0x648] sm:$0xff] }
 0x38e   : > { %v1400_v7 = vpop.f32.mrf.mxu0 }
 0x38f   : > { %v10283_v8 = vadd.f32 %v1400_v7, %v10169_v29  ;;  %v7673_v29 = vld [vmem:[%s11849_s2 + $0x5b8] sm:$0xff]  ;;  %v7695_v7 = vld [vmem:[%s11849_s2 + $0x640] sm:$0xff] }
 0x3ac   : > { %v8310_v9 = vpop.f32.mrf.mxu0 }
 0x3ae   : > { %v8311_v10 = vpop.f32.mrf.mxu0 }
 0x3af   : > { %v8312_v11 = vadd.f32 %v8311_v10, %v8310_v9  ;;  %v7694_v9 = vld [vmem:[%s11849_s2 + $0x638] sm:$0xff]  ;;  %v7709_v10 = vld [vmem:[%s11849_s2 + $0x6b0] sm:$0xff] }
 0x3b1   : > { %8852 = vmatprep.subr.msk.mxu1 %vm864_vm1, %v8312_v11 }
 0x3b2   : > { %8853 = vmatpush3.msk.msra.mxu1 %vm864_vm1, %v8312_v11  ;;  %v7693_v11 = vld [vmem:[%s11849_s2 + $0x630] sm:$0xff] }
 0x3b3   : > { %8855 = vmatmul.mubr.msk.f32.vlgmr.msra.gmra.mxu1 %vm857_vm0, %v7646_v12  ;;  %8316 = vmatprep.subr.mxu1 %v7681_v13  ;;  %v7708_v12 = vld [vmem:[%s11849_s2 + $0x6a8] sm:$0xff] }
 0x3b4   : > { %8317 = vmatpush3.msra.mxu1 %v7665_v14  ;;  %1700 = vmatprep.mubr.f32.mxu1 %v9919_v63  ;;  %v7692_v13 = vld [vmem:[%s11849_s2 + $0x628] sm:$0xff]  ;;  %v7707_v14 = vld [vmem:[%s11849_s2 + $0x6a0] sm:$0xff] }
 0x3b5   : > { %8318 = vmatprep.subr.mxu1 %v7680_v15  ;;  %v7691_v15 = vld [vmem:[%s11849_s2 + $0x620] sm:$0xff] }
 0x3b6   : > { %8319 = vmatpush3.msra.mxu1 %v7664_v16  ;;  %v7706_v16 = vld [vmem:[%s11849_s2 + $0x698] sm:$0xff] }
 0x3b7   : > { %8320 = vmatprep.subr.mxu1 %v7679_v17  ;;  %v7690_v17 = vld [vmem:[%s11849_s2 + $0x618] sm:$0xff] }
 0x3b8   : > { %8321 = vmatpush3.msra.mxu1 %v7663_v18  ;;  %v7705_v18 = vld [vmem:[%s11849_s2 + $0x690] sm:$0xff] }
 0x3b9   : > { %8322 = vmatprep.subr.mxu1 %v7678_v19  ;;  %v7689_v19 = vld [vmem:[%s11849_s2 + $0x610] sm:$0xff] }
 0x3ba   : > { %8323 = vmatpush3.msra.mxu1 %v7662_v20  ;;  %v7704_v20 = vld [vmem:[%s11849_s2 + $0x688] sm:$0xff] }
 0x3bb   : > { %8324 = vmatprep.subr.mxu1 %v7677_v21  ;;  %v7688_v21 = vld [vmem:[%s11849_s2 + $0x608] sm:$0xff] }
 0x3bc   : > { %8325 = vmatpush3.msra.mxu1 %v7661_v22  ;;  %v7703_v22 = vld [vmem:[%s11849_s2 + $0x680] sm:$0xff] }
 0x3bd   : > { %8326 = vmatprep.subr.mxu1 %v7676_v23  ;;  %v7687_v23 = vld [vmem:[%s11849_s2 + $0x600] sm:$0xff] }
 0x3be   : > { %8327 = vmatpush3.msra.mxu1 %v7660_v24  ;;  %v7719_v24 = vld [vmem:[%s11852_s27 + $0x60] sm:$0xff] }
 0x3bf   : > { %8328 = vmatprep.subr.mxu1 %v7675_v25 }
 0x3c0   : > { %8329 = vmatpush3.msra.mxu1 %v7659_v26 }
 0x3c1   : > { %8330 = vmatprep.subr.mxu1 %v7674_v27 }
 0x3c2   : > { %8331 = vmatpush3.msra.mxu1 %v7658_v28 }
 0x3c3   : > { %8332 = vmatprep.subr.mxu1 %v7673_v29 }
 0x3c4   : > { %8333 = vmatpush3.msra.mxu1 %v7657_v30 }
 0x3c5   : > { %8334 = vmatprep.subr.mxu1 %v7672_v31 }
 0x3c6   : > { %8335 = vmatpush3.msra.mxu1 %v7656_v32  ;;  %v7720_v32 = vld [vmem:[%s11852_s27 + $0x68] sm:$0xff] }
 0x3c7   : > { %8336 = vmatprep.subr.mxu1 %v7671_v33  ;;  %v7755_v33 = vld [vmem:[%s11849_s2 + $0x7f8] sm:$0xff] }
 0x3c8   : > { %8337 = vmatpush3.msra.mxu1 %v7655_v34  ;;  %v7739_v34 = vld [vmem:[%s11849_s2 + $0x778] sm:$0xff] }
 0x3c9   : > { %8338 = vmatprep.subr.mxu1 %v7670_v35  ;;  %v7754_v35 = vld [vmem:[%s11849_s2 + $0x7f0] sm:$0xff] }
 0x3ca   : > { %8339 = vmatpush3.msra.mxu1 %v7654_v36  ;;  %v7738_v36 = vld [vmem:[%s11849_s2 + $0x770] sm:$0xff] }
 0x3cb   : > { %8340 = vmatprep.subr.mxu1 %v7669_v37  ;;  %v7753_v37 = vld [vmem:[%s11849_s2 + $0x7e8] sm:$0xff] }
 0x3cc   : > { %8341 = vmatpush3.msra.mxu1 %v7653_v38  ;;  %v7737_v38 = vld [vmem:[%s11849_s2 + $0x768] sm:$0xff] }
 0x3cd   : > { %8342 = vmatprep.subr.mxu1 %v7668_v39  ;;  %v7752_v39 = vld [vmem:[%s11849_s2 + $0x7e0] sm:$0xff] }
 0x3ce   : > { %8343 = vmatpush3.msra.mxu1 %v7652_v40  ;;  %v7736_v40 = vld [vmem:[%s11849_s2 + $0x760] sm:$0xff] }
 0x3cf   : > { %8344 = vmatprep.subr.mxu1 %v7667_v41  ;;  %v7751_v41 = vld [vmem:[%s11849_s2 + $0x7d8] sm:$0xff] }
 0x3d0   : > { %8345 = vmatpush3.msra.mxu1 %v7651_v42  ;;  %v7735_v42 = vld [vmem:[%s11849_s2 + $0x758] sm:$0xff] }
 0x3d1   : > { %8346 = vmatprep.subr.mxu1 %v7666_v43  ;;  %v7750_v43 = vld [vmem:[%s11849_s2 + $0x7d0] sm:$0xff] }
 0x3d2   : > { %8347 = vmatpush3.msra.mxu1 %v7650_v44  ;;  %v7734_v44 = vld [vmem:[%s11849_s2 + $0x750] sm:$0xff] }
 0x3d3   : > { %1701 = vmatmul.mubr.f32.vlgmr.msra.gmra.mxu1 %v9897_v56 }
 0x3d4   : > { %8864 = vmatprep.mubr.msk.f32.mxu1 %vm857_vm0, %v7719_v24  ;;  %v7785_v24 = vld [vmem:[%s11849_s2 + $0x8c0] sm:$0xff] }
 0x473   : > { %v8856_v46 = vpop.f32.mrf.mxu1 }
 0x474   : > { %v10394_v47 = vadd.f32 %v8856_v46, %v10280_v6  ;;  %v7711_v6 = vld [vmem:[%s11849_s2 + $0x6c0] sm:$0xff]  ;;  %v7733_v46 = vld [vmem:[%s11849_s2 + $0x748] sm:$0xff] }
 0x475   : > { %v1592_v48 = vpop.f32.mrf.mxu1 }
 0x476   : > { %v10397_v49 = vadd.f32 %v1592_v48, %v10283_v8  ;;  %v7710_v8 = vld [vmem:[%s11849_s2 + $0x6b8] sm:$0xff]  ;;  %v7732_v48 = vld [vmem:[%s11849_s2 + $0x740] sm:$0xff] }
 0x493   : > { %v8348_v50 = vpop.f32.mrf.mxu1 }
 0x495   : > { %v8349_v51 = vpop.f32.mrf.mxu1 }
 0x496   : > { %v8350_v52 = vadd.f32 %v8349_v51, %v8348_v50  ;;  %v7731_v50 = vld [vmem:[%s11849_s2 + $0x738] sm:$0xff]  ;;  %v7746_v51 = vld [vmem:[%s11849_s2 + $0x7b0] sm:$0xff] }
 0x498   : > { %8857 = vmatprep.subr.msk.mxu0 %vm864_vm1, %v8350_v52 }
 0x499   : > { %8858 = vmatpush3.msk.msra.mxu0 %vm864_vm1, %v8350_v52  ;;  %v7730_v52 = vld [vmem:[%s11849_s2 + $0x730] sm:$0xff] }
 0x49a   : > { %8860 = vmatmul.mubr.msk.f32.vlgmr.msra.gmra.mxu0 %vm857_vm0, %v7683_v53  ;;  %8354 = vmatprep.subr.mxu0 %v7718_v54  ;;  %v7745_v53 = vld [vmem:[%s11849_s2 + $0x7a8] sm:$0xff] }
 0x49b   : > { %8355 = vmatpush3.msra.mxu0 %v7702_v55  ;;  %1892 = vmatprep.mubr.f32.mxu0 %v9919_v63  ;;  %v7729_v54 = vld [vmem:[%s11849_s2 + $0x728] sm:$0xff]  ;;  %v7744_v55 = vld [vmem:[%s11849_s2 + $0x7a0] sm:$0xff] }
 0x49c   : > { %8356 = vmatprep.subr.mxu0 %v7717_v57  ;;  %v7728_v57 = vld [vmem:[%s11849_s2 + $0x720] sm:$0xff] }
 0x49d   : > { %8357 = vmatpush3.msra.mxu0 %v7701_v58  ;;  %v7743_v58 = vld [vmem:[%s11849_s2 + $0x798] sm:$0xff] }
 0x49e   : > { %8358 = vmatprep.subr.mxu0 %v7716_v59  ;;  %v7727_v59 = vld [vmem:[%s11849_s2 + $0x718] sm:$0xff] }
 0x49f   : > { %8359 = vmatpush3.msra.mxu0 %v7700_v60  ;;  %v7742_v60 = vld [vmem:[%s11849_s2 + $0x790] sm:$0xff] }
 0x4a0   : > { %8360 = vmatprep.subr.mxu0 %v7715_v61  ;;  %v7726_v61 = vld [vmem:[%s11849_s2 + $0x710] sm:$0xff] }
 0x4a1   : > { %8361 = vmatpush3.msra.mxu0 %v7699_v62  ;;  %v7741_v62 = vld [vmem:[%s11849_s2 + $0x788] sm:$0xff] }
 0x4a2   : > { %8362 = vmatprep.subr.mxu0 %v7714_v0  ;;  %v7725_v0 = vld [vmem:[%s11849_s2 + $0x708] sm:$0xff] }
 0x4a3   : > { %8363 = vmatpush3.msra.mxu0 %v7698_v1  ;;  %v7740_v1 = vld [vmem:[%s11849_s2 + $0x780] sm:$0xff] }
 0x4a4   : > { %8364 = vmatprep.subr.mxu0 %v7713_v2  ;;  %v7724_v2 = vld [vmem:[%s11849_s2 + $0x700] sm:$0xff] }
 0x4a5   : > { %8365 = vmatpush3.msra.mxu0 %v7697_v3  ;;  %v7756_v3 = vld [vmem:[%s11852_s27 + $0x70] sm:$0xff] }
 0x4a6   : > { %8366 = vmatprep.subr.mxu0 %v7712_v4 }
 0x4a7   : > { %8367 = vmatpush3.msra.mxu0 %v7696_v5 }
 0x4a8   : > { %8368 = vmatprep.subr.mxu0 %v7711_v6 }
 0x4a9   : > { %8369 = vmatpush3.msra.mxu0 %v7695_v7 }
 0x4aa   : > { %8370 = vmatprep.subr.mxu0 %v7710_v8 }
 0x4ab   : > { %8371 = vmatpush3.msra.mxu0 %v7694_v9 }
 0x4ac   : > { %8372 = vmatprep.subr.mxu0 %v7709_v10 }
 0x4ad   : > { %8373 = vmatpush3.msra.mxu0 %v7693_v11  ;;  %v7792_v11 = vld [vmem:[%s11849_s2 + $0x8f8] sm:$0xff] }
 0x4ae   : > { %8374 = vmatprep.subr.mxu0 %v7708_v12  ;;  %v7776_v12 = vld [vmem:[%s11849_s2 + $0x878] sm:$0xff] }
 0x4af   : > { %8375 = vmatpush3.msra.mxu0 %v7692_v13  ;;  %v7791_v13 = vld [vmem:[%s11849_s2 + $0x8f0] sm:$0xff] }
 0x4b0   : > { %8376 = vmatprep.subr.mxu0 %v7707_v14  ;;  %v7775_v14 = vld [vmem:[%s11849_s2 + $0x870] sm:$0xff] }
 0x4b1   : > { %8377 = vmatpush3.msra.mxu0 %v7691_v15  ;;  %v7790_v15 = vld [vmem:[%s11849_s2 + $0x8e8] sm:$0xff] }
 0x4b2   : > { %8378 = vmatprep.subr.mxu0 %v7706_v16  ;;  %v7774_v16 = vld [vmem:[%s11849_s2 + $0x868] sm:$0xff] }
 0x4b3   : > { %8379 = vmatpush3.msra.mxu0 %v7690_v17  ;;  %v7789_v17 = vld [vmem:[%s11849_s2 + $0x8e0] sm:$0xff] }
 0x4b4   : > { %8380 = vmatprep.subr.mxu0 %v7705_v18  ;;  %v7773_v18 = vld [vmem:[%s11849_s2 + $0x860] sm:$0xff] }
 0x4b5   : > { %8381 = vmatpush3.msra.mxu0 %v7689_v19  ;;  %v7772_v19 = vld [vmem:[%s11849_s2 + $0x858] sm:$0xff] }
 0x4b6   : > { %8382 = vmatprep.subr.mxu0 %v7704_v20  ;;  %v7787_v20 = vld [vmem:[%s11849_s2 + $0x8d0] sm:$0xff] }
 0x4b7   : > { %8383 = vmatpush3.msra.mxu0 %v7688_v21  ;;  %v7771_v21 = vld [vmem:[%s11849_s2 + $0x850] sm:$0xff] }
 0x4b8   : > { %8384 = vmatprep.subr.mxu0 %v7703_v22  ;;  %v7786_v22 = vld [vmem:[%s11849_s2 + $0x8c8] sm:$0xff] }
 0x4b9   : > { %8385 = vmatpush3.msra.mxu0 %v7687_v23  ;;  %v7770_v23 = vld [vmem:[%s11849_s2 + $0x848] sm:$0xff] }
 0x4ba   : > { %1893 = vmatmul.mubr.f32.vlgmr.msra.gmra.mxu0 %v9897_v56 }
 0x4bb   : > { %8869 = vmatprep.mubr.msk.f32.mxu0 %vm857_vm0, %v7756_v3  ;;  %v2387_v3 = vld [vmem:[%s11854_s28] sm:$0xff] }
 0x55a   : > { %v8861_v25 = vpop.f32.mrf.mxu0 }
 0x55b   : > { %v10508_v26 = vadd.f32 %v8861_v25, %v10394_v47  ;;  %v7748_v47 = vld [vmem:[%s11849_s2 + $0x7c0] sm:$0xff] }
 0x55c   : > { %v1784_v27 = vpop.f32.mrf.mxu0  ;;  %v7769_v25 = vld [vmem:[%s11849_s2 + $0x840] sm:$0xff] }
 0x55d   : > { %v10511_v28 = vadd.f32 %v1784_v27, %v10397_v49  ;;  %v7747_v49 = vld [vmem:[%s11849_s2 + $0x7b8] sm:$0xff] }
 0x55e   : > { %v7768_v27 = vld [vmem:[%s11849_s2 + $0x838] sm:$0xff] }
 0x57a   : > { %v8386_v29 = vpop.f32.mrf.mxu0 }
 0x57c   : > { %v8387_v30 = vpop.f32.mrf.mxu0 }
 0x57d   : > { %v8388_v31 = vadd.f32 %v8387_v30, %v8386_v29  ;;  %v7767_v29 = vld [vmem:[%s11849_s2 + $0x830] sm:$0xff]  ;;  %v7782_v30 = vld [vmem:[%s11849_s2 + $0x8a8] sm:$0xff] }
 0x57f   : > { %8862 = vmatprep.subr.msk.mxu1 %vm864_vm1, %v8388_v31 }
 0x580   : > { %8863 = vmatpush3.msk.msra.mxu1 %vm864_vm1, %v8388_v31  ;;  %v7766_v31 = vld [vmem:[%s11849_s2 + $0x828] sm:$0xff] }
 0x581   : > { %8865 = vmatmul.mubr.msk.f32.vlgmr.msra.gmra.mxu1 %vm857_vm0, %v7720_v32  ;;  %8392 = vmatprep.subr.mxu1 %v7755_v33  ;;  %v7781_v32 = vld [vmem:[%s11849_s2 + $0x8a0] sm:$0xff] }
 0x582   : > { %8393 = vmatpush3.msra.mxu1 %v7739_v34  ;;  %2084 = vmatprep.mubr.f32.mxu1 %v9919_v63  ;;  %v7765_v33 = vld [vmem:[%s11849_s2 + $0x820] sm:$0xff]  ;;  %v7780_v34 = vld [vmem:[%s11849_s2 + $0x898] sm:$0xff] }
 0x583   : > { %8394 = vmatprep.subr.mxu1 %v7754_v35  ;;  %v7764_v35 = vld [vmem:[%s11849_s2 + $0x818] sm:$0xff] }
 0x584   : > { %8395 = vmatpush3.msra.mxu1 %v7738_v36  ;;  %v7779_v36 = vld [vmem:[%s11849_s2 + $0x890] sm:$0xff] }
 0x585   : > { %8396 = vmatprep.subr.mxu1 %v7753_v37  ;;  %v7763_v37 = vld [vmem:[%s11849_s2 + $0x810] sm:$0xff] }
 0x586   : > { %8397 = vmatpush3.msra.mxu1 %v7737_v38  ;;  %v7778_v38 = vld [vmem:[%s11849_s2 + $0x888] sm:$0xff] }
 0x587   : > { %8398 = vmatprep.subr.mxu1 %v7752_v39  ;;  %v7762_v39 = vld [vmem:[%s11849_s2 + $0x808] sm:$0xff] }
 0x588   : > { %8399 = vmatpush3.msra.mxu1 %v7736_v40  ;;  %v7777_v40 = vld [vmem:[%s11849_s2 + $0x880] sm:$0xff] }
 0x589   : > { %8400 = vmatprep.subr.mxu1 %v7751_v41  ;;  %v7761_v41 = vld [vmem:[%s11849_s2 + $0x800] sm:$0xff] }
 0x58a   : > { %8401 = vmatpush3.msra.mxu1 %v7735_v42  ;;  %v9585_v42 = vld [vmem:[%s9876_s1] sm:$0xff] }
 0x58b   : > { %8402 = vmatprep.subr.mxu1 %v7750_v43  ;;  %v7793_v43 = vld [vmem:[%s11852_s27 + $0x80] sm:$0xff] }
 0x58c   : > { %8403 = vmatpush3.msra.mxu1 %v7734_v44  ;;  %v2371_v44 = vld [vmem:[%s11853_s3] sm:$0xff] }
 0x58d   : > { %8404 = vmatprep.subr.mxu1 %v7749_v45  ;;  %v9594_v45 = vmov 0  }
 0x58e   : > { %8405 = vmatpush3.msra.mxu1 %v7733_v46  ;;  %9582 = vset.pattern.permute.xlu0 %v9594_v45  ;;  %v2372_v46 = vld [vmem:[%s11853_s3 + $0x8] sm:$0xff] }
 0x58f   : > { %8406 = vmatprep.subr.mxu1 %v7748_v47  ;;  %9583 = vset.pattern.permute.xlu1 %v9594_v45  ;;  %v4097_v47 = vld [vmem:[%s11822_s6 + $0x10] sm:$0xff] }
 0x590   : > { %8407 = vmatpush3.msra.mxu1 %v7732_v48  ;;  %2375 = vperm.xlu0 %9582, %v2371_v44   ;;  %v5612_v48 = vld [vmem:[%s11825_s9] sm:$0xff] }
 0x591   : > { %8408 = vmatprep.subr.mxu1 %v7747_v49  ;;  %v7217_v49 = vld [vmem:[%s11831_s15] sm:$0xf] }
 0x592   : > { %8409 = vmatpush3.msra.mxu1 %v7731_v50 }
 0x593   : > { %8410 = vmatprep.subr.mxu1 %v7746_v51 }
 0x594   : > { %8411 = vmatpush3.msra.mxu1 %v7730_v52  ;;  %2380 = vperm.xlu0 %9582, %v2372_v46  }
 0x595   : > { %8412 = vmatprep.subr.mxu1 %v7745_v53 }
 0x596   : > { %8413 = vmatpush3.msra.mxu1 %v7729_v54 }
 0x597   : > { %8414 = vmatprep.subr.mxu1 %v7744_v55 }
 0x598   : > { %8415 = vmatpush3.msra.mxu1 %v7728_v57  ;;  %4111 = vperm.xlu0 %9582, %v4097_v47  }
 0x599   : > { %8416 = vmatprep.subr.mxu1 %v7743_v58  ;;  %v7794_v58 = vld [vmem:[%s11852_s27 + $0x88] sm:$0xff] }
 0x59a   : > { %8417 = vmatpush3.msra.mxu1 %v7727_v59  ;;  %v2394_v59 = vld [vmem:[%s11854_s28 + $0x38] sm:$0xff] }
 0x59b   : > { %8418 = vmatprep.subr.mxu1 %v7742_v60  ;;  %v2393_v60 = vld [vmem:[%s11854_s28 + $0x30] sm:$0xff] }
 0x59c   : > { %8419 = vmatpush3.msra.mxu1 %v7726_v61  ;;  %5615 = vperm.xlu0 %9582, %v5612_v48   ;;  %v2392_v61 = vld [vmem:[%s11854_s28 + $0x28] sm:$0xff] }
 0x59d   : > { %8420 = vmatprep.subr.mxu1 %v7741_v62  ;;  %v2391_v62 = vld [vmem:[%s11854_s28 + $0x20] sm:$0xff] }
 0x59e   : > { %8421 = vmatpush3.msra.mxu1 %v7725_v0  ;;  %v2390_v0 = vld [vmem:[%s11854_s28 + $0x18] sm:$0xff] }
 0x59f   : > { %8422 = vmatprep.subr.mxu1 %v7740_v1  ;;  %v2389_v1 = vld [vmem:[%s11854_s28 + $0x10] sm:$0xff] }
 0x5a0   : > { %8423 = vmatpush3.msra.mxu1 %v7724_v2  ;;  %7220 = vperm.xlu0 %9582, %v7217_v49   ;;  %v2388_v2 = vld [vmem:[%s11854_s28 + $0x8] sm:$0xff] }
 0x5a1   : > { %2085 = vmatmul.mubr.f32.vlgmr.msra.gmra.mxu1 %v9897_v56  ;;  %v7757_v56 = vld [vmem:[%s11852_s27 + $0x78] sm:$0xff] }
 0x5a2   : > { %8874 = vmatprep.mubr.msk.f32.mxu1 %vm857_vm0, %v7793_v43 }
 0x641   : > { %v8866_v4 = vpop.f32.mrf.mxu1 }
 0x642   : > { %v10622_v5 = vadd.f32 %v8866_v4, %v10508_v26  ;;  %v7784_v26 = vld [vmem:[%s11849_s2 + $0x8b8] sm:$0xff] }
 0x643   : > { %v1976_v6 = vpop.f32.mrf.mxu1  ;;  %v7807_v4 = vld [vmem:[%s11854_s28 + $0x78] sm:$0xff] }
 0x644   : > { %v10625_v7 = vadd.f32 %v1976_v6, %v10511_v28  ;;  %v7783_v28 = vld [vmem:[%s11849_s2 + $0x8b0] sm:$0xff] }
 0x661   : > { %v8424_v8 = vpop.f32.mrf.mxu1 }
 0x663   : > { %v8425_v9 = vpop.f32.mrf.mxu1 }
 0x664   : > { %v8426_v10 = vadd.f32 %v8425_v9, %v8424_v8 }
 0x666   : > { %8867 = vmatprep.subr.msk.mxu0 %vm864_vm1, %v8426_v10 }
 0x667   : > { %8868 = vmatpush3.msk.msra.mxu0 %vm864_vm1, %v8426_v10 }
 0x668   : > { %8870 = vmatmul.mubr.msk.f32.vlgmr.msra.gmra.mxu0 %vm857_vm0, %v7757_v56  ;;  %8430 = vmatprep.subr.mxu0 %v7792_v11 }
 0x669   : > { %8431 = vmatpush3.msra.mxu0 %v7776_v12  ;;  %2276 = vmatprep.mubr.f32.mxu0 %v9919_v63  ;;  %v7788_v63 = vld [vmem:[%s11849_s2 + $0x8d8] sm:$0xff] }
 0x66a   : > { %8432 = vmatprep.subr.mxu0 %v7791_v13 }
 0x66b   : > { %8433 = vmatpush3.msra.mxu0 %v7775_v14  ;;  %v7806_v14 = vld [vmem:[%s11854_s28 + $0x70] sm:$0xff] }
 0x66c   : > { %8434 = vmatprep.subr.mxu0 %v7790_v15  ;;  %v7805_v15 = vld [vmem:[%s11854_s28 + $0x68] sm:$0xff] }
 0x66d   : > { %8435 = vmatpush3.msra.mxu0 %v7774_v16  ;;  %v7804_v16 = vld [vmem:[%s11854_s28 + $0x60] sm:$0xff] }
 0x66e   : > { %8436 = vmatprep.subr.mxu0 %v7789_v17  ;;  %v7803_v17 = vld [vmem:[%s11854_s28 + $0x58] sm:$0xff] }
 0x66f   : > { %8437 = vmatpush3.msra.mxu0 %v7773_v18  ;;  %v7802_v18 = vld [vmem:[%s11854_s28 + $0x50] sm:$0xff] }
 0x670   : > { %8438 = vmatprep.subr.mxu0 %v7788_v63  ;;  %v7801_v63 = vld [vmem:[%s11854_s28 + $0x48] sm:$0xff] }
 0x671   : > { %8439 = vmatpush3.msra.mxu0 %v7772_v19  ;;  %v7800_v19 = vld [vmem:[%s11854_s28 + $0x40] sm:$0xff] }
 0x672   : > { %8440 = vmatprep.subr.mxu0 %v7787_v20  ;;  %v7810_v20 = vld [vmem:[%s11821_s5 + $0x20] sm:$0xff] }
 0x673   : > { %8441 = vmatpush3.msra.mxu0 %v7771_v21  ;;  %v2477_v21 = vld [vmem:[%s11821_s5] sm:$0xff] }
 0x674   : > { %8442 = vmatprep.subr.mxu0 %v7786_v22 }
 0x675   : > { %8443 = vmatpush3.msra.mxu0 %v7770_v23 }
 0x676   : > { %8444 = vmatprep.subr.mxu0 %v7785_v24  ;;  %v2478_v24 = vld [vmem:[%s11821_s5 + $0x8] sm:$0xff] }
 0x677   : > { %8445 = vmatpush3.msra.mxu0 %v7769_v25  ;;  %v2479_v25 = vld [vmem:[%s11821_s5 + $0x10] sm:$0xff] }
 0x678   : > { %8446 = vmatprep.subr.mxu0 %v7784_v26  ;;  %v2480_v26 = vld [vmem:[%s11821_s5 + $0x18] sm:$0xff] }
 0x679   : > { %8447 = vmatpush3.msra.mxu0 %v7768_v27 }
 0x67a   : > { %8448 = vmatprep.subr.mxu0 %v7783_v28 }
 0x67b   : > { %8449 = vmatpush3.msra.mxu0 %v7767_v29  ;;  %v7811_v29 = vld [vmem:[%s11821_s5 + $0x28] sm:$0xff] }
 0x67c   : > { %8450 = vmatprep.subr.mxu0 %v7782_v30  ;;  %v7829_v30 = vld [vmem:[%s11854_s28 + $0xb8] sm:$0xff] }
 0x67d   : > { %8451 = vmatpush3.msra.mxu0 %v7766_v31  ;;  %v7812_v31 = vld [vmem:[%s11821_s5 + $0x30] sm:$0xff] }
 0x67e   : > { %8452 = vmatprep.subr.mxu0 %v7781_v32  ;;  %v7828_v32 = vld [vmem:[%s11854_s28 + $0xb0] sm:$0xff] }
 0x67f   : > { %8453 = vmatpush3.msra.mxu0 %v7765_v33  ;;  %v7813_v33 = vld [vmem:[%s11821_s5 + $0x38] sm:$0xff] }
 0x680   : > { %8454 = vmatprep.subr.mxu0 %v7780_v34  ;;  %v7827_v34 = vld [vmem:[%s11854_s28 + $0xa8] sm:$0xff] }
 0x681   : > { %8455 = vmatpush3.msra.mxu0 %v7764_v35  ;;  %v7826_v35 = vld [vmem:[%s11854_s28 + $0xa0] sm:$0xff] }
 0x682   : > { %8456 = vmatprep.subr.mxu0 %v7779_v36  ;;  %v7825_v36 = vld [vmem:[%s11854_s28 + $0x98] sm:$0xff] }
 0x683   : > { %8457 = vmatpush3.msra.mxu0 %v7763_v37  ;;  %v7824_v37 = vld [vmem:[%s11854_s28 + $0x90] sm:$0xff] }
 0x684   : > { %8458 = vmatprep.subr.mxu0 %v7778_v38  ;;  %v7823_v38 = vld [vmem:[%s11854_s28 + $0x88] sm:$0xff] }
 0x685   : > { %8459 = vmatpush3.msra.mxu0 %v7762_v39  ;;  %v7822_v39 = vld [vmem:[%s11854_s28 + $0x80] sm:$0xff] }
 0x686   : > { %8460 = vmatprep.subr.mxu0 %v7777_v40  ;;  %v7832_v40 = vld [vmem:[%s11821_s5 + $0x40] sm:$0xff] }
 0x687   : > { %8461 = vmatpush3.msra.mxu0 %v7761_v41 }
 0x688   : > { %2277 = vmatmul.mubr.f32.vlgmr.msra.gmra.mxu0 %v9585_v42 }
 0x689   : > { %8919 = vmatprep.mubr.msk.f32.mxu0 %vm2570_vm3, %v7810_v20  ;;  %v7863_v20 = vld [vmem:[%s11854_s28 + $0x128] sm:$0xff] }
 0x728   : > { %v8871_v50 = vpop.f32.mrf.mxu0 }
 0x729   : > { %v2178_v51 = vadd.f32 %v8871_v50, %v10622_v5  ;;  %v2376_v5 = vpop.permute.xlu0 %2375 }
 0x72a   : > { %v2168_v52 = vpop.f32.mrf.mxu0 }
 0x72b   : > { %v2177_v53 = vadd.f32 %v2168_v52, %v10625_v7 }
 0x72d   : > { %v2381_v9 = vpop.permute.xlu0 %2380 }
 0x748   : > { %v8462_v54 = vpop.f32.mrf.mxu0 }
 0x74a   : > { %v8463_v55 = vpop.f32.mrf.mxu0 }
 0x74b   : > { %v8464_v57 = vadd.f32 %v8463_v55, %v8462_v54  ;;  %v7847_v54 = vld [vmem:[%s11854_s28 + $0xf8] sm:$0xff]  ;;  %v7834_v55 = vld [vmem:[%s11821_s5 + $0x50] sm:$0xff] }
 0x74d   : > { %8872 = vmatprep.subr.msk.mxu1 %vm864_vm1, %v8464_v57 }
 0x74e   : > { %8873 = vmatpush3.msk.msra.mxu1 %vm864_vm1, %v8464_v57  ;;  %v7846_v57 = vld [vmem:[%s11854_s28 + $0xf0] sm:$0xff] }
 0x74f   : > { %8875 = vmatmul.mubr.msk.f32.vlgmr.msra.gmra.mxu1 %vm857_vm0, %v7794_v58  ;;  %8877 = vmatprep.subr.mxu1 %v2394_v59  ;;  %v7835_v58 = vld [vmem:[%s11821_s5 + $0x58] sm:$0xff] }
 0x750   : > { %8878 = vmatpush3.msra.mxu1 %v2394_v59  ;;  %v7845_v59 = vld [vmem:[%s11854_s28 + $0xe8] sm:$0xff] }
 0x751   : > { %8879 = vmatprep.subr.mxu1 %v2393_v60 }
 0x752   : > { %8880 = vmatpush3.msra.mxu1 %v2393_v60  ;;  %v7844_v60 = vld [vmem:[%s11854_s28 + $0xe0] sm:$0xff] }
 0x753   : > { %8881 = vmatprep.subr.mxu1 %v2392_v61 }
 0x754   : > { %8882 = vmatpush3.msra.mxu1 %v2392_v61  ;;  %v7843_v61 = vld [vmem:[%s11854_s28 + $0xd8] sm:$0xff] }
 0x755   : > { %8883 = vmatprep.subr.mxu1 %v2391_v62 }
 0x756   : > { %8884 = vmatpush3.msra.mxu1 %v2391_v62  ;;  %v7842_v62 = vld [vmem:[%s11854_s28 + $0xd0] sm:$0xff] }
 0x757   : > { %8885 = vmatprep.subr.mxu1 %v2390_v0 }
 0x758   : > { %8886 = vmatpush3.msra.mxu1 %v2390_v0  ;;  %v7841_v0 = vld [vmem:[%s11854_s28 + $0xc8] sm:$0xff] }
 0x759   : > { %8887 = vmatprep.subr.mxu1 %v2389_v1 }
 0x75a   : > { %8888 = vmatpush3.msra.mxu1 %v2389_v1  ;;  %v7840_v1 = vld [vmem:[%s11854_s28 + $0xc0] sm:$0xff] }
 0x75b   : > { %8889 = vmatprep.subr.mxu1 %v2388_v2 }
 0x75c   : > { %8890 = vmatpush3.msra.mxu1 %v2388_v2  ;;  %v7850_v2 = vld [vmem:[%s11821_s5 + $0x60] sm:$0xff] }
 0x75d   : > { %8891 = vmatprep.subr.mxu1 %v2387_v3 }
 0x75e   : > { %8892 = vmatpush3.msra.mxu1 %v2387_v3 }
 0x75f   : > { %8896 = vmatprep.subr.mxu1 %v7807_v4 }
 0x80f   : > { %v8876_v6 = vpop.f32.mrf.mxu1 }
 0x810   : > { %v2370_v7 = vadd.f32 %v8876_v6, %v2178_v51 }
 0x811   : > { %v2360_v8 = vpop.f32.mrf.mxu1 }
 0x812   : > { %v2369_v10 = vadd.f32 %v2360_v8, %v2177_v53  ;;  %v2384_v56 = vadd.f32 %v2381_v9, %v2370_v7  ;;  %v7833_v53 = vld [vmem:[%s11821_s5 + $0x48] sm:$0xff] }
 0x814   : > { %v2383_v11 = vadd.f32 %v2376_v5, %v2369_v10  ;;  %v10787_v13 = vmax.f32 %v2384_v56, 0.0 }
 0x816   : > { %v10785_v12 = vmax.f32 %v2383_v11, 0.0 }
 0x818   : > { %8893 = vmatprep.mubr.msk.f32.mxu1 %vm2395_vm2, %v10785_v12 }
 0x819   : > { %8894 = vmatmul.mubr.msk.f32.vlgmr.msra.gmra.mxu1 %vm2395_vm2, %v10787_v13 }
 0x81a   : > { %8897 = vmatpush3.msra.mxu1 %v7807_v4  ;;  %8912 = vmatprep.mubr.msk.f32.mxu1 %vm2395_vm2, %v10785_v12 }
 0x81b   : > { %8898 = vmatprep.subr.mxu1 %v7806_v14 }
 0x81c   : > { %8899 = vmatpush3.msra.mxu1 %v7806_v14 }
 0x81d   : > { %8900 = vmatprep.subr.mxu1 %v7805_v15 }
 0x81e   : > { %8901 = vmatpush3.msra.mxu1 %v7805_v15 }
 0x81f   : > { %8902 = vmatprep.subr.mxu1 %v7804_v16 }
 0x820   : > { %8903 = vmatpush3.msra.mxu1 %v7804_v16  ;;  %v7851_v16 = vld [vmem:[%s11821_s5 + $0x68] sm:$0xff] }
 0x821   : > { %8904 = vmatprep.subr.mxu1 %v7803_v17 }
 0x822   : > { %8905 = vmatpush3.msra.mxu1 %v7803_v17  ;;  %v7865_v17 = vld [vmem:[%s11854_s28 + $0x138] sm:$0xff] }
 0x823   : > { %8906 = vmatprep.subr.mxu1 %v7802_v18 }
 0x824   : > { %8907 = vmatpush3.msra.mxu1 %v7802_v18  ;;  %v7852_v18 = vld [vmem:[%s11821_s5 + $0x70] sm:$0xff] }
 0x825   : > { %8908 = vmatprep.subr.mxu1 %v7801_v63 }
 0x826   : > { %8909 = vmatpush3.msra.mxu1 %v7801_v63  ;;  %v7864_v63 = vld [vmem:[%s11854_s28 + $0x130] sm:$0xff] }
 0x827   : > { %8910 = vmatprep.subr.mxu1 %v7800_v19 }
 0x828   : > { %8911 = vmatpush3.msra.mxu1 %v7800_v19  ;;  %v7853_v19 = vld [vmem:[%s11821_s5 + $0x78] sm:$0xff] }
 0x829   : > { %8913 = vmatmul.mubr.msk.f32.vlgmr.msra.gmra.mxu1 %vm2395_vm2, %v10787_v13 }
 0x82a   : > { %8929 = vmatprep.mubr.msk.f32.mxu1 %vm2570_vm3, %v2477_v21  ;;  %v7862_v21 = vld [vmem:[%s11854_s28 + $0x120] sm:$0xff] }
 0x8d9   : > { %v8895_v22 = vpop.f32.mrf.mxu1 }
 0x8da   : > { %8925 = vmatprep.subr.mxu1 %v8895_v22 }
 0x8db   : > { %v2468_v23 = vpop.f32.mrf.mxu1  ;;  %8926 = vmatpush3.msra.mxu1 %v8895_v22  ;;  %v7861_v22 = vld [vmem:[%s11854_s28 + $0x118] sm:$0xff] }
 0x8dc   : > { %8927 = vmatprep.subr.mxu1 %v2468_v23 }
 0x8dd   : > { %8928 = vmatpush3.msra.mxu1 %v2468_v23  ;;  %v7860_v23 = vld [vmem:[%s11854_s28 + $0x110] sm:$0xff] }
 0x8de   : > { %8930 = vmatmul.mubr.msk.f32.vlgmr.msra.gmra.mxu1 %vm2570_vm3, %v2478_v24  ;;  %v7859_v24 = vld [vmem:[%s11854_s28 + $0x108] sm:$0xff] }
 0x8df   : > { %8932 = vmatprep.mubr.msk.f32.mxu1 %vm2570_vm3, %v2479_v25  ;;  %v7858_v25 = vld [vmem:[%s11854_s28 + $0x100] sm:$0xff] }
 0x8e2   : > { %8933 = vmatmul.mubr.msk.f32.gmra.mxu1 %vm2570_vm3, %v2480_v26  ;;  %v7868_v26 = vld [vmem:[%s11821_s5 + $0x80] sm:$0xff] }
 0x8e3   : > { %8958 = vmatprep.mubr.msk.f32.mxu1 %vm2570_vm3, %v7832_v40  ;;  %v7882_v40 = vld [vmem:[%s11854_s28 + $0x170] sm:$0xff] }
 0x8e9   : > { %v8914_v27 = vpop.f32.mrf.mxu1 }
 0x8ea   : > { %8915 = vmatprep.subr.mxu0 %v8914_v27 }
 0x8eb   : > { %v2556_v28 = vpop.f32.mrf.mxu1  ;;  %8916 = vmatpush3.msra.mxu0 %v8914_v27 }
 0x8ec   : > { %8917 = vmatprep.subr.mxu0 %v2556_v28 }
 0x8ed   : > { %8918 = vmatpush3.msra.mxu0 %v2556_v28 }
 0x8ee   : > { %8920 = vmatmul.mubr.msk.f32.vlgmr.msra.gmra.mxu0 %vm2570_vm3, %v7811_v29  ;;  %8935 = vmatprep.subr.mxu0 %v7829_v30 }
 0x8ef   : > { %8936 = vmatpush3.msra.mxu0 %v7829_v30  ;;  %8922 = vmatprep.mubr.msk.f32.mxu0 %vm2570_vm3, %v7812_v31 }
 0x8f0   : > { %8937 = vmatprep.subr.mxu0 %v7828_v32 }
 0x8f1   : > { %8938 = vmatpush3.msra.mxu0 %v7828_v32 }
 0x8f2   : > { %8923 = vmatmul.mubr.msk.f32.gmra.mxu0 %vm2570_vm3, %v7813_v33  ;;  %8939 = vmatprep.subr.mxu0 %v7827_v34 }
 0x8f3   : > { %8940 = vmatpush3.msra.mxu0 %v7827_v34  ;;  %8951 = vmatprep.mubr.msk.f32.mxu0 %vm2395_vm2, %v10785_v12 }
 0x8f4   : > { %8941 = vmatprep.subr.mxu0 %v7826_v35 }
 0x8f5   : > { %8942 = vmatpush3.msra.mxu0 %v7826_v35 }
 0x8f6   : > { %8943 = vmatprep.subr.mxu0 %v7825_v36 }
 0x8f7   : > { %8944 = vmatpush3.msra.mxu0 %v7825_v36 }
 0x8f8   : > { %8945 = vmatprep.subr.mxu0 %v7824_v37 }
 0x8f9   : > { %8946 = vmatpush3.msra.mxu0 %v7824_v37  ;;  %v7869_v37 = vld [vmem:[%s11821_s5 + $0x88] sm:$0xff] }
 0x8fa   : > { %8947 = vmatprep.subr.mxu0 %v7823_v38 }
 0x8fb   : > { %8948 = vmatpush3.msra.mxu0 %v7823_v38  ;;  %v7883_v38 = vld [vmem:[%s11854_s28 + $0x178] sm:$0xff] }
 0x8fc   : > { %8949 = vmatprep.subr.mxu0 %v7822_v39 }
 0x8fd   : > { %8950 = vmatpush3.msra.mxu0 %v7822_v39  ;;  %v7870_v39 = vld [vmem:[%s11821_s5 + $0x90] sm:$0xff] }
 0x8fe   : > { %8952 = vmatmul.mubr.msk.f32.vlgmr.msra.gmra.mxu0 %vm2395_vm2, %v10787_v13 }
 0x8ff   : > { %8987 = vmatprep.mubr.msk.f32.mxu0 %vm2570_vm3, %v7850_v2  ;;  %v7899_v2 = vld [vmem:[%s11854_s28 + $0x1a8] sm:$0xff] }
 0x99e   : > { %v8931_v41 = vpop.f32.mrf.mxu1 }
 0x9a0   : > { %v2746_v43 = vpop.f32.mrf.mxu1 }
 0x9a2   : > { %v8934_v48 = vpop.f32.mrf.mxu1 }
 0x9a4   : > { %v2756_v3 = vpop.f32.mrf.mxu1 }
 0x9ae   : > { %v8921_v42 = vpop.f32.mrf.mxu0 }
 0x9af   : > { %v2752_v44 = vadd.f32 %v8931_v41, %v8921_v42  ;;  %v7871_v41 = vld [vmem:[%s11821_s5 + $0x98] sm:$0xff]  ;;  %v7881_v42 = vld [vmem:[%s11854_s28 + $0x168] sm:$0xff] }
 0x9b0   : > { %v2649_v45 = vpop.f32.mrf.mxu0 }
 0x9b1   : > { %v2747_v46 = vadd.f32 %v2746_v43, %v2649_v45  ;;  %v7880_v43 = vld [vmem:[%s11854_s28 + $0x160] sm:$0xff]  ;;  %v7878_v45 = vld [vmem:[%s11854_s28 + $0x150] sm:$0xff] }
 0x9b2   : > { %v8924_v47 = vpop.f32.mrf.mxu0 }
 0x9b3   : > { %v2762_v49 = vadd.f32 %v8934_v48, %v8924_v47  ;;  %v7876_v47 = vld [vmem:[%s11854_s28 + $0x140] sm:$0xff] }
 0x9b4   : > { %v2659_v50 = vpop.f32.mrf.mxu0  ;;  %v7886_v48 = vld [vmem:[%s11821_s5 + $0xa0] sm:$0xff] }
 0x9b5   : > { %v2757_v9 = vadd.f32 %v2756_v3, %v2659_v50  ;;  %v7898_v3 = vld [vmem:[%s11854_s28 + $0x1a0] sm:$0xff] }
 0x9be   : > { %v8953_v51 = vpop.f32.mrf.mxu0 }
 0x9bf   : > { %8954 = vmatprep.subr.mxu1 %v8953_v51 }
 0x9c0   : > { %v2840_v52 = vpop.f32.mrf.mxu0  ;;  %8955 = vmatpush3.msra.mxu1 %v8953_v51 }
 0x9c1   : > { %8956 = vmatprep.subr.mxu1 %v2840_v52 }
 0x9c2   : > { %8957 = vmatpush3.msra.mxu1 %v2840_v52 }
 0x9c3   : > { %8959 = vmatmul.mubr.msk.f32.vlgmr.msra.gmra.mxu1 %vm2570_vm3, %v7833_v53  ;;  %8964 = vmatprep.subr.mxu1 %v7847_v54 }
 0x9c4   : > { %8965 = vmatpush3.msra.mxu1 %v7847_v54  ;;  %8961 = vmatprep.mubr.msk.f32.mxu1 %vm2570_vm3, %v7834_v55 }
 0x9c5   : > { %8966 = vmatprep.subr.mxu1 %v7846_v57 }
 0x9c6   : > { %8967 = vmatpush3.msra.mxu1 %v7846_v57 }
 0x9c7   : > { %8962 = vmatmul.mubr.msk.f32.gmra.mxu1 %vm2570_vm3, %v7835_v58  ;;  %8968 = vmatprep.subr.mxu1 %v7845_v59 }
 0x9c8   : > { %8969 = vmatpush3.msra.mxu1 %v7845_v59  ;;  %8980 = vmatprep.mubr.msk.f32.mxu1 %vm2395_vm2, %v10785_v12 }
 0x9c9   : > { %8970 = vmatprep.subr.mxu1 %v7844_v60 }
 0x9ca   : > { %8971 = vmatpush3.msra.mxu1 %v7844_v60  ;;  %v7887_v60 = vld [vmem:[%s11821_s5 + $0xa8] sm:$0xff] }
 0x9cb   : > { %8972 = vmatprep.subr.mxu1 %v7843_v61 }
 0x9cc   : > { %8973 = vmatpush3.msra.mxu1 %v7843_v61  ;;  %v7901_v61 = vld [vmem:[%s11854_s28 + $0x1b8] sm:$0xff] }
 0x9cd   : > { %8974 = vmatprep.subr.mxu1 %v7842_v62 }
 0x9ce   : > { %8975 = vmatpush3.msra.mxu1 %v7842_v62  ;;  %v7888_v62 = vld [vmem:[%s11821_s5 + $0xb0] sm:$0xff] }
 0x9cf   : > { %8976 = vmatprep.subr.mxu1 %v7841_v0 }
 0x9d0   : > { %8977 = vmatpush3.msra.mxu1 %v7841_v0  ;;  %v7900_v0 = vld [vmem:[%s11854_s28 + $0x1b0] sm:$0xff] }
 0x9d1   : > { %8978 = vmatprep.subr.mxu1 %v7840_v1 }
 0x9d2   : > { %8979 = vmatpush3.msra.mxu1 %v7840_v1  ;;  %v7889_v1 = vld [vmem:[%s11821_s5 + $0xb8] sm:$0xff] }
 0x9d3   : > { %8981 = vmatmul.mubr.msk.f32.vlgmr.msra.gmra.mxu1 %vm2395_vm2, %v10787_v13 }
 0x9d4   : > { %9016 = vmatprep.mubr.msk.f32.mxu1 %vm2570_vm3, %v7868_v26  ;;  %v7915_v26 = vld [vmem:[%s11854_s28 + $0x1d8] sm:$0xff] }
 0xa83   : > { %v8960_v4 = vpop.f32.mrf.mxu1 }
 0xa84   : > { %v2952_v5 = vadd.f32 %v8960_v4, %v2752_v44  ;;  %v7879_v44 = vld [vmem:[%s11854_s28 + $0x158] sm:$0xff] }
 0xa85   : > { %v2932_v6 = vpop.f32.mrf.mxu1  ;;  %v7897_v4 = vld [vmem:[%s11854_s28 + $0x198] sm:$0xff] }
 0xa86   : > { %v2951_v7 = vadd.f32 %v2932_v6, %v2747_v46  ;;  %v7877_v46 = vld [vmem:[%s11854_s28 + $0x148] sm:$0xff] }
 0xa87   : > { %v8963_v8 = vpop.f32.mrf.mxu1  ;;  %v7895_v6 = vld [vmem:[%s11854_s28 + $0x188] sm:$0xff] }
 0xa88   : > { %v2954_v10 = vadd.f32 %v8963_v8, %v2762_v49  ;;  %v7904_v8 = vld [vmem:[%s11821_s5 + $0xc0] sm:$0xff] }
 0xa89   : > { %v2942_v56 = vpop.f32.mrf.mxu1 }
 0xa8a   : > { %v2953_v11 = vadd.f32 %v2942_v56, %v2757_v9 }
 0xa93   : > { %v8982_v14 = vpop.f32.mrf.mxu1 }
 0xa94   : > { %8983 = vmatprep.subr.mxu0 %v8982_v14 }
 0xa95   : > { %v3030_v15 = vpop.f32.mrf.mxu1  ;;  %8984 = vmatpush3.msra.mxu0 %v8982_v14 }
 0xa96   : > { %8985 = vmatprep.subr.mxu0 %v3030_v15 }
 0xa97   : > { %8986 = vmatpush3.msra.mxu0 %v3030_v15 }
 0xa98   : > { %8988 = vmatmul.mubr.msk.f32.vlgmr.msra.gmra.mxu0 %vm2570_vm3, %v7851_v16  ;;  %8993 = vmatprep.subr.mxu0 %v7865_v17 }
 0xa99   : > { %8994 = vmatpush3.msra.mxu0 %v7865_v17  ;;  %8990 = vmatprep.mubr.msk.f32.mxu0 %vm2570_vm3, %v7852_v18 }
 0xa9a   : > { %8995 = vmatprep.subr.mxu0 %v7864_v63 }
 0xa9b   : > { %8996 = vmatpush3.msra.mxu0 %v7864_v63 }
 0xa9c   : > { %8991 = vmatmul.mubr.msk.f32.gmra.mxu0 %vm2570_vm3, %v7853_v19  ;;  %8997 = vmatprep.subr.mxu0 %v7863_v20  ;;  %v7905_v19 = vld [vmem:[%s11821_s5 + $0xc8] sm:$0xff] }
 0xa9d   : > { %8998 = vmatpush3.msra.mxu0 %v7863_v20  ;;  %9009 = vmatprep.mubr.msk.f32.mxu0 %vm2395_vm2, %v10785_v12  ;;  %v7919_v20 = vld [vmem:[%s11854_s28 + $0x1f8] sm:$0xff] }
 0xa9e   : > { %8999 = vmatprep.subr.mxu0 %v7862_v21 }
 0xa9f   : > { %9000 = vmatpush3.msra.mxu0 %v7862_v21  ;;  %v7906_v21 = vld [vmem:[%s11821_s5 + $0xd0] sm:$0xff] }
 0xaa0   : > { %9001 = vmatprep.subr.mxu0 %v7861_v22 }
 0xaa1   : > { %9002 = vmatpush3.msra.mxu0 %v7861_v22  ;;  %v7918_v22 = vld [vmem:[%s11854_s28 + $0x1f0] sm:$0xff] }
 0xaa2   : > { %9003 = vmatprep.subr.mxu0 %v7860_v23 }
 0xaa3   : > { %9004 = vmatpush3.msra.mxu0 %v7860_v23  ;;  %v7907_v23 = vld [vmem:[%s11821_s5 + $0xd8] sm:$0xff] }
 0xaa4   : > { %9005 = vmatprep.subr.mxu0 %v7859_v24 }
 0xaa5   : > { %9006 = vmatpush3.msra.mxu0 %v7859_v24  ;;  %v7917_v24 = vld [vmem:[%s11854_s28 + $0x1e8] sm:$0xff] }
 0xaa6   : > { %9007 = vmatprep.subr.mxu0 %v7858_v25 }
 0xaa7   : > { %9008 = vmatpush3.msra.mxu0 %v7858_v25  ;;  %v7916_v25 = vld [vmem:[%s11854_s28 + $0x1e0] sm:$0xff] }
 0xaa8   : > { %9010 = vmatmul.mubr.msk.f32.vlgmr.msra.gmra.mxu0 %vm2395_vm2, %v10787_v13 }
 0xaa9   : > { %9045 = vmatprep.mubr.msk.f32.mxu0 %vm2570_vm3, %v7886_v48  ;;  %v7933_v48 = vld [vmem:[%s11854_s28 + $0x218] sm:$0xff] }
 0xb58   : > { %v8989_v27 = vpop.f32.mrf.mxu0 }
 0xb59   : > { %v3142_v28 = vadd.f32 %v8989_v27, %v2952_v5  ;;  %v7896_v5 = vld [vmem:[%s11854_s28 + $0x190] sm:$0xff] }
 0xb5a   : > { %v3122_v29 = vpop.f32.mrf.mxu0  ;;  %v7914_v27 = vld [vmem:[%s11854_s28 + $0x1d0] sm:$0xff] }
 0xb5b   : > { %v3141_v30 = vadd.f32 %v3122_v29, %v2951_v7  ;;  %v7894_v7 = vld [vmem:[%s11854_s28 + $0x180] sm:$0xff] }
 0xb5c   : > { %v8992_v31 = vpop.f32.mrf.mxu0  ;;  %v7912_v29 = vld [vmem:[%s11854_s28 + $0x1c0] sm:$0xff] }
 0xb5d   : > { %v3144_v32 = vadd.f32 %v8992_v31, %v2954_v10 }
 0xb5e   : > { %v3132_v33 = vpop.f32.mrf.mxu0 }
 0xb5f   : > { %v3143_v34 = vadd.f32 %v3132_v33, %v2953_v11 }
 0xb68   : > { %v9011_v35 = vpop.f32.mrf.mxu0 }
 0xb69   : > { %9012 = vmatprep.subr.mxu1 %v9011_v35 }
 0xb6a   : > { %v3220_v36 = vpop.f32.mrf.mxu0  ;;  %9013 = vmatpush3.msra.mxu1 %v9011_v35 }
 0xb6b   : > { %9014 = vmatprep.subr.mxu1 %v3220_v36 }
 0xb6c   : > { %9015 = vmatpush3.msra.mxu1 %v3220_v36 }
 0xb6d   : > { %9017 = vmatmul.mubr.msk.f32.vlgmr.msra.gmra.mxu1 %vm2570_vm3, %v7869_v37  ;;  %9022 = vmatprep.subr.mxu1 %v7883_v38 }
 0xb6e   : > { %9023 = vmatpush3.msra.mxu1 %v7883_v38  ;;  %9019 = vmatprep.mubr.msk.f32.mxu1 %vm2570_vm3, %v7870_v39 }
 0xb6f   : > { %9024 = vmatprep.subr.mxu1 %v7882_v40 }
 0xb70   : > { %9025 = vmatpush3.msra.mxu1 %v7882_v40 }
 0xb71   : > { %9020 = vmatmul.mubr.msk.f32.gmra.mxu1 %vm2570_vm3, %v7871_v41  ;;  %9026 = vmatprep.subr.mxu1 %v7881_v42  ;;  %v7923_v41 = vld [vmem:[%s11821_s5 + $0xe8] sm:$0xff] }
 0xb72   : > { %9027 = vmatpush3.msra.mxu1 %v7881_v42  ;;  %9038 = vmatprep.mubr.msk.f32.mxu1 %vm2395_vm2, %v10785_v12  ;;  %v7937_v42 = vld [vmem:[%s11854_s28 + $0x238] sm:$0xff] }
 0xb73   : > { %9028 = vmatprep.subr.mxu1 %v7880_v43 }
 0xb74   : > { %9029 = vmatpush3.msra.mxu1 %v7880_v43  ;;  %v7924_v43 = vld [vmem:[%s11821_s5 + $0xf0] sm:$0xff] }
 0xb75   : > { %9030 = vmatprep.subr.mxu1 %v7879_v44 }
 0xb76   : > { %9031 = vmatpush3.msra.mxu1 %v7879_v44  ;;  %v7936_v44 = vld [vmem:[%s11854_s28 + $0x230] sm:$0xff] }
 0xb77   : > { %9032 = vmatprep.subr.mxu1 %v7878_v45 }
 0xb78   : > { %9033 = vmatpush3.msra.mxu1 %v7878_v45  ;;  %v7925_v45 = vld [vmem:[%s11821_s5 + $0xf8] sm:$0xff] }
 0xb79   : > { %9034 = vmatprep.subr.mxu1 %v7877_v46 }
 0xb7a   : > { %9035 = vmatpush3.msra.mxu1 %v7877_v46  ;;  %v7935_v46 = vld [vmem:[%s11854_s28 + $0x228] sm:$0xff] }
 0xb7b   : > { %9036 = vmatprep.subr.mxu1 %v7876_v47 }
 0xb7c   : > { %9037 = vmatpush3.msra.mxu1 %v7876_v47  ;;  %v7934_v47 = vld [vmem:[%s11854_s28 + $0x220] sm:$0xff] }
 0xb7d   : > { %9039 = vmatmul.mubr.msk.f32.vlgmr.msra.gmra.mxu1 %vm2395_vm2, %v10787_v13 }
 0xb7e   : > { %9074 = vmatprep.mubr.msk.f32.mxu1 %vm2570_vm3, %v7904_v8  ;;  %v7943_v8 = vld [vmem:[%s11821_s5 + $0x118] sm:$0xff] }
 0xc2d   : > { %v9018_v49 = vpop.f32.mrf.mxu1 }
 0xc2e   : > { %v3332_v50 = vadd.f32 %v9018_v49, %v3142_v28  ;;  %v7913_v28 = vld [vmem:[%s11854_s28 + $0x1c8] sm:$0xff]  ;;  %v7932_v49 = vld [vmem:[%s11854_s28 + $0x210] sm:$0xff] }
 0xc2f   : > { %v3312_v51 = vpop.f32.mrf.mxu1 }
 0xc30   : > { %v3331_v52 = vadd.f32 %v3312_v51, %v3141_v30  ;;  %v7922_v30 = vld [vmem:[%s11821_s5 + $0xe0] sm:$0xff] }
 0xc31   : > { %v9021_v53 = vpop.f32.mrf.mxu1  ;;  %v7930_v51 = vld [vmem:[%s11854_s28 + $0x200] sm:$0xff] }
 0xc32   : > { %v3334_v54 = vadd.f32 %v9021_v53, %v3144_v32  ;;  %v4095_v53 = vld [vmem:[%s11822_s6] sm:$0xff] }
 0xc33   : > { %v3322_v55 = vpop.f32.mrf.mxu1  ;;  %4101 = vperm.xlu1 %9583, %v4095_v53   ;;  %v7993_v53 = vld [vmem:[%s11823_s7 + $0x60] sm:$0xff] }
 0xc34   : > { %v3333_v57 = vadd.f32 %v3322_v55, %v3143_v34  ;;  %v4098_v55 = vld [vmem:[%s11822_s6 + $0x18] sm:$0xff] }
 0xc3d   : > { %v9040_v58 = vpop.f32.mrf.mxu1 }
 0xc3e   : > { %9041 = vmatprep.subr.mxu0 %v9040_v58 }
 0xc3f   : > { %v3410_v59 = vpop.f32.mrf.mxu1  ;;  %9042 = vmatpush3.msra.mxu0 %v9040_v58  ;;  %v7226_v58 = vld [vmem:[%s11833_s17] sm:$0x1f] }
 0xc40   : > { %9043 = vmatprep.subr.mxu0 %v3410_v59 }
 0xc41   : > { %9044 = vmatpush3.msra.mxu0 %v3410_v59 }
 0xc42   : > { %9046 = vmatmul.mubr.msk.f32.vlgmr.msra.gmra.mxu0 %vm2570_vm3, %v7887_v60  ;;  %9051 = vmatprep.subr.mxu0 %v7901_v61 }
 0xc43   : > { %9052 = vmatpush3.msra.mxu0 %v7901_v61  ;;  %9048 = vmatprep.mubr.msk.f32.mxu0 %vm2570_vm3, %v7888_v62 }
 0xc44   : > { %9053 = vmatprep.subr.mxu0 %v7900_v0 }
 0xc45   : > { %9054 = vmatpush3.msra.mxu0 %v7900_v0 }
 0xc46   : > { %9049 = vmatmul.mubr.msk.f32.gmra.mxu0 %vm2570_vm3, %v7889_v1  ;;  %9055 = vmatprep.subr.mxu0 %v7899_v2 }
 0xc47   : > { %9056 = vmatpush3.msra.mxu0 %v7899_v2  ;;  %9067 = vmatprep.mubr.msk.f32.mxu0 %vm2395_vm2, %v10785_v12 }
 0xc48   : > { %9057 = vmatprep.subr.mxu0 %v7898_v3 }
 0xc49   : > { %9058 = vmatpush3.msra.mxu0 %v7898_v3 }
 0xc4a   : > { %9059 = vmatprep.subr.mxu0 %v7897_v4 }
 0xc4b   : > { %9060 = vmatpush3.msra.mxu0 %v7897_v4 }
 0xc4c   : > { %9061 = vmatprep.subr.mxu0 %v7896_v5 }
 0xc4d   : > { %9062 = vmatpush3.msra.mxu0 %v7896_v5 }
 0xc4e   : > { %9063 = vmatprep.subr.mxu0 %v7895_v6 }
 0xc4f   : > { %9064 = vmatpush3.msra.mxu0 %v7895_v6  ;;  %v7941_v6 = vld [vmem:[%s11821_s5 + $0x108] sm:$0xff] }
 0xc50   : > { %9065 = vmatprep.subr.mxu0 %v7894_v7 }
 0xc51   : > { %9066 = vmatpush3.msra.mxu0 %v7894_v7  ;;  %v7942_v7 = vld [vmem:[%s11821_s5 + $0x110] sm:$0xff] }
 0xc52   : > { %9068 = vmatmul.mubr.msk.f32.vlgmr.msra.gmra.mxu0 %vm2395_vm2, %v10787_v13 }
 0xc53   : > { %9103 = vmatprep.mubr.msk.f32.mxu0 %vm2570_vm3, %v7922_v30 }
 0xd02   : > { %v9047_v9 = vpop.f32.mrf.mxu0 }
 0xd03   : > { %v3522_v10 = vadd.f32 %v9047_v9, %v3332_v50  ;;  %v7931_v50 = vld [vmem:[%s11854_s28 + $0x208] sm:$0xff] }
 0xd04   : > { %v3502_v56 = vpop.f32.mrf.mxu0  ;;  %v4128_v9 = vld [vmem:[%s11823_s7 + $0x8] sm:$0xff] }
 0xd05   : > { %v3521_v11 = vadd.f32 %v3502_v56, %v3331_v52  ;;  %v7940_v52 = vld [vmem:[%s11821_s5 + $0x100] sm:$0xff] }
 0xd06   : > { %v9050_v14 = vpop.f32.mrf.mxu0  ;;  %v4127_v56 = vld [vmem:[%s11823_s7] sm:$0xff] }
 0xd07   : > { %v3524_v15 = vadd.f32 %v9050_v14, %v3334_v54  ;;  %v4096_v54 = vld [vmem:[%s11822_s6 + $0x8] sm:$0xff]  ;;  %v4102_v14 = vpop.permute.xlu1 %4101 }
 0xd08   : > { %v3512_v16 = vpop.f32.mrf.mxu0  ;;  %4106 = vperm.xlu1 %9583, %v4096_v54   ;;  %v8002_v54 = vld [vmem:[%s11823_s7 + $0x78] sm:$0xff] }
 0xd09   : > { %v3523_v17 = vadd.f32 %v3512_v16, %v3333_v57  ;;  %v5621_v57 = vld [vmem:[%s11827_s11] sm:$0x1f] }
 0xd0c   : > { %4116 = vperm.xlu1 %9583, %v4098_v55   ;;  %v8001_v55 = vld [vmem:[%s11823_s7 + $0x70] sm:$0xff] }
 0xd10   : > { %5624 = vperm.xlu1 %9583, %v5621_v57   ;;  %v8010_v57 = vld [vmem:[%s11823_s7 + $0x88] sm:$0xff] }
 0xd12   : > { %v9069_v18 = vpop.f32.mrf.mxu0 }
 0xd13   : > { %9070 = vmatprep.subr.mxu1 %v9069_v18 }
 0xd14   : > { %v3600_v63 = vpop.f32.mrf.mxu0  ;;  %9071 = vmatpush3.msra.mxu1 %v9069_v18  ;;  %7229 = vperm.xlu1 %9583, %v7226_v58   ;;  %v8009_v58 = vld [vmem:[%s11823_s7 + $0x80] sm:$0xff] }
 0xd15   : > { %9072 = vmatprep.subr.mxu1 %v3600_v63 }
 0xd16   : > { %9073 = vmatpush3.msra.mxu1 %v3600_v63 }
 0xd17   : > { %9075 = vmatmul.mubr.msk.f32.vlgmr.msra.gmra.mxu1 %vm2570_vm3, %v7905_v19  ;;  %9080 = vmatprep.subr.mxu1 %v7919_v20 }
 0xd18   : > { %9081 = vmatpush3.msra.mxu1 %v7919_v20  ;;  %9077 = vmatprep.mubr.msk.f32.mxu1 %vm2570_vm3, %v7906_v21 }
 0xd19   : > { %9082 = vmatprep.subr.mxu1 %v7918_v22 }
 0xd1a   : > { %9083 = vmatpush3.msra.mxu1 %v7918_v22 }
 0xd1b   : > { %9078 = vmatmul.mubr.msk.f32.gmra.mxu1 %vm2570_vm3, %v7907_v23  ;;  %9084 = vmatprep.subr.mxu1 %v7917_v24 }
 0xd1c   : > { %9085 = vmatpush3.msra.mxu1 %v7917_v24  ;;  %9096 = vmatprep.mubr.msk.f32.mxu1 %vm2395_vm2, %v10785_v12 }
 0xd1d   : > { %9086 = vmatprep.subr.mxu1 %v7916_v25 }
 0xd1e   : > { %9087 = vmatpush3.msra.mxu1 %v7916_v25 }
 0xd1f   : > { %9088 = vmatprep.subr.mxu1 %v7915_v26 }
 0xd20   : > { %9089 = vmatpush3.msra.mxu1 %v7915_v26 }
 0xd21   : > { %9090 = vmatprep.subr.mxu1 %v7914_v27 }
 0xd22   : > { %9091 = vmatpush3.msra.mxu1 %v7914_v27  ;;  %v4112_v27 = vpop.permute.xlu0 %4111 }
 0xd23   : > { %9092 = vmatprep.subr.mxu1 %v7913_v28 }
 0xd24   : > { %9093 = vmatpush3.msra.mxu1 %v7913_v28 }
 0xd25   : > { %9094 = vmatprep.subr.mxu1 %v7912_v29 }
 0xd26   : > { %9095 = vmatpush3.msra.mxu1 %v7912_v29 }
 0xd27   : > { %9097 = vmatmul.mubr.msk.f32.vlgmr.msra.gmra.mxu1 %vm2395_vm2, %v10787_v13 }
 0xd28   : > { %9132 = vmatprep.mubr.msk.f32.mxu1 %vm2570_vm3, %v7940_v52  ;;  %v7994_v52 = vld [vmem:[%s11823_s7 + $0x68] sm:$0xff] }
 0xd83   : > { %v4107_v16 = vpop.permute.xlu1 %4106 }
 0xd87   : > { %v4117_v24 = vpop.permute.xlu1 %4116 }
 0xdd7   : > { %v9076_v31 = vpop.f32.mrf.mxu1 }
 0xdd8   : > { %v3712_v32 = vadd.f32 %v9076_v31, %v3522_v10  ;;  %v7953_v10 = vld [vmem:[%s11823_s7 + $0x18] sm:$0xff] }
 0xdd9   : > { %v3692_v33 = vpop.f32.mrf.mxu1 }
 0xdda   : > { %v3711_v34 = vadd.f32 %v3692_v33, %v3521_v11  ;;  %v7952_v11 = vld [vmem:[%s11823_s7 + $0x10] sm:$0xff]  ;;  %v9595_v33 = vmov 0.0  }
 0xddb   : > { %v9079_v35 = vpop.f32.mrf.mxu1 }
 0xddc   : > { %v3714_v36 = vadd.f32 %v9079_v35, %v3524_v15 }
 0xddd   : > { %v3702_v37 = vpop.f32.mrf.mxu1 }
 0xdde   : > { %v3713_v38 = vadd.f32 %v3702_v37, %v3523_v17 }
 0xde7   : > { %v9098_v39 = vpop.f32.mrf.mxu1 }
 0xde8   : > { %9099 = vmatprep.subr.mxu0 %v9098_v39 }
 0xde9   : > { %v3790_v40 = vpop.f32.mrf.mxu1  ;;  %9100 = vmatpush3.msra.mxu0 %v9098_v39 }
 0xdea   : > { %9101 = vmatprep.subr.mxu0 %v3790_v40 }
 0xdeb   : > { %9102 = vmatpush3.msra.mxu0 %v3790_v40 }
 0xdec   : > { %9104 = vmatmul.mubr.msk.f32.vlgmr.msra.gmra.mxu0 %vm2570_vm3, %v7923_v41  ;;  %9109 = vmatprep.subr.mxu0 %v7937_v42 }
 0xded   : > { %9110 = vmatpush3.msra.mxu0 %v7937_v42  ;;  %9106 = vmatprep.mubr.msk.f32.mxu0 %vm2570_vm3, %v7924_v43  ;;  %v7958_v42 = vld [vmem:[%s11824_s8 + $0x8] sm:$0xff]  ;;  %v4226_v43 = vld [vmem:[%s11824_s8] sm:$0xff] }
 0xdee   : > { %9111 = vmatprep.subr.mxu0 %v7936_v44 }
 0xdef   : > { %9112 = vmatpush3.msra.mxu0 %v7936_v44  ;;  %v7962_v44 = vld [vmem:[%s11823_s7 + $0x28] sm:$0xff] }
 0xdf0   : > { %9107 = vmatmul.mubr.msk.f32.gmra.mxu0 %vm2570_vm3, %v7925_v45  ;;  %9113 = vmatprep.subr.mxu0 %v7935_v46  ;;  %v7961_v45 = vld [vmem:[%s11823_s7 + $0x20] sm:$0xff] }
 0xdf1   : > { %9114 = vmatpush3.msra.mxu0 %v7935_v46  ;;  %9125 = vmatprep.mubr.msk.f32.mxu0 %vm2395_vm2, %v10785_v12  ;;  %v7970_v46 = vld [vmem:[%s11823_s7 + $0x38] sm:$0xff] }
 0xdf2   : > { %9115 = vmatprep.subr.mxu0 %v7934_v47 }
 0xdf3   : > { %9116 = vmatpush3.msra.mxu0 %v7934_v47  ;;  %v7969_v47 = vld [vmem:[%s11823_s7 + $0x30] sm:$0xff] }
 0xdf4   : > { %9117 = vmatprep.subr.mxu0 %v7933_v48 }
 0xdf5   : > { %9118 = vmatpush3.msra.mxu0 %v7933_v48  ;;  %v7978_v48 = vld [vmem:[%s11823_s7 + $0x48] sm:$0xff] }
 0xdf6   : > { %9119 = vmatprep.subr.mxu0 %v7932_v49 }
 0xdf7   : > { %9120 = vmatpush3.msra.mxu0 %v7932_v49  ;;  %v7977_v49 = vld [vmem:[%s11823_s7 + $0x40] sm:$0xff] }
 0xdf8   : > { %9121 = vmatprep.subr.mxu0 %v7931_v50 }
 0xdf9   : > { %9122 = vmatpush3.msra.mxu0 %v7931_v50  ;;  %v7986_v50 = vld [vmem:[%s11823_s7 + $0x58] sm:$0xff] }
 0xdfa   : > { %9123 = vmatprep.subr.mxu0 %v7930_v51 }
 0xdfb   : > { %9124 = vmatpush3.msra.mxu0 %v7930_v51  ;;  %v7985_v51 = vld [vmem:[%s11823_s7 + $0x50] sm:$0xff] }
 0xdfc   : > { %9126 = vmatmul.mubr.msk.f32.vlgmr.msra.gmra.mxu0 %vm2395_vm2, %v10787_v13  ;;  %9138 = vmatprep.subr.mxu0 %v4128_v9 }
 0xdfd   : > { %9139 = vmatpush3.msra.mxu0 %v4128_v9 }
 0xdfe   : > { %9140 = vmatprep.subr.mxu0 %v4127_v56 }
 0xdff   : > { %9141 = vmatpush3.msra.mxu0 %v4127_v56  ;;  %v7975_v56 = vld [vmem:[%s11824_s8 + $0x18] sm:$0xff] }
 0xe00   : > { %9158 = vmatprep.subr.mxu0 %v9595_v33 }
 0xeac   : > { %v9105_v59 = vpop.f32.mrf.mxu0 }
 0xead   : > { %v3902_v60 = vadd.f32 %v9105_v59, %v3712_v32 }
 0xeae   : > { %v3882_v61 = vpop.f32.mrf.mxu0 }
 0xeaf   : > { %v3901_v62 = vadd.f32 %v3882_v61, %v3711_v34 }
 0xeb0   : > { %v9108_v0 = vpop.f32.mrf.mxu0 }
 0xeb1   : > { %v3904_v1 = vadd.f32 %v9108_v0, %v3714_v36 }
 0xeb2   : > { %v3892_v2 = vpop.f32.mrf.mxu0 }
 0xeb3   : > { %v3903_v3 = vadd.f32 %v3892_v2, %v3713_v38 }
 0xebc   : > { %v9127_v4 = vpop.f32.mrf.mxu0 }
 0xebd   : > { %9128 = vmatprep.subr.mxu1 %v9127_v4 }
 0xebe   : > { %v3980_v5 = vpop.f32.mrf.mxu0  ;;  %9129 = vmatpush3.msra.mxu1 %v9127_v4 }
 0xebf   : > { %9130 = vmatprep.subr.mxu1 %v3980_v5 }
 0xec0   : > { %9131 = vmatpush3.msra.mxu1 %v3980_v5 }
 0xec1   : > { %9133 = vmatmul.mubr.msk.f32.vlgmr.msra.gmra.mxu1 %vm2570_vm3, %v7941_v6  ;;  %9148 = vmatprep.subr.mxu1 %v7953_v10  ;;  %v7967_v6 = vld [vmem:[%s11824_s8 + $0x10] sm:$0xff] }
 0xec2   : > { %9135 = vmatprep.mubr.msk.f32.mxu1 %vm2570_vm3, %v7942_v7  ;;  %9149 = vmatpush3.msra.mxu1 %v7953_v10 }
 0xec3   : > { %9150 = vmatprep.subr.mxu1 %v7952_v11 }
 0xec4   : > { %9151 = vmatpush3.msra.mxu1 %v7952_v11 }
 0xec5   : > { %9136 = vmatmul.mubr.msk.f32.gmra.mxu1 %vm2570_vm3, %v7943_v8  ;;  %9169 = vmatprep.subr.mxu1 %v9595_v33 }
 0xf81   : > { %v9134_v15 = vpop.f32.mrf.mxu1 }
 0xf82   : > { %v4092_v17 = vadd.f32 %v9134_v15, %v3902_v60 }
 0xf83   : > { %v4072_v18 = vpop.f32.mrf.mxu1 }
 0xf84   : > { %v4091_v63 = vadd.f32 %v4072_v18, %v3901_v62  ;;  %v4120_v19 = vadd.f32 %v4107_v16, %v4092_v17  ;;  %v7983_v17 = vld [vmem:[%s11824_s8 + $0x20] sm:$0xff] }
 0xf85   : > { %v9137_v20 = vpop.f32.mrf.mxu1 }
 0xf86   : > { %v4119_v21 = vadd.f32 %v4102_v14, %v4091_v63  ;;  %v4094_v22 = vadd.f32 %v9137_v20, %v3904_v1  ;;  %v11187_v28 = vmax.f32 %v4120_v19, 0.0 }
 0xf87   : > { %v4082_v23 = vpop.f32.mrf.mxu1 }
 0xf88   : > { %v11185_v25 = vmax.f32 %v4119_v21, 0.0  ;;  %v4093_v26 = vadd.f32 %v4082_v23, %v3903_v3  ;;  %v4122_v29 = vadd.f32 %v4117_v24, %v4094_v22  ;;  %v7991_v21 = vld [vmem:[%s11824_s8 + $0x28] sm:$0xff] }
 0xf8a   : > { %v4121_v30 = vadd.f32 %v4112_v27, %v4093_v26  ;;  %9142 = vmatprep.mubr.msk.f32.mxu0 %vm2570_vm3, %v11185_v25  ;;  %9152 = vmatprep.mubr.msk.f32.mxu1 %vm2570_vm3, %v11185_v25  ;;  %v11199_v32 = vmax.f32 %v4122_v29, 0.0  ;;  %v7999_v26 = vld [vmem:[%s11824_s8 + $0x30] sm:$0xff] }
 0xf8b   : > { %9143 = vmatmul.mubr.msk.f32.vlgmr.msra.gmra.mxu0 %vm2570_vm3, %v11187_v28  ;;  %9153 = vmatmul.mubr.msk.f32.vlgmr.msra.gmra.mxu1 %vm2570_vm3, %v11187_v28 }
 0xf8c   : > { %v11197_v31 = vmax.f32 %v4121_v30, 0.0 }
 0xf8e   : > { %9145 = vmatprep.mubr.msk.f32.mxu0 %vm2570_vm3, %v11197_v31  ;;  %9155 = vmatprep.mubr.msk.f32.mxu1 %vm2570_vm3, %v11197_v31 }
 0xf8f   : > { %9146 = vmatmul.mubr.msk.f32.gmra.mxu0 %vm2570_vm3, %v11199_v32  ;;  %9156 = vmatmul.mubr.msk.f32.gmra.mxu1 %vm2570_vm3, %v11199_v32 }
 0xf90   : > { %9166 = vmatprep.mubr.msk.f32.mxu0 %vm9596_vm4, %v9595_v33  ;;  %9177 = vmatprep.mubr.msk.f32.mxu1 %vm9596_vm4, %v9595_v33 }
0x104b   : > { %v9144_v34 = vpop.f32.mrf.mxu0  ;;  %v9154_v35 = vpop.f32.mrf.mxu1 }
0x104d   : > { %v4207_v36 = vpop.f32.mrf.mxu0  ;;  %v4296_v37 = vpop.f32.mrf.mxu1 }
0x104f   : > { %v9147_v38 = vpop.f32.mrf.mxu0  ;;  %v9157_v39 = vpop.f32.mrf.mxu1 }
0x1050   : > { %9159 = vmatpush3.msra.mxu0 %v9157_v39  ;;  %9170 = vmatpush3.msra.mxu1 %v9147_v38  ;;  %v5703_v38 = vld [vmem:[%s11828_s12 + $0x10] sm:$0xff] }
0x1051   : > { %v4217_v40 = vpop.f32.mrf.mxu0  ;;  %v4306_v41 = vpop.f32.mrf.mxu1  ;;  %9160 = vmatprep.subr.mxu0 %v9595_v33  ;;  %9171 = vmatprep.subr.mxu1 %v9595_v33 }
0x1052   : > { %9161 = vmatpush3.msra.mxu0 %v4306_v41  ;;  %9172 = vmatpush3.msra.mxu1 %v4217_v40 }
0x1053   : > { %9162 = vmatprep.subr.mxu0 %v9595_v33  ;;  %9173 = vmatprep.subr.mxu1 %v9595_v33 }
0x1054   : > { %9163 = vmatpush3.msra.mxu0 %v9154_v35  ;;  %9174 = vmatpush3.msra.mxu1 %v9144_v34 }
0x1055   : > { %9164 = vmatprep.subr.mxu0 %v9595_v33  ;;  %9175 = vmatprep.subr.mxu1 %v9595_v33 }
0x1056   : > { %9165 = vmatpush3.msra.mxu0 %v4296_v37  ;;  %9176 = vmatpush3.msra.mxu1 %v4207_v36  ;;  %v8015_v36 = vld [vmem:[%s11824_s8 + $0x40] sm:$0xff]  ;;  %v5704_v37 = vld [vmem:[%s11828_s12 + $0x18] sm:$0xff] }
0x1057   : > { %9167 = vmatmul.mubr.msk.f32.vlgmr.msra.gmra.mxu0 %vm4317_vm5, %v7958_v42  ;;  %9178 = vmatmul.mubr.msk.f32.vlgmr.msra.gmra.mxu1 %vm4317_vm5, %v4226_v43 }
0x1058   : > { %9180 = vmatprep.subr.mxu0 %v7962_v44  ;;  %9184 = vmatprep.mubr.msk.f32.mxu0 %vm2570_vm3, %v11185_v25 }
0x1059   : > { %9181 = vmatpush3.msra.mxu0 %v7962_v44  ;;  %9190 = vmatprep.subr.mxu1 %v9595_v33 }
0x105a   : > { %9182 = vmatprep.subr.mxu0 %v7961_v45  ;;  %9198 = vmatprep.mubr.msk.f32.mxu1 %vm9596_vm4, %v9595_v33 }
0x105b   : > { %9183 = vmatpush3.msra.mxu0 %v7961_v45 }
0x105c   : > { %9185 = vmatmul.mubr.msk.f32.vlgmr.msra.gmra.mxu0 %vm2570_vm3, %v11187_v28  ;;  %9201 = vmatprep.subr.mxu0 %v7970_v46 }
0x105d   : > { %9187 = vmatprep.mubr.msk.f32.mxu0 %vm2570_vm3, %v11197_v31  ;;  %9202 = vmatpush3.msra.mxu0 %v7970_v46 }
0x105e   : > { %9203 = vmatprep.subr.mxu0 %v7969_v47 }
0x105f   : > { %9204 = vmatpush3.msra.mxu0 %v7969_v47 }
0x1060   : > { %9188 = vmatmul.mubr.msk.f32.gmra.mxu0 %vm2570_vm3, %v11199_v32  ;;  %9222 = vmatprep.subr.mxu0 %v7978_v48 }
0x1061   : > { %9205 = vmatprep.mubr.msk.f32.mxu0 %vm2570_vm3, %v11185_v25 }
0x1064   : > { %9206 = vmatmul.mubr.msk.f32.vlgmr.msra.gmra.mxu0 %vm2570_vm3, %v11187_v28 }
0x1065   : > { %9208 = vmatprep.mubr.msk.f32.mxu0 %vm2570_vm3, %v11197_v31  ;;  %9223 = vmatpush3.msra.mxu0 %v7978_v48 }
0x1066   : > { %9224 = vmatprep.subr.mxu0 %v7977_v49 }
0x1067   : > { %9225 = vmatpush3.msra.mxu0 %v7977_v49 }
0x1068   : > { %9209 = vmatmul.mubr.msk.f32.gmra.mxu0 %vm2570_vm3, %v11199_v32  ;;  %9243 = vmatprep.subr.mxu0 %v7986_v50 }
0x1069   : > { %9226 = vmatprep.mubr.msk.f32.mxu0 %vm2570_vm3, %v11185_v25 }
0x106c   : > { %9227 = vmatmul.mubr.msk.f32.vlgmr.msra.gmra.mxu0 %vm2570_vm3, %v11187_v28 }
0x106d   : > { %9229 = vmatprep.mubr.msk.f32.mxu0 %vm2570_vm3, %v11197_v31  ;;  %9244 = vmatpush3.msra.mxu0 %v7986_v50 }
0x106e   : > { %9245 = vmatprep.subr.mxu0 %v7985_v51 }
0x106f   : > { %9246 = vmatpush3.msra.mxu0 %v7985_v51 }
0x1070   : > { %9230 = vmatmul.mubr.msk.f32.gmra.mxu0 %vm2570_vm3, %v11199_v32  ;;  %9264 = vmatprep.subr.mxu0 %v7994_v52 }
0x1071   : > { %9247 = vmatprep.mubr.msk.f32.mxu0 %vm2570_vm3, %v11185_v25 }
0x1074   : > { %9248 = vmatmul.mubr.msk.f32.vlgmr.msra.gmra.mxu0 %vm2570_vm3, %v11187_v28 }
0x1075   : > { %9250 = vmatprep.mubr.msk.f32.mxu0 %vm2570_vm3, %v11197_v31  ;;  %9265 = vmatpush3.msra.mxu0 %v7994_v52 }
0x1076   : > { %9266 = vmatprep.subr.mxu0 %v7993_v53 }
0x1077   : > { %9267 = vmatpush3.msra.mxu0 %v7993_v53 }
0x1078   : > { %9251 = vmatmul.mubr.msk.f32.gmra.mxu0 %vm2570_vm3, %v11199_v32  ;;  %9285 = vmatprep.subr.mxu0 %v8002_v54 }
0x1079   : > { %9268 = vmatprep.mubr.msk.f32.mxu0 %vm2570_vm3, %v11185_v25 }
0x107c   : > { %9269 = vmatmul.mubr.msk.f32.vlgmr.msra.gmra.mxu0 %vm2570_vm3, %v11187_v28 }
0x107d   : > { %9271 = vmatprep.mubr.msk.f32.mxu0 %vm2570_vm3, %v11197_v31  ;;  %9286 = vmatpush3.msra.mxu0 %v8002_v54 }
0x107e   : > { %9287 = vmatprep.subr.mxu0 %v8001_v55 }
0x107f   : > { %9288 = vmatpush3.msra.mxu0 %v8001_v55 }
0x1080   : > { %9272 = vmatmul.mubr.msk.f32.gmra.mxu0 %vm2570_vm3, %v11199_v32  ;;  %9306 = vmatprep.subr.mxu0 %v8010_v57 }
0x1081   : > { %9289 = vmatprep.mubr.msk.f32.mxu0 %vm2570_vm3, %v11185_v25 }
0x1084   : > { %9290 = vmatmul.mubr.msk.f32.vlgmr.msra.gmra.mxu0 %vm2570_vm3, %v11187_v28 }
0x1085   : > { %9292 = vmatprep.mubr.msk.f32.mxu0 %vm2570_vm3, %v11197_v31  ;;  %9307 = vmatpush3.msra.mxu0 %v8010_v57 }
0x1086   : > { %9308 = vmatprep.subr.mxu0 %v8009_v58 }
0x1087   : > { %9309 = vmatpush3.msra.mxu0 %v8009_v58 }
0x1088   : > { %9293 = vmatmul.mubr.msk.f32.gmra.mxu0 %vm2570_vm3, %v11199_v32  ;;  %9327 = vmatprep.subr.mxu0 %v9595_v33 }
0x1089   : > { %9310 = vmatprep.mubr.msk.f32.mxu0 %vm2570_vm3, %v11185_v25 }
0x108c   : > { %9311 = vmatmul.mubr.msk.f32.vlgmr.msra.gmra.mxu0 %vm2570_vm3, %v11187_v28 }
0x108d   : > { %9313 = vmatprep.mubr.msk.f32.mxu0 %vm2570_vm3, %v11197_v31  ;;  %v8007_v31 = vld [vmem:[%s11824_s8 + $0x38] sm:$0xff] }
0x1090   : > { %9314 = vmatmul.mubr.msk.f32.gmra.mxu0 %vm2570_vm3, %v11199_v32 }
0x1091   : > { %9329 = vmatprep.mubr.msk.f32.mxu0 %vm9596_vm4, %v9595_v33 }
0x1117   : > { %v4387_v59 = vpop.f32.mrf.mxu0  ;;  %v4460_v60 = vpop.f32.mrf.mxu1 }
0x1118   : > { %v11333_v61 = vadd.f32 %v4460_v60, %v4387_v59  ;;  %v5616_v60 = vpop.permute.xlu0 %5615 }
0x1119   : > { %v9168_v62 = vpop.f32.mrf.mxu0  ;;  %v9179_v0 = vpop.f32.mrf.mxu1 }
0x111c   : > { %v9186_v1 = vpop.f32.mrf.mxu0 }
0x111e   : > { %v4533_v2 = vpop.f32.mrf.mxu0 }
0x1120   : > { %v9189_v3 = vpop.f32.mrf.mxu0 }
0x1121   : > { %9191 = vmatpush3.msra.mxu1 %v9189_v3  ;;  %v5787_v3 = vld [vmem:[%s11829_s13 + $0x30] sm:$0xff] }
0x1122   : > { %v4543_v4 = vpop.f32.mrf.mxu0  ;;  %9192 = vmatprep.subr.mxu1 %v9595_v33 }
0x1123   : > { %9193 = vmatpush3.msra.mxu1 %v4543_v4  ;;  %v5786_v4 = vld [vmem:[%s11829_s13 + $0x28] sm:$0xff] }
0x1124   : > { %9194 = vmatprep.subr.mxu1 %v9595_v33  ;;  %v9207_v5 = vpop.f32.mrf.mxu0 }
0x1125   : > { %9195 = vmatpush3.msra.mxu1 %v9186_v1 }
0x1126   : > { %9196 = vmatprep.subr.mxu1 %v9595_v33  ;;  %v4697_v7 = vpop.f32.mrf.mxu0 }
0x1127   : > { %9197 = vmatpush3.msra.mxu1 %v4533_v2  ;;  %v5620_v2 = vld [vmem:[%s11826_s10] sm:$0x1f] }
0x1128   : > { %9199 = vmatmul.mubr.msk.f32.vlgmr.msra.gmra.mxu1 %vm4317_vm5, %v7967_v6  ;;  %v9210_v8 = vpop.f32.mrf.mxu0  ;;  %9211 = vmatprep.subr.mxu1 %v9595_v33  ;;  %v5784_v6 = vld [vmem:[%s11829_s13 + $0x18] sm:$0xff] }
0x1129   : > { %9212 = vmatpush3.msra.mxu1 %v9210_v8  ;;  %9219 = vmatprep.mubr.msk.f32.mxu1 %vm9596_vm4, %v9595_v33  ;;  %v5782_v8 = vld [vmem:[%s11829_s13 + $0x8] sm:$0xff] }
0x112a   : > { %v4707_v9 = vpop.f32.mrf.mxu0  ;;  %9213 = vmatprep.subr.mxu1 %v9595_v33 }
0x112b   : > { %9214 = vmatpush3.msra.mxu1 %v4707_v9  ;;  %v5781_v9 = vld [vmem:[%s11829_s13] sm:$0xff] }
0x112c   : > { %9215 = vmatprep.subr.mxu1 %v9595_v33  ;;  %v9228_v10 = vpop.f32.mrf.mxu0 }
0x112d   : > { %9216 = vmatpush3.msra.mxu1 %v9207_v5  ;;  %v5785_v5 = vld [vmem:[%s11829_s13 + $0x20] sm:$0xff] }
0x112e   : > { %9217 = vmatprep.subr.mxu1 %v9595_v33  ;;  %v4861_v11 = vpop.f32.mrf.mxu0 }
0x112f   : > { %9218 = vmatpush3.msra.mxu1 %v4697_v7  ;;  %v5783_v7 = vld [vmem:[%s11829_s13 + $0x10] sm:$0xff] }
0x1130   : > { %9220 = vmatmul.mubr.msk.f32.vlgmr.msra.gmra.mxu1 %vm4317_vm5, %v7975_v56  ;;  %v9231_v14 = vpop.f32.mrf.mxu0  ;;  %9232 = vmatprep.subr.mxu1 %v9595_v33  ;;  %v5701_v56 = vld [vmem:[%s11828_s12] sm:$0xff] }
0x1131   : > { %9233 = vmatpush3.msra.mxu1 %v9231_v14  ;;  %9240 = vmatprep.mubr.msk.f32.mxu1 %vm9596_vm4, %v9595_v33  ;;  %v5625_v14 = vpop.permute.xlu1 %5624 }
0x1132   : > { %v4871_v15 = vpop.f32.mrf.mxu0  ;;  %9234 = vmatprep.subr.mxu1 %v9595_v33 }
0x1133   : > { %9235 = vmatpush3.msra.mxu1 %v4871_v15 }
0x1134   : > { %9236 = vmatprep.subr.mxu1 %v9595_v33  ;;  %v9249_v16 = vpop.f32.mrf.mxu0 }
0x1135   : > { %9237 = vmatpush3.msra.mxu1 %v9228_v10  ;;  %v5702_v10 = vld [vmem:[%s11828_s12 + $0x8] sm:$0xff] }
0x1136   : > { %9238 = vmatprep.subr.mxu1 %v9595_v33  ;;  %v5025_v18 = vpop.f32.mrf.mxu0 }
0x1137   : > { %9239 = vmatpush3.msra.mxu1 %v4861_v11  ;;  %v8028_v11 = vld [vmem:[%s11829_s13 + $0x78] sm:$0xff] }
0x1138   : > { %9241 = vmatmul.mubr.msk.f32.vlgmr.msra.gmra.mxu1 %vm4317_vm5, %v7983_v17  ;;  %v9252_v63 = vpop.f32.mrf.mxu0  ;;  %9253 = vmatprep.subr.mxu1 %v9595_v33 }
0x1139   : > { %9254 = vmatpush3.msra.mxu1 %v9252_v63  ;;  %9261 = vmatprep.mubr.msk.f32.mxu1 %vm9596_vm4, %v9595_v33  ;;  %v8026_v63 = vld [vmem:[%s11829_s13 + $0x68] sm:$0xff] }
0x113a   : > { %v5035_v19 = vpop.f32.mrf.mxu0  ;;  %9255 = vmatprep.subr.mxu1 %v9595_v33 }
0x113b   : > { %9256 = vmatpush3.msra.mxu1 %v5035_v19  ;;  %v8025_v19 = vld [vmem:[%s11829_s13 + $0x60] sm:$0xff] }
0x113c   : > { %9257 = vmatprep.subr.mxu1 %v9595_v33  ;;  %v9270_v20 = vpop.f32.mrf.mxu0 }
0x113d   : > { %9258 = vmatpush3.msra.mxu1 %v9249_v16 }
0x113e   : > { %9259 = vmatprep.subr.mxu1 %v9595_v33  ;;  %v5189_v22 = vpop.f32.mrf.mxu0 }
0x113f   : > { %9260 = vmatpush3.msra.mxu1 %v5025_v18  ;;  %v8027_v18 = vld [vmem:[%s11829_s13 + $0x70] sm:$0xff] }
0x1140   : > { %9262 = vmatmul.mubr.msk.f32.vlgmr.msra.gmra.mxu1 %vm4317_vm5, %v7991_v21  ;;  %v9273_v23 = vpop.f32.mrf.mxu0  ;;  %9274 = vmatprep.subr.mxu1 %v9595_v33  ;;  %v8023_v21 = vld [vmem:[%s11829_s13 + $0x50] sm:$0xff] }
0x1141   : > { %9275 = vmatpush3.msra.mxu1 %v9273_v23  ;;  %9282 = vmatprep.mubr.msk.f32.mxu1 %vm9596_vm4, %v9595_v33  ;;  %v8021_v23 = vld [vmem:[%s11829_s13 + $0x40] sm:$0xff] }
0x1142   : > { %v5199_v24 = vpop.f32.mrf.mxu0  ;;  %9276 = vmatprep.subr.mxu1 %v9595_v33 }
0x1143   : > { %9277 = vmatpush3.msra.mxu1 %v5199_v24 }
0x1144   : > { %9278 = vmatprep.subr.mxu1 %v9595_v33  ;;  %v9291_v25 = vpop.f32.mrf.mxu0 }
0x1145   : > { %9279 = vmatpush3.msra.mxu1 %v9270_v20  ;;  %v8024_v20 = vld [vmem:[%s11829_s13 + $0x58] sm:$0xff] }
0x1146   : > { %9280 = vmatprep.subr.mxu1 %v9595_v33  ;;  %v5353_v27 = vpop.f32.mrf.mxu0 }
0x1147   : > { %9281 = vmatpush3.msra.mxu1 %v5189_v22  ;;  %v8022_v22 = vld [vmem:[%s11829_s13 + $0x48] sm:$0xff] }
0x1148   : > { %9283 = vmatmul.mubr.msk.f32.vlgmr.msra.gmra.mxu1 %vm4317_vm5, %v7999_v26  ;;  %v9294_v28 = vpop.f32.mrf.mxu0  ;;  %9295 = vmatprep.subr.mxu1 %v9595_v33  ;;  %v5864_v26 = vld [vmem:[%s11830_s14] sm:$0xf] }
0x1149   : > { %9296 = vmatpush3.msra.mxu1 %v9294_v28  ;;  %9303 = vmatprep.mubr.msk.f32.mxu1 %vm9596_vm4, %v9595_v33 }
0x114a   : > { %v5363_v29 = vpop.f32.mrf.mxu0  ;;  %9297 = vmatprep.subr.mxu1 %v9595_v33 }
0x114b   : > { %9298 = vmatpush3.msra.mxu1 %v5363_v29 }
0x114c   : > { %9299 = vmatprep.subr.mxu1 %v9595_v33  ;;  %v9312_v30 = vpop.f32.mrf.mxu0 }
0x114d   : > { %9300 = vmatpush3.msra.mxu1 %v9291_v25 }
0x114e   : > { %9301 = vmatprep.subr.mxu1 %v9595_v33  ;;  %v5517_v32 = vpop.f32.mrf.mxu0 }
0x114f   : > { %9302 = vmatpush3.msra.mxu1 %v5353_v27 }
0x1150   : > { %9304 = vmatmul.mubr.msk.f32.vlgmr.msra.gmra.mxu1 %vm4317_vm5, %v8007_v31  ;;  %v9315_v34 = vpop.f32.mrf.mxu0  ;;  %9316 = vmatprep.subr.mxu1 %v9595_v33  ;;  %v8041_v31 = vld [vmem:[%s11829_s13 + $0xb8] sm:$0xff] }
0x1151   : > { %9317 = vmatpush3.msra.mxu1 %v9315_v34  ;;  %9324 = vmatprep.mubr.msk.f32.mxu1 %vm9596_vm4, %v9595_v33  ;;  %v8040_v34 = vld [vmem:[%s11829_s13 + $0xb0] sm:$0xff] }
0x1152   : > { %v5527_v35 = vpop.f32.mrf.mxu0  ;;  %9318 = vmatprep.subr.mxu1 %v9595_v33 }
0x1153   : > { %9319 = vmatpush3.msra.mxu1 %v5527_v35  ;;  %v8039_v35 = vld [vmem:[%s11829_s13 + $0xa8] sm:$0xff] }
0x1154   : > { %9320 = vmatprep.subr.mxu1 %v9595_v33 }
0x1155   : > { %9321 = vmatpush3.msra.mxu1 %v9312_v30  ;;  %v8031_v30 = vld [vmem:[%s11830_s14 + $0x4] sm:$0xf] }
0x1156   : > { %9322 = vmatprep.subr.mxu1 %v9595_v33 }
0x1157   : > { %9323 = vmatpush3.msra.mxu1 %v5517_v32 }
0x1158   : > { %9325 = vmatmul.mubr.msk.f32.vlgmr.msra.gmra.mxu1 %vm4317_vm5, %v8015_v36  ;;  %5736 = vmatprep.subr.mxu1 %v5704_v37  ;;  %v8038_v36 = vld [vmem:[%s11829_s13 + $0xa0] sm:$0xff]  ;;  %v8037_v37 = vld [vmem:[%s11829_s13 + $0x98] sm:$0xff] }
0x1159   : > { %5772 = vmatprep.mubr.f32.mxu1 %v9595_v33  ;;  %5737 = vmatpush1.msra.mxu1 %v5703_v38  ;;  %v8036_v38 = vld [vmem:[%s11829_s13 + $0x90] sm:$0xff] }
0x115a   : > { %5738 = vmatprep.subr.mxu1 %v5702_v10 }
0x115b   : > { %5739 = vmatpush1.msra.mxu1 %v5701_v56 }
0x115c   : > { %9351 = vmatprep.subr.mxu1 %v8028_v11 }
0x11e8   : > { %v4623_v39 = vpop.f32.mrf.mxu1 }
0x11e9   : > { %v4627_v49 = vadd.f32 %v4623_v39, %v11333_v61  ;;  %v5788_v61 = vld [vmem:[%s11829_s13 + $0x38] sm:$0xff]  ;;  %v8035_v39 = vld [vmem:[%s11829_s13 + $0x88] sm:$0xff] }
0x11ea   : > { %v9200_v40 = vpop.f32.mrf.mxu1 }
0x11eb   : > { %v8034_v40 = vld [vmem:[%s11829_s13 + $0x80] sm:$0xff] }
0x11f0   : > { %v4787_v41 = vpop.f32.mrf.mxu1 }
0x11f1   : > { %v4791_v50 = vadd.f32 %v4787_v41, %v4627_v49  ;;  %v8052_v49 = vld [vmem:[%s11829_s13 + $0xf0] sm:$0xff] }
0x11f2   : > { %v9221_v42 = vpop.f32.mrf.mxu1 }
0x11f8   : > { %v4951_v43 = vpop.f32.mrf.mxu1 }
0x11f9   : > { %v4955_v52 = vadd.f32 %v4951_v43, %v4791_v50  ;;  %v8051_v50 = vld [vmem:[%s11829_s13 + $0xe8] sm:$0xff] }
0x11fa   : > { %v9242_v44 = vpop.f32.mrf.mxu1 }
0x1200   : > { %v5115_v45 = vpop.f32.mrf.mxu1 }
0x1201   : > { %v5119_v54 = vadd.f32 %v5115_v45, %v4955_v52  ;;  %v8049_v52 = vld [vmem:[%s11829_s13 + $0xd8] sm:$0xff] }
0x1202   : > { %v9263_v46 = vpop.f32.mrf.mxu1 }
0x1203   : > { %v8044_v46 = vld [vmem:[%s11830_s14 + $0x8] sm:$0xf] }
0x1208   : > { %v5279_v47 = vpop.f32.mrf.mxu1 }
0x1209   : > { %v5283_v55 = vadd.f32 %v5279_v47, %v5119_v54  ;;  %v8053_v47 = vld [vmem:[%s11829_s13 + $0xf8] sm:$0xff]  ;;  %v8047_v54 = vld [vmem:[%s11829_s13 + $0xc8] sm:$0xff] }
0x120a   : > { %v9284_v48 = vpop.f32.mrf.mxu1 }
0x1210   : > { %v5443_v51 = vpop.f32.mrf.mxu1 }
0x1211   : > { %v5447_v57 = vadd.f32 %v5443_v51, %v5283_v55  ;;  %v8050_v51 = vld [vmem:[%s11829_s13 + $0xe0] sm:$0xff] }
0x1212   : > { %v9305_v53 = vpop.f32.mrf.mxu1  ;;  %v8046_v55 = vld [vmem:[%s11829_s13 + $0xc0] sm:$0xff] }
0x1213   : > { %v8048_v53 = vld [vmem:[%s11829_s13 + $0xd0] sm:$0xff] }
0x1218   : > { %v5607_v58 = vpop.f32.mrf.mxu1 }
0x1219   : > { %v5611_v59 = vadd.f32 %v5607_v58, %v5447_v57 }
0x121a   : > { %v9326_v62 = vpop.f32.mrf.mxu1 }
0x121b   : > { %v5618_v0 = vadd.f32 %v5616_v60, %v5611_v59 }
0x121d   : > { %v5619_v1 = vmax.f32 %v5618_v0, 0.0  ;;  %v8056_v0 = vld [vmem:[%s11830_s14 + $0xc] sm:$0xf] }
0x121f   : > { %9328 = vmatpush3.msra.mxu0 %v5619_v1  ;;  %v8065_v1 = vld [vmem:[%s11829_s13 + $0x138] sm:$0xff] }
0x1220   : > { %9330 = vmatmul.mubr.msk.f32.vlgmr.msra.gmra.mxu0 %vm5627_vm6, %v5620_v2  ;;  %9332 = vmatprep.subr.mxu0 %v5788_v61 }
0x1221   : > { %9333 = vmatpush3.msra.mxu0 %v5788_v61  ;;  %9348 = vmatprep.mubr.msk.f32.mxu0 %vm2395_vm2, %v10785_v12  ;;  %v8064_v61 = vld [vmem:[%s11829_s13 + $0x130] sm:$0xff] }
0x1222   : > { %9334 = vmatprep.subr.mxu0 %v5787_v3 }
0x1223   : > { %9335 = vmatpush3.msra.mxu0 %v5787_v3  ;;  %v8063_v3 = vld [vmem:[%s11829_s13 + $0x128] sm:$0xff] }
0x1224   : > { %9336 = vmatprep.subr.mxu0 %v5786_v4 }
0x1225   : > { %9337 = vmatpush3.msra.mxu0 %v5786_v4  ;;  %v8062_v4 = vld [vmem:[%s11829_s13 + $0x120] sm:$0xff] }
0x1226   : > { %9338 = vmatprep.subr.mxu0 %v5785_v5 }
0x1227   : > { %9339 = vmatpush3.msra.mxu0 %v5785_v5  ;;  %v8061_v5 = vld [vmem:[%s11829_s13 + $0x118] sm:$0xff] }
0x1228   : > { %9340 = vmatprep.subr.mxu0 %v5784_v6 }
0x1229   : > { %9341 = vmatpush3.msra.mxu0 %v5784_v6  ;;  %v8060_v6 = vld [vmem:[%s11829_s13 + $0x110] sm:$0xff] }
0x122a   : > { %9342 = vmatprep.subr.mxu0 %v5783_v7 }
0x122b   : > { %9343 = vmatpush3.msra.mxu0 %v5783_v7  ;;  %v8059_v7 = vld [vmem:[%s11829_s13 + $0x108] sm:$0xff] }
0x122c   : > { %9344 = vmatprep.subr.mxu0 %v5782_v8 }
0x122d   : > { %9345 = vmatpush3.msra.mxu0 %v5782_v8  ;;  %v8058_v8 = vld [vmem:[%s11829_s13 + $0x100] sm:$0xff] }
0x122e   : > { %9346 = vmatprep.subr.mxu0 %v5781_v9 }
0x122f   : > { %9347 = vmatpush3.msra.mxu0 %v5781_v9 }
0x1230   : > { %9349 = vmatmul.mubr.msk.f32.vlgmr.msra.gmra.mxu0 %vm2395_vm2, %v10787_v13  ;;  %9370 = vmatprep.subr.mxu0 %v9595_v33 }
0x1231   : > { %9374 = vmatprep.mubr.msk.f32.mxu0 %vm9596_vm4, %v9595_v33 }
0x12e0   : > { %v5697_v15 = vpop.f32.mrf.mxu0 }
0x12e1   : > { %v5698_v16 = vadd.f32 %v5697_v15, %v5625_v14  ;;  %v8068_v14 = vld [vmem:[%s11830_s14 + $0x10] sm:$0xf]  ;;  %v8077_v15 = vld [vmem:[%s11829_s13 + $0x178] sm:$0xff] }
0x12e2   : > { %v9331_v17 = vpop.f32.mrf.mxu0 }
0x12e3   : > { %8018 = vmatmul.mubr.msk.f32.vlgmr.msra.gmra.mxu1 %vm2570_vm3, %v5698_v16  ;;  %v8076_v17 = vld [vmem:[%s11829_s13 + $0x170] sm:$0xff] }
0x12e4   : > { %9352 = vmatpush3.msra.mxu1 %v8028_v11  ;;  %9367 = vmatprep.mubr.msk.f32.mxu1 %vm2395_vm2, %v10785_v12 }
0x12e5   : > { %9353 = vmatprep.subr.mxu1 %v8027_v18 }
0x12e6   : > { %9354 = vmatpush3.msra.mxu1 %v8027_v18  ;;  %v8075_v18 = vld [vmem:[%s11829_s13 + $0x168] sm:$0xff] }
0x12e7   : > { %9355 = vmatprep.subr.mxu1 %v8026_v63 }
0x12e8   : > { %9356 = vmatpush3.msra.mxu1 %v8026_v63  ;;  %v8074_v63 = vld [vmem:[%s11829_s13 + $0x160] sm:$0xff] }
0x12e9   : > { %9357 = vmatprep.subr.mxu1 %v8025_v19 }
0x12ea   : > { %9358 = vmatpush3.msra.mxu1 %v8025_v19  ;;  %v8073_v19 = vld [vmem:[%s11829_s13 + $0x158] sm:$0xff] }
0x12eb   : > { %9359 = vmatprep.subr.mxu1 %v8024_v20 }
0x12ec   : > { %9360 = vmatpush3.msra.mxu1 %v8024_v20  ;;  %v8072_v20 = vld [vmem:[%s11829_s13 + $0x150] sm:$0xff] }
0x12ed   : > { %9361 = vmatprep.subr.mxu1 %v8023_v21 }
0x12ee   : > { %9362 = vmatpush3.msra.mxu1 %v8023_v21  ;;  %v8071_v21 = vld [vmem:[%s11829_s13 + $0x148] sm:$0xff] }
0x12ef   : > { %9363 = vmatprep.subr.mxu1 %v8022_v22 }
0x12f0   : > { %9364 = vmatpush3.msra.mxu1 %v8022_v22  ;;  %v9350_v24 = vpop.f32.mrf.mxu0  ;;  %v8070_v22 = vld [vmem:[%s11829_s13 + $0x140] sm:$0xff] }
0x12f1   : > { %9365 = vmatprep.subr.mxu1 %v8021_v23 }
0x12f2   : > { %9366 = vmatpush3.msra.mxu1 %v8021_v23  ;;  %v5855_v25 = vpop.f32.mrf.mxu0 }
0x12f3   : > { %9368 = vmatmul.mubr.msk.f32.vlgmr.msra.gmra.mxu1 %vm2395_vm2, %v10787_v13  ;;  %9377 = vmatprep.subr.mxu1 %v9595_v33 }
0x12f4   : > { %9378 = vmatpush3.msra.mxu1 %v9350_v24  ;;  %9381 = vmatprep.mubr.msk.f32.mxu1 %vm9596_vm4, %v9595_v33 }
0x12f5   : > { %9379 = vmatprep.subr.mxu1 %v9595_v33 }
0x12f6   : > { %9380 = vmatpush3.msra.mxu1 %v5855_v25 }
0x12f7   : > { %9403 = vmatprep.subr.mxu1 %v9595_v33  ;;  %9382 = vmatmul.mubr.msk.f32.vlgmr.msra.gmra.mxu1 %vm2570_vm3, %v5864_v26 }
0x12f8   : > { %9407 = vmatprep.mubr.msk.f32.mxu1 %vm9596_vm4, %v9595_v33 }
0x13a3   : > { %v5774_v27 = vpop.f32.mrf.mxu1 }
0x13a4   : > { %5779 = vst [vmem:[%s637_s21] sm:$0x1f] %v5774_v27  ;;  %v8080_v27 = vld [vmem:[%s11830_s14 + $0x14] sm:$0xf] }
0x13a5   : > { %v5776_v28 = vpop.f32.mrf.mxu1 }
0x13a6   : > { %5780 = vst [vmem:[%s637_s21 + $0x8] sm:$0x1f] %v5776_v28  ;;  %v8089_v28 = vld [vmem:[%s11829_s13 + $0x1b8] sm:$0xff] }
0x13b3   : > { %v9369_v29 = vpop.f32.mrf.mxu1 }
0x13b4   : > { %9371 = vmatpush3.msra.mxu0 %v9369_v29 }
0x13b5   : > { %v5940_v32 = vpop.f32.mrf.mxu1  ;;  %9372 = vmatprep.subr.mxu0 %v9595_v33 }
0x13b6   : > { %9373 = vmatpush3.msra.mxu0 %v5940_v32  ;;  %v8086_v32 = vld [vmem:[%s11829_s13 + $0x1a0] sm:$0xff] }
0x13b7   : > { %9375 = vmatmul.mubr.msk.f32.vlgmr.msra.gmra.mxu0 %vm2570_vm3, %v8031_v30  ;;  %9384 = vmatprep.subr.mxu0 %v8041_v31  ;;  %v6093_v41 = vpop.f32.mrf.mxu1  ;;  %v8088_v30 = vld [vmem:[%s11829_s13 + $0x1b0] sm:$0xff] }
0x13b8   : > { %9385 = vmatpush3.msra.mxu0 %v8041_v31  ;;  %9400 = vmatprep.mubr.msk.f32.mxu0 %vm2395_vm2, %v10785_v12  ;;  %v8087_v31 = vld [vmem:[%s11829_s13 + $0x1a8] sm:$0xff] }
0x13b9   : > { %9386 = vmatprep.subr.mxu0 %v8040_v34  ;;  %v9383_v42 = vpop.f32.mrf.mxu1 }
0x13ba   : > { %9387 = vmatpush3.msra.mxu0 %v8040_v34  ;;  %v8085_v34 = vld [vmem:[%s11829_s13 + $0x198] sm:$0xff] }
0x13bb   : > { %9388 = vmatprep.subr.mxu0 %v8039_v35  ;;  %v8092_v42 = vld [vmem:[%s11830_s14 + $0x18] sm:$0xf] }
0x13bc   : > { %9389 = vmatpush3.msra.mxu0 %v8039_v35  ;;  %v8084_v35 = vld [vmem:[%s11829_s13 + $0x190] sm:$0xff] }
0x13bd   : > { %9390 = vmatprep.subr.mxu0 %v8038_v36 }
0x13be   : > { %9391 = vmatpush3.msra.mxu0 %v8038_v36  ;;  %v8083_v36 = vld [vmem:[%s11829_s13 + $0x188] sm:$0xff] }
0x13bf   : > { %9392 = vmatprep.subr.mxu0 %v8037_v37 }
0x13c0   : > { %9393 = vmatpush3.msra.mxu0 %v8037_v37  ;;  %v8082_v37 = vld [vmem:[%s11829_s13 + $0x180] sm:$0xff] }
0x13c1   : > { %9394 = vmatprep.subr.mxu0 %v8036_v38 }
0x13c2   : > { %9395 = vmatpush3.msra.mxu0 %v8036_v38 }
0x13c3   : > { %9396 = vmatprep.subr.mxu0 %v8035_v39 }
0x13c4   : > { %9397 = vmatpush3.msra.mxu0 %v8035_v39 }
0x13c5   : > { %9398 = vmatprep.subr.mxu0 %v8034_v40 }
0x13c6   : > { %9399 = vmatpush3.msra.mxu0 %v8034_v40 }
0x13c7   : > { %9401 = vmatmul.mubr.msk.f32.vlgmr.msra.gmra.mxu0 %vm2395_vm2, %v10787_v13  ;;  %9429 = vmatprep.subr.mxu0 %v9595_v33 }
0x13c8   : > { %9433 = vmatprep.mubr.msk.f32.mxu0 %vm9596_vm4, %v9595_v33 }
0x1477   : > { %v6020_v43 = vpop.f32.mrf.mxu0 }
0x1478   : > { %v6094_v57 = vadd.f32 %v6093_v41, %v6020_v43  ;;  %v8101_v43 = vld [vmem:[%s11829_s13 + $0x1f8] sm:$0xff] }
0x1479   : > { %v9376_v44 = vpop.f32.mrf.mxu0 }
0x1487   : > { %v9402_v45 = vpop.f32.mrf.mxu0 }
0x1488   : > { %9404 = vmatpush3.msra.mxu1 %v9402_v45  ;;  %v8100_v45 = vld [vmem:[%s11829_s13 + $0x1f0] sm:$0xff] }
0x1489   : > { %v6172_v48 = vpop.f32.mrf.mxu0  ;;  %9405 = vmatprep.subr.mxu1 %v9595_v33 }
0x148a   : > { %9406 = vmatpush3.msra.mxu1 %v6172_v48  ;;  %v8097_v48 = vld [vmem:[%s11829_s13 + $0x1d8] sm:$0xff] }
0x148b   : > { %9408 = vmatmul.mubr.msk.f32.vlgmr.msra.gmra.mxu1 %vm2570_vm3, %v8044_v46  ;;  %9410 = vmatprep.subr.mxu1 %v8053_v47  ;;  %v8099_v46 = vld [vmem:[%s11829_s13 + $0x1e8] sm:$0xff] }
0x148c   : > { %9411 = vmatpush3.msra.mxu1 %v8053_v47  ;;  %9426 = vmatprep.mubr.msk.f32.mxu1 %vm2395_vm2, %v10785_v12  ;;  %v8098_v47 = vld [vmem:[%s11829_s13 + $0x1e0] sm:$0xff] }
0x148d   : > { %9412 = vmatprep.subr.mxu1 %v8052_v49 }
0x148e   : > { %9413 = vmatpush3.msra.mxu1 %v8052_v49  ;;  %v8096_v49 = vld [vmem:[%s11829_s13 + $0x1d0] sm:$0xff] }
0x148f   : > { %9414 = vmatprep.subr.mxu1 %v8051_v50 }
0x1490   : > { %9415 = vmatpush3.msra.mxu1 %v8051_v50  ;;  %v8095_v50 = vld [vmem:[%s11829_s13 + $0x1c8] sm:$0xff] }
0x1491   : > { %9416 = vmatprep.subr.mxu1 %v8050_v51 }
0x1492   : > { %9417 = vmatpush3.msra.mxu1 %v8050_v51  ;;  %v8094_v51 = vld [vmem:[%s11829_s13 + $0x1c0] sm:$0xff] }
0x1493   : > { %9418 = vmatprep.subr.mxu1 %v8049_v52 }
0x1494   : > { %9419 = vmatpush3.msra.mxu1 %v8049_v52 }
0x1495   : > { %9420 = vmatprep.subr.mxu1 %v8048_v53 }
0x1496   : > { %9421 = vmatpush3.msra.mxu1 %v8048_v53 }
0x1497   : > { %9422 = vmatprep.subr.mxu1 %v8047_v54 }
0x1498   : > { %9423 = vmatpush3.msra.mxu1 %v8047_v54 }
0x1499   : > { %9424 = vmatprep.subr.mxu1 %v8046_v55 }
0x149a   : > { %9425 = vmatpush3.msra.mxu1 %v8046_v55 }
0x149b   : > { %9427 = vmatmul.mubr.msk.f32.vlgmr.msra.gmra.mxu1 %vm2395_vm2, %v10787_v13  ;;  %9455 = vmatprep.subr.mxu1 %v9595_v33 }
0x149c   : > { %9459 = vmatprep.mubr.msk.f32.mxu1 %vm9596_vm4, %v9595_v33 }
0x154b   : > { %v6252_v58 = vpop.f32.mrf.mxu1 }
0x154c   : > { %v6256_v59 = vadd.f32 %v6252_v58, %v6094_v57  ;;  %v8104_v57 = vld [vmem:[%s11830_s14 + $0x1c] sm:$0xf] }
0x154d   : > { %v9409_v60 = vpop.f32.mrf.mxu1  ;;  %v8113_v58 = vld [vmem:[%s11829_s13 + $0x238] sm:$0xff] }
0x154e   : > { %v8112_v60 = vld [vmem:[%s11829_s13 + $0x230] sm:$0xff] }
0x155b   : > { %v9428_v62 = vpop.f32.mrf.mxu1 }
0x155c   : > { %9430 = vmatpush3.msra.mxu0 %v9428_v62  ;;  %v8111_v62 = vld [vmem:[%s11829_s13 + $0x228] sm:$0xff] }
0x155d   : > { %v6332_v2 = vpop.f32.mrf.mxu1  ;;  %9431 = vmatprep.subr.mxu0 %v9595_v33 }
0x155e   : > { %9432 = vmatpush3.msra.mxu0 %v6332_v2  ;;  %v8107_v2 = vld [vmem:[%s11829_s13 + $0x208] sm:$0xff] }
0x155f   : > { %9434 = vmatmul.mubr.msk.f32.vlgmr.msra.gmra.mxu0 %vm2570_vm3, %v8056_v0  ;;  %9436 = vmatprep.subr.mxu0 %v8065_v1  ;;  %v8110_v0 = vld [vmem:[%s11829_s13 + $0x220] sm:$0xff] }
0x1560   : > { %9437 = vmatpush3.msra.mxu0 %v8065_v1  ;;  %9452 = vmatprep.mubr.msk.f32.mxu0 %vm2395_vm2, %v10785_v12  ;;  %v8109_v1 = vld [vmem:[%s11829_s13 + $0x218] sm:$0xff] }
0x1561   : > { %9438 = vmatprep.subr.mxu0 %v8064_v61 }
0x1562   : > { %9439 = vmatpush3.msra.mxu0 %v8064_v61  ;;  %v8106_v61 = vld [vmem:[%s11829_s13 + $0x200] sm:$0xff] }
0x1563   : > { %9440 = vmatprep.subr.mxu0 %v8063_v3 }
0x1564   : > { %9441 = vmatpush3.msra.mxu0 %v8063_v3 }
0x1565   : > { %9442 = vmatprep.subr.mxu0 %v8062_v4 }
0x1566   : > { %9443 = vmatpush3.msra.mxu0 %v8062_v4 }
0x1567   : > { %9444 = vmatprep.subr.mxu0 %v8061_v5 }
0x1568   : > { %9445 = vmatpush3.msra.mxu0 %v8061_v5 }
0x1569   : > { %9446 = vmatprep.subr.mxu0 %v8060_v6 }
0x156a   : > { %9447 = vmatpush3.msra.mxu0 %v8060_v6 }
0x156b   : > { %9448 = vmatprep.subr.mxu0 %v8059_v7 }
0x156c   : > { %9449 = vmatpush3.msra.mxu0 %v8059_v7  ;;  %v8116_v7 = vld [vmem:[%s11830_s14 + $0x20] sm:$0xf] }
0x156d   : > { %9450 = vmatprep.subr.mxu0 %v8058_v8 }
0x156e   : > { %9451 = vmatpush3.msra.mxu0 %v8058_v8 }
0x156f   : > { %9453 = vmatmul.mubr.msk.f32.vlgmr.msra.gmra.mxu0 %vm2395_vm2, %v10787_v13  ;;  %9481 = vmatprep.subr.mxu0 %v9595_v33 }
0x1570   : > { %9485 = vmatprep.mubr.msk.f32.mxu0 %vm9596_vm4, %v9595_v33 }
0x161f   : > { %v6412_v9 = vpop.f32.mrf.mxu0 }
0x1620   : > { %v6416_v10 = vadd.f32 %v6412_v9, %v6256_v59 }
0x1621   : > { %v9435_v56 = vpop.f32.mrf.mxu0 }
0x162f   : > { %v9454_v11 = vpop.f32.mrf.mxu0 }
0x1630   : > { %9456 = vmatpush3.msra.mxu1 %v9454_v11 }
0x1631   : > { %v6492_v16 = vpop.f32.mrf.mxu0  ;;  %9457 = vmatprep.subr.mxu1 %v9595_v33 }
0x1632   : > { %9458 = vmatpush3.msra.mxu1 %v6492_v16  ;;  %v7323_v16 = vld [vmem:[%s11834_s18 + $0x78] sm:$0xff] }
0x1633   : > { %9460 = vmatmul.mubr.msk.f32.vlgmr.msra.gmra.mxu1 %vm2570_vm3, %v8068_v14  ;;  %9462 = vmatprep.subr.mxu1 %v8077_v15 }
0x1634   : > { %9463 = vmatpush3.msra.mxu1 %v8077_v15  ;;  %9478 = vmatprep.mubr.msk.f32.mxu1 %vm2395_vm2, %v10785_v12  ;;  %v7225_v15 = vld [vmem:[%s11832_s16] sm:$0x1f] }
0x1635   : > { %9464 = vmatprep.subr.mxu1 %v8076_v17 }
0x1636   : > { %9465 = vmatpush3.msra.mxu1 %v8076_v17  ;;  %v7322_v17 = vld [vmem:[%s11834_s18 + $0x70] sm:$0xff] }
0x1637   : > { %9466 = vmatprep.subr.mxu1 %v8075_v18 }
0x1638   : > { %9467 = vmatpush3.msra.mxu1 %v8075_v18  ;;  %v7321_v18 = vld [vmem:[%s11834_s18 + $0x68] sm:$0xff] }
0x1639   : > { %9468 = vmatprep.subr.mxu1 %v8074_v63 }
0x163a   : > { %9469 = vmatpush3.msra.mxu1 %v8074_v63  ;;  %v7320_v63 = vld [vmem:[%s11834_s18 + $0x60] sm:$0xff] }
0x163b   : > { %9470 = vmatprep.subr.mxu1 %v8073_v19 }
0x163c   : > { %9471 = vmatpush3.msra.mxu1 %v8073_v19  ;;  %v7319_v19 = vld [vmem:[%s11834_s18 + $0x58] sm:$0xff] }
0x163d   : > { %9472 = vmatprep.subr.mxu1 %v8072_v20 }
0x163e   : > { %9473 = vmatpush3.msra.mxu1 %v8072_v20  ;;  %v7318_v20 = vld [vmem:[%s11834_s18 + $0x50] sm:$0xff] }
0x163f   : > { %9474 = vmatprep.subr.mxu1 %v8071_v21 }
0x1640   : > { %9475 = vmatpush3.msra.mxu1 %v8071_v21  ;;  %v7317_v21 = vld [vmem:[%s11834_s18 + $0x48] sm:$0xff] }
0x1641   : > { %9476 = vmatprep.subr.mxu1 %v8070_v22 }
0x1642   : > { %9477 = vmatpush3.msra.mxu1 %v8070_v22  ;;  %v7316_v22 = vld [vmem:[%s11834_s18 + $0x40] sm:$0xff] }
0x1643   : > { %9479 = vmatmul.mubr.msk.f32.vlgmr.msra.gmra.mxu1 %vm2395_vm2, %v10787_v13  ;;  %9507 = vmatprep.subr.mxu1 %v9595_v33 }
0x1644   : > { %9511 = vmatprep.mubr.msk.f32.mxu1 %vm9596_vm4, %v9595_v33 }
0x16f3   : > { %v6572_v23 = vpop.f32.mrf.mxu1 }
0x16f4   : > { %v6576_v24 = vadd.f32 %v6572_v23, %v6416_v10  ;;  %v7221_v10 = vpop.permute.xlu0 %7220  ;;  %v7314_v23 = vld [vmem:[%s11834_s18 + $0x30] sm:$0xff] }
0x16f5   : > { %v9461_v25 = vpop.f32.mrf.mxu1 }
0x16f6   : > { %v7312_v25 = vld [vmem:[%s11834_s18 + $0x20] sm:$0xff] }
0x1703   : > { %v9480_v26 = vpop.f32.mrf.mxu1 }
0x1704   : > { %9482 = vmatpush3.msra.mxu0 %v9480_v26  ;;  %v7311_v26 = vld [vmem:[%s11834_s18 + $0x18] sm:$0xff] }
0x1705   : > { %v6652_v29 = vpop.f32.mrf.mxu1  ;;  %9483 = vmatprep.subr.mxu0 %v9595_v33 }
0x1706   : > { %9484 = vmatpush3.msra.mxu0 %v6652_v29  ;;  %v7308_v29 = vld [vmem:[%s11834_s18] sm:$0xff] }
0x1707   : > { %9486 = vmatmul.mubr.msk.f32.vlgmr.msra.gmra.mxu0 %vm2570_vm3, %v8080_v27  ;;  %9488 = vmatprep.subr.mxu0 %v8089_v28  ;;  %v7310_v27 = vld [vmem:[%s11834_s18 + $0x10] sm:$0xff] }
0x1708   : > { %9489 = vmatpush3.msra.mxu0 %v8089_v28  ;;  %9504 = vmatprep.mubr.msk.f32.mxu0 %vm2395_vm2, %v10785_v12  ;;  %v7309_v28 = vld [vmem:[%s11834_s18 + $0x8] sm:$0xff] }
0x1709   : > { %9490 = vmatprep.subr.mxu0 %v8088_v30 }
0x170a   : > { %9491 = vmatpush3.msra.mxu0 %v8088_v30  ;;  %v7230_v30 = vpop.permute.xlu1 %7229 }
0x170b   : > { %9492 = vmatprep.subr.mxu0 %v8087_v31 }
0x170c   : > { %9493 = vmatpush3.msra.mxu0 %v8087_v31 }
0x170d   : > { %9494 = vmatprep.subr.mxu0 %v8086_v32 }
0x170e   : > { %9495 = vmatpush3.msra.mxu0 %v8086_v32 }
0x170f   : > { %9496 = vmatprep.subr.mxu0 %v8085_v34 }
0x1710   : > { %9497 = vmatpush3.msra.mxu0 %v8085_v34 }
0x1711   : > { %9498 = vmatprep.subr.mxu0 %v8084_v35 }
0x1712   : > { %9499 = vmatpush3.msra.mxu0 %v8084_v35 }
0x1713   : > { %9500 = vmatprep.subr.mxu0 %v8083_v36 }
0x1714   : > { %9501 = vmatpush3.msra.mxu0 %v8083_v36 }
0x1715   : > { %9502 = vmatprep.subr.mxu0 %v8082_v37 }
0x1716   : > { %9503 = vmatpush3.msra.mxu0 %v8082_v37 }
0x1717   : > { %9505 = vmatmul.mubr.msk.f32.vlgmr.msra.gmra.mxu0 %vm2395_vm2, %v10787_v13  ;;  %9533 = vmatprep.subr.mxu0 %v9595_v33 }
0x1718   : > { %9537 = vmatprep.mubr.msk.f32.mxu0 %vm9596_vm4, %v9595_v33 }
0x17c7   : > { %v6732_v38 = vpop.f32.mrf.mxu0 }
0x17c8   : > { %v6736_v39 = vadd.f32 %v6732_v38, %v6576_v24  ;;  %v7313_v24 = vld [vmem:[%s11834_s18 + $0x28] sm:$0xff] }
0x17c9   : > { %v9487_v40 = vpop.f32.mrf.mxu0 }
0x17d7   : > { %v9506_v41 = vpop.f32.mrf.mxu0 }
0x17d8   : > { %9508 = vmatpush3.msra.mxu1 %v9506_v41 }
0x17d9   : > { %v6812_v44 = vpop.f32.mrf.mxu0  ;;  %9509 = vmatprep.subr.mxu1 %v9595_v33 }
0x17da   : > { %9510 = vmatpush3.msra.mxu1 %v6812_v44 }
0x17db   : > { %9512 = vmatmul.mubr.msk.f32.vlgmr.msra.gmra.mxu1 %vm2570_vm3, %v8092_v42  ;;  %9514 = vmatprep.subr.mxu1 %v8101_v43 }
0x17dc   : > { %9515 = vmatpush3.msra.mxu1 %v8101_v43  ;;  %9530 = vmatprep.mubr.msk.f32.mxu1 %vm2395_vm2, %v10785_v12 }
0x17dd   : > { %9516 = vmatprep.subr.mxu1 %v8100_v45 }
0x17de   : > { %9517 = vmatpush3.msra.mxu1 %v8100_v45 }
0x17df   : > { %9518 = vmatprep.subr.mxu1 %v8099_v46 }
0x17e0   : > { %9519 = vmatpush3.msra.mxu1 %v8099_v46 }
0x17e1   : > { %9520 = vmatprep.subr.mxu1 %v8098_v47 }
0x17e2   : > { %9521 = vmatpush3.msra.mxu1 %v8098_v47 }
0x17e3   : > { %9522 = vmatprep.subr.mxu1 %v8097_v48 }
0x17e4   : > { %9523 = vmatpush3.msra.mxu1 %v8097_v48 }
0x17e5   : > { %9524 = vmatprep.subr.mxu1 %v8096_v49 }
0x17e6   : > { %9525 = vmatpush3.msra.mxu1 %v8096_v49 }
0x17e7   : > { %9526 = vmatprep.subr.mxu1 %v8095_v50 }
0x17e8   : > { %9527 = vmatpush3.msra.mxu1 %v8095_v50 }
0x17e9   : > { %9528 = vmatprep.subr.mxu1 %v8094_v51 }
0x17ea   : > { %9529 = vmatpush3.msra.mxu1 %v8094_v51 }
0x17eb   : > { %9531 = vmatmul.mubr.msk.f32.vlgmr.msra.gmra.mxu1 %vm2395_vm2, %v10787_v13  ;;  %9559 = vmatprep.subr.mxu1 %v9595_v33 }
0x17ec   : > { %9563 = vmatprep.mubr.msk.f32.mxu1 %vm9596_vm4, %v9595_v33 }
0x189b   : > { %v6892_v52 = vpop.f32.mrf.mxu1 }
0x189c   : > { %v6896_v53 = vadd.f32 %v6892_v52, %v6736_v39 }
0x189d   : > { %v9513_v54 = vpop.f32.mrf.mxu1 }
0x18ab   : > { %v9532_v55 = vpop.f32.mrf.mxu1 }
0x18ac   : > { %9534 = vmatpush3.msra.mxu0 %v9532_v55 }
0x18ad   : > { %v6972_v59 = vpop.f32.mrf.mxu1  ;;  %9535 = vmatprep.subr.mxu0 %v9595_v33 }
0x18ae   : > { %9536 = vmatpush3.msra.mxu0 %v6972_v59 }
0x18af   : > { %9538 = vmatmul.mubr.msk.f32.vlgmr.msra.gmra.mxu0 %vm2570_vm3, %v8104_v57  ;;  %9540 = vmatprep.subr.mxu0 %v8113_v58 }
0x18b0   : > { %9541 = vmatpush3.msra.mxu0 %v8113_v58  ;;  %9556 = vmatprep.mubr.msk.f32.mxu0 %vm2395_vm2, %v10785_v12  ;;  %v8108_v12 = vld [vmem:[%s11829_s13 + $0x210] sm:$0xff] }
0x18b1   : > { %9542 = vmatprep.subr.mxu0 %v8112_v60 }
0x18b2   : > { %9543 = vmatpush3.msra.mxu0 %v8112_v60 }
0x18b3   : > { %9544 = vmatprep.subr.mxu0 %v8111_v62 }
0x18b4   : > { %9545 = vmatpush3.msra.mxu0 %v8111_v62 }
0x18b5   : > { %9546 = vmatprep.subr.mxu0 %v8110_v0 }
0x18b6   : > { %9547 = vmatpush3.msra.mxu0 %v8110_v0 }
0x18b7   : > { %9548 = vmatprep.subr.mxu0 %v8109_v1 }
0x18b8   : > { %9549 = vmatpush3.msra.mxu0 %v8109_v1 }
0x18b9   : > { %9550 = vmatprep.subr.mxu0 %v8108_v12 }
0x18ba   : > { %9551 = vmatpush3.msra.mxu0 %v8108_v12 }
0x18bb   : > { %9552 = vmatprep.subr.mxu0 %v8107_v2 }
0x18bc   : > { %9553 = vmatpush3.msra.mxu0 %v8107_v2 }
0x18bd   : > { %9554 = vmatprep.subr.mxu0 %v8106_v61 }
0x18be   : > { %9555 = vmatpush3.msra.mxu0 %v8106_v61 }
0x18bf   : > { %9557 = vmatmul.mubr.msk.f32.vlgmr.msra.gmra.mxu0 %vm2395_vm2, %v10787_v13 }
0x196f   : > { %v7052_v3 = vpop.f32.mrf.mxu0 }
0x1970   : > { %v7056_v4 = vadd.f32 %v7052_v3, %v6896_v53 }
0x1971   : > { %v9539_v5 = vpop.f32.mrf.mxu0 }
0x197f   : > { %v9558_v6 = vpop.f32.mrf.mxu0 }
0x1980   : > { %9560 = vmatpush3.msra.mxu1 %v9558_v6 }
0x1981   : > { %v7132_v8 = vpop.f32.mrf.mxu0  ;;  %9561 = vmatprep.subr.mxu1 %v9595_v33 }
0x1982   : > { %9562 = vmatpush3.msra.mxu1 %v7132_v8 }
0x1983   : > { %9564 = vmatmul.mubr.msk.f32.vlgmr.msra.gmra.mxu1 %vm2570_vm3, %v8116_v7  ;;  %9566 = vmatprep.subr.mxu1 %v9595_v33 }
0x1984   : > { %9568 = vmatprep.mubr.msk.f32.mxu1 %vm9596_vm4, %v9595_v33 }
0x1a43   : > { %v7212_v13 = vpop.f32.mrf.mxu1 }
0x1a44   : > { %v7216_v9 = vadd.f32 %v7212_v13, %v7056_v4 }
0x1a45   : > { %v9565_v56 = vpop.f32.mrf.mxu1 }
0x1a46   : > { %v7223_v11 = vadd.f32 %v7221_v10, %v7216_v9 }
0x1a48   : > { %v7224_v14 = vmax.f32 %v7223_v11, 0.0 }
0x1a4a   : > { %9567 = vmatpush3.msk.msra.mxu1 %vm864_vm1, %v7224_v14 }
0x1a4b   : > { %9569 = vmatmul.mubr.msk.f32.vlgmr.msra.gmra.mxu1 %vm857_vm0, %v7225_v15  ;;  %7343 = vmatprep.subr.mxu1 %v7323_v16 }
0x1a4c   : > { %7344 = vmatpush1.msra.mxu1 %v7322_v17  ;;  %7391 = vmatprep.mubr.f32.mxu1 %v9595_v33  ;;  %v7315_v33 = vld [vmem:[%s11834_s18 + $0x38] sm:$0xff] }
0x1a4d   : > { %7345 = vmatprep.subr.mxu1 %v7321_v18 }
0x1a4e   : > { %7346 = vmatpush1.msra.mxu1 %v7320_v63 }
0x1a4f   : > { %7347 = vmatprep.subr.mxu1 %v7319_v19 }
0x1a50   : > { %7348 = vmatpush1.msra.mxu1 %v7318_v20 }
0x1a51   : > { %7349 = vmatprep.subr.mxu1 %v7317_v21 }
0x1a52   : > { %7350 = vmatpush1.msra.mxu1 %v7316_v22 }
0x1a53   : > { %7351 = vmatprep.subr.mxu1 %v7315_v33 }
0x1a54   : > { %7352 = vmatpush1.msra.mxu1 %v7314_v23 }
0x1a55   : > { %7353 = vmatprep.subr.mxu1 %v7313_v24 }
0x1a56   : > { %7354 = vmatpush1.msra.mxu1 %v7312_v25 }
0x1a57   : > { %7355 = vmatprep.subr.mxu1 %v7311_v26 }
0x1a58   : > { %7356 = vmatpush1.msra.mxu1 %v7310_v27 }
0x1a59   : > { %7357 = vmatprep.subr.mxu1 %v7309_v28 }
0x1a5a   : > { %7358 = vmatpush1.msra.mxu1 %v7308_v29 }
0x1b0b   : > { %v7304_v31 = vpop.f32.mrf.mxu1 }
0x1b0c   : > { %v7305_v32 = vadd.f32 %v7304_v31, %v7230_v30 }
0x1b0d   : > { %v9570_v34 = vpop.f32.mrf.mxu1 }
0x1b0e   : > { %8120 = vmatmul.mubr.msk.f32.vlgmr.msra.gmra.mxu1 %vm2395_vm2, %v7305_v32 }
0x1bce   : > { %v7393_v35 = vpop.f32.mrf.mxu1 }
0x1bcf   : > { %7398 = vst [vmem:[%s642_s24] sm:$0x1f] %v7393_v35 }
0x1bd0   : > { %v7395_v36 = vpop.f32.mrf.mxu1 }
0x1bd1   : > { %7399 = vst [vmem:[%s642_s24 + $0x8] sm:$0x1f] %v7395_v36 }
0x1bd2 PF: > { %s11856_s29 = sld [smem:[#allocation2_spill]] }
0x1bd8   : > { %s31_s1 = sadd.s32 1, %s11856_s29  }
0x1bd9   : > { %p28_p4 = scmp.ge.s32.totalorder %s31_s1, 4  }
0x1bdb   :  { %30 = sbr.rel (!%p28_p4) target bundleno = 6 (0x6), region = 202 }

</bundles_post_ra>
